<compile_context>
chip_gen: v7x
topology: tpu7x:2x2x1
jax: 0.10.0
libtpu: 0.0.40
codegen_flags: <defaults>
</compile_context>

<pallas_src>
import jax
import jax.numpy as jnp
from jax.experimental import pallas as pl
from jax.experimental.pallas import tpu as pltpu

_NEG = -3.0e38  # "-inf" stand-in that stays finite through f32 matmuls


def _ingram_relation_kernel(head_ref, eh_ref, et_ref, side_ref,
                            wah_ref, wet_ref, bfus_ref, vbd_ref, eaug_ref,
                            out_ref, acc_ref, m_ref):
    t = pl.program_id(1)
    n_t = pl.num_programs(1)
    r_blk = out_ref.shape[0]
    dim_out = out_ref.shape[1]
    H = vbd_ref.shape[1]
    Tt = eh_ref.shape[0]

    @pl.when(t == 0)
    def _():
        acc_ref[...] = jnp.zeros_like(acc_ref)
        m_ref[...] = jnp.full_like(m_ref, _NEG)

    e_aug = eaug_ref[...]                                     # [H, H+D_out] f32

    # Fused et-side projection (compute_dtype x compute_dtype -> f32 on MXU):
    #   lanes [0, D_out)        : attn_proj tail-half contribution (+ b_attn)
    #   lanes [D_out, D_out+H)  : constant 1.0 (softmax denominator source)
    #   lanes [D_out+H, ...)    : aggr_proj (+ b_aggr)
    et_proj = jnp.dot(et_ref[...], wet_ref[...],
                      preferred_element_type=jnp.float32) + bfus_ref[...]
    a = jnp.dot(eh_ref[...], wah_ref[...],
                preferred_element_type=jnp.float32) + et_proj[:, :dim_out]
    a = jnp.where(a >= 0, a, jnp.float32(0.2) * a)            # LeakyReLU(0.2)
    agg_aug = et_proj[:, dim_out:]                            # [Tt, H+D_out]

    side = side_ref[...]                                      # [Tt, H+1] f32
    # per-head logit via block-diagonal matmul + bin bias (gathered in wrapper)
    score = jnp.dot(a, vbd_ref[...],
                    preferred_element_type=jnp.float32) + side[:, :H]

    # in-block / non-padded mask; head index rides as f32 in side's last lane,
    # giving a [Tt, 1] column without a lane-width-1 BlockSpec or a transpose.
    r0 = pl.program_id(0) * r_blk
    r0_f = r0.astype(jnp.float32)
    head_col = side[:, H:]                                    # [Tt, 1]
    in_blk = jnp.logical_and(head_col >= r0_f,
                             head_col < r0_f + jnp.float32(r_blk))
    masked = jnp.where(in_blk, score, jnp.float32(_NEG))      # [Tt, H]

    # expand per-head columns to the [denom | numer] lane layout with a 0/1
    # selection matmul (each e_aug column has exactly one 1 -> pure copy).
    masked_exp = jnp.dot(masked, e_aug,
                         preferred_element_type=jnp.float32)  # [Tt, H+D_out]

    # per-head online running max over the T sweep (in-block triplets only).
    # Numerator and denominator carry the same shift, so it cancels exactly in
    # the final divide; masking keeps out-of-block / padded rows from driving
    # the shift (underflow only if an in-block segment sits >~87 below the
    # block max for its head).
    m_old = m_ref[...]
    m_new = jnp.maximum(m_old, jnp.max(masked_exp, axis=0, keepdims=True))
    m_ref[...] = m_new
    rescale = jnp.exp(m_old - m_new)                          # [1, H+D_out]

    fused = jnp.exp(masked_exp - m_new) * agg_aug             # [Tt, H+D_out]

    # [R_blk, Tt] one-hot scatter: denominator + numerator in ONE f32 matmul.
    rt_oh = ((jax.lax.broadcasted_iota(jnp.int32, (r_blk, Tt), 0) + r0)
             == head_ref[...]).astype(jnp.float32)
    acc_ref[...] = acc_ref[...] * rescale + jnp.dot(
        rt_oh, fused, preferred_element_type=jnp.float32)

    @pl.when(t == n_t - 1)
    def _():
        acc = acc_ref[...]
        d = acc[:, :H] + jnp.float32(1e-16)                   # [R_blk, H]
        inv = pl.reciprocal(d, approx=True)
        inv = inv * (jnp.float32(2.0) - d * inv)              # one Newton step
        out_ref[...] = acc[:, H:] * jnp.dot(
            inv, e_aug[:, H:], preferred_element_type=jnp.float32)


def ingram_relation_forward(emb_rel, relation_triplets, params, num_head=8,
                            t_tile=512, r_block=256,
                            compute_dtype=jnp.bfloat16):
    """Pallas-backed forward pass of InGramRelationLayer."""
    emb_rel = jnp.asarray(emb_rel, jnp.float32)
    triplets = jnp.asarray(relation_triplets)
    head_idxs = triplets[:, 0].astype(jnp.int32)
    tail_idxs = triplets[:, 1].astype(jnp.int32)
    bin_idxs = triplets[:, 2].astype(jnp.int32)

    num_rel, dim_in = emb_rel.shape
    dim_out = params["w_attn"].shape[1]
    H = num_head
    dim_hid = dim_out // H
    assert dim_out == dim_hid * H

    # ---- glue done in plain JAX (data-dependent gathers) ---------------------
    eh = emb_rel[head_idxs].astype(compute_dtype)
    et = emb_rel[tail_idxs].astype(compute_dtype)
    bin_bias = params["attn_bin"].astype(jnp.float32)[bin_idxs]         # [T, H]
    # head index rides along with the bin bias -> [Tt, 1] mask column in-kernel
    side = jnp.concatenate(
        [bin_bias, head_idxs.astype(jnp.float32)[:, None]], axis=1)     # [T, H+1]

    # ---- T padding (large lane-aligned tiles; clamp to padded triplet count) -
    T = int(head_idxs.shape[0])
    t_tile = max(128, (int(t_tile) // 128) * 128)
    t_tile = min(t_tile, ((T + 127) // 128) * 128)
    T_pad = ((T + t_tile - 1) // t_tile) * t_tile
    if T_pad != T:
        pad = T_pad - T
        head_idxs = jnp.concatenate([head_idxs, jnp.full((pad,), -1, jnp.int32)])
        eh = jnp.concatenate([eh, jnp.zeros((pad, dim_in), eh.dtype)])
        et = jnp.concatenate([et, jnp.zeros((pad, dim_in), et.dtype)])
        side = jnp.concatenate(
            [side,
             jnp.concatenate([jnp.zeros((pad, H), jnp.float32),
                              jnp.full((pad, 1), -1.0, jnp.float32)], axis=1)])

    # ---- R padding: single block by default -> no recompute across R blocks --
    if num_rel <= r_block:
        r_block_eff = ((num_rel + 7) // 8) * 8
    else:
        r_block_eff = ((int(r_block) + 7) // 8) * 8
    R_pad = ((num_rel + r_block_eff - 1) // r_block_eff) * r_block_eff

    # ---- static derived parameter matrices (built once in the wrapper) -------
    w_attn = params["w_attn"].astype(jnp.float32)
    w_attn_h = w_attn[:dim_in].astype(compute_dtype)
    # fused et-side weight: [w_attn_t | zeros (ones come from the bias) | w_aggr]
    w_et_fused = jnp.concatenate(
        [w_attn[dim_in:], jnp.zeros((dim_in, H), jnp.float32),
         params["w_aggr"].astype(jnp.float32)], axis=1).astype(compute_dtype)
    b_fused = jnp.concatenate(
        [params["b_attn"].astype(jnp.float32).reshape(1, dim_out),
         jnp.ones((1, H), jnp.float32),
         params["b_aggr"].astype(jnp.float32).reshape(1, dim_out)], axis=1)
    attn_vec = params["attn_vec"].astype(jnp.float32)                   # [H, Dh]
    eye_h = jnp.eye(H, dtype=jnp.float32)
    # block-diagonal [D_out, H]: (a @ v_bd)[t,h] == sum_d a[t, h*Dh+d] * vec[h,d]
    v_bd = (attn_vec[:, :, None] * eye_h[:, None, :]).reshape(dim_out, H)
    # [H, H+D_out] = [I_H | per-head expansion]; e_exp is its lane slice [:, H:]
    e_aug = jnp.concatenate([eye_h, jnp.repeat(eye_h, dim_hid, axis=1)], axis=1)

    head2d = head_idxs[None, :]                                         # [1, T_pad]

    n_r = R_pad // r_block_eff
    n_t = T_pad // t_tile

    def _const(shape):
        return pl.BlockSpec(shape, lambda r, t: (0, 0))

    grid_spec = pltpu.PrefetchScalarGridSpec(
        num_scalar_prefetch=0,
        grid=(n_r, n_t),
        in_specs=[
            pl.BlockSpec((1, t_tile), lambda r, t: (0, t)),             # head ids
            pl.BlockSpec((t_tile, dim_in), lambda r, t: (t, 0)),        # eh
            pl.BlockSpec((t_tile, dim_in), lambda r, t: (t, 0)),        # et
            pl.BlockSpec((t_tile, H + 1), lambda r, t: (t, 0)),         # bin bias | head
            _const((dim_in, dim_out)),                                  # w_attn_h
            _const((dim_in, 2 * dim_out + H)),                          # w_et_fused
            _const((1, 2 * dim_out + H)),                               # b_fused
            _const((dim_out, H)),                                       # v_bd
            _const((H, H + dim_out)),                                   # e_aug
        ],
        out_specs=pl.BlockSpec((r_block_eff, dim_out), lambda r, t: (r, 0)),
        scratch_shapes=[
            pltpu.VMEM((r_block_eff, H + dim_out), jnp.float32),        # fused acc
            pltpu.VMEM((1, H + dim_out), jnp.float32),                  # running max
        ],
    )

    # VMEM footprint at these defaults is tiny; re-budget against v7x's 64 MiB
    # if dim_in/dim_out grow to production sizes with t_tile~1024.
    out = pl.pallas_call(
        _ingram_relation_kernel,
        out_shape=jax.ShapeDtypeStruct((R_pad, dim_out), jnp.float32),
        grid_spec=grid_spec,
        compiler_params=pltpu.CompilerParams(
            dimension_semantics=("parallel", "arbitrary"),
            vmem_limit_bytes=64 * 1024 * 1024),
    )(head2d, eh, et, side, w_attn_h, w_et_fused, b_fused, v_bd, e_aug)

    return out[:num_rel]


def reference_forward(emb_rel, relation_triplets, params, num_head):
    """Pure-JAX reference mirroring the PyTorch module."""
    head = relation_triplets[:, 0]
    tail = relation_triplets[:, 1]
    bins = relation_triplets[:, 2]
    num_rel = emb_rel.shape[0]
    dim_out = params["w_attn"].shape[1]
    dim_hid = dim_out // num_head

    concat = jnp.concatenate([emb_rel[head], emb_rel[tail]], axis=-1)
    a = concat @ params["w_attn"] + params["b_attn"]
    a = jnp.where(a >= 0, a, 0.2 * a).reshape(-1, num_head, dim_hid)
    raw = jnp.sum(a * params["attn_vec"][None], axis=-1) + params["attn_bin"][bins]
    seg_max = jnp.full((num_rel, num_head), -jnp.inf, jnp.float32).at[head].max(raw)
    attn_val = jnp.exp(raw - seg_max[head])
    sums = jnp.zeros((num_rel, num_head), jnp.float32).at[head].add(attn_val)
    beta = attn_val / (sums[head] + 1e-16)
    agg = (emb_rel[tail] @ params["w_aggr"] + params["b_aggr"]).reshape(
        -1, num_head, dim_hid)
    out = jnp.zeros((num_rel, num_head, dim_hid), jnp.float32).at[head].add(
        beta[..., None] * agg)
    return out.reshape(num_rel, dim_out)


def init_params(key, dim_in_rel, dim_out_rel, num_bin, num_head):
    """Deterministic synthetic init matching the module's parameter shapes."""
    dim_hid = dim_out_rel // num_head
    gain = jnp.sqrt(2.0)  # calculate_gain('relu')
    k1, k2, k3 = jax.random.split(key, 3)

    std_attn = gain * jnp.sqrt(2.0 / (2 * dim_in_rel + dim_out_rel))
    w_attn = (jax.random.normal(k1, (2 * dim_in_rel, dim_out_rel), jnp.float32)
              * std_attn)
    b_attn = jnp.zeros((1, dim_out_rel), jnp.float32)

    std_aggr = gain * jnp.sqrt(2.0 / (dim_in_rel + dim_out_rel))
    w_aggr = (jax.random.normal(k2, (dim_in_rel, dim_out_rel), jnp.float32)
              * std_aggr)
    b_aggr = jnp.zeros((1, dim_out_rel), jnp.float32)

    std_vec = gain * jnp.sqrt(2.0 / (num_head * dim_hid + dim_hid))
    attn_vec = jax.random.normal(k3, (num_head, dim_hid), jnp.float32) * std_vec
    attn_bin = jnp.zeros((num_bin, num_head), jnp.float32)

    return dict(w_attn=w_attn, b_attn=b_attn, w_aggr=w_aggr, b_aggr=b_aggr,
                attn_vec=attn_vec, attn_bin=attn_bin)


if __name__ == "__main__":
    num_rel = 64
    dim_in_rel = 32
    dim_out_rel = 32
    num_head = 8
    num_bin = 10
    num_triplets = 300   # non-multiple of 128 -> exercises T padding

    key = jax.random.PRNGKey(0)
    k_emb, k_head, k_tail, k_bin, k_par = jax.random.split(key, 5)

    emb_rel = jax.random.normal(k_emb, (num_rel, dim_in_rel), jnp.float32)
    heads = jax.random.randint(k_head, (num_triplets,), 0, num_rel, jnp.int32)
    tails = jax.random.randint(k_tail, (num_triplets,), 0, num_rel, jnp.int32)
    bins = jax.random.randint(k_bin, (num_triplets,), 0, num_bin, jnp.int32)
    relation_triplets = jnp.stack([heads, tails, bins], axis=-1)       # [T, 3]

    params = init_params(k_par, dim_in_rel, dim_out_rel, num_bin, num_head)
    # non-zero attn_bin so the bin-bias path is actually exercised
    params["attn_bin"] = 0.1 * jax.random.normal(
        jax.random.PRNGKey(7), (num_bin, num_head), jnp.float32)

    ref = jax.block_until_ready(
        reference_forward(emb_rel, relation_triplets, params, num_head))

    # 1) fast path (defaults): bf16 MXU inputs, single R block, one big T tile.
    out_fast = jax.block_until_ready(
        ingram_relation_forward(emb_rel, relation_triplets, params,
                                num_head=num_head))
    assert out_fast.shape == (num_rel, dim_out_rel)
    err_fast = float(jnp.max(jnp.abs(out_fast - ref)))
    assert jnp.allclose(out_fast, ref, atol=1e-1, rtol=1e-1), \
        f"bf16 path max abs err {err_fast}"

    # 2) exactness path: f32 MXU inputs, multi-block grid (2 R blocks x 3 T
    #    tiles) -> validates the online max / accumulator logic bit-tightly.
    out_f32 = jax.block_until_ready(
        ingram_relation_forward(emb_rel, relation_triplets, params,
                                num_head=num_head, t_tile=128, r_block=32,
                                compute_dtype=jnp.float32))
    err_f32 = float(jnp.max(jnp.abs(out_f32 - ref)))
    assert jnp.allclose(out_f32, ref, atol=5e-4, rtol=5e-4), \
        f"f32 path max abs err {err_f32}"

    print("KERNEL_OK")
</pallas_src>

<mosaic_0001>
module attributes {stable_mosaic.version = 11 : i64} {
  func.func @_ingram_relation_kernel(%arg0: i32, %arg1: i32, %arg2: memref<1x384xi32, #tpu.memory_space<vmem>>, %arg3: memref<384x32xbf16, #tpu.memory_space<vmem>>, %arg4: memref<384x32xbf16, #tpu.memory_space<vmem>>, %arg5: memref<384x9xf32, #tpu.memory_space<vmem>>, %arg6: memref<32x32xbf16, #tpu.memory_space<vmem>>, %arg7: memref<32x72xbf16, #tpu.memory_space<vmem>>, %arg8: memref<1x72xf32, #tpu.memory_space<vmem>>, %arg9: memref<32x8xf32, #tpu.memory_space<vmem>>, %arg10: memref<8x40xf32, #tpu.memory_space<vmem>>, %arg11: memref<64x32xf32, #tpu.memory_space<vmem>>, %arg12: memref<64x40xf32, #tpu.memory_space<vmem>>, %arg13: memref<1x40xf32, #tpu.memory_space<vmem>>) attributes {dimension_semantics = [#tpu.dimension_semantics<parallel>, #tpu.dimension_semantics<arbitrary>], iteration_bounds = array<i64: 1, 1>, scalar_prefetch = 0 : i64, scratch_operands = 2 : i64, tpu.core_type = #tpu.core_type<tc>, window_params = [{transform_indices = @transform_0, window_bounds = array<i64: 1, 384>}, {transform_indices = @transform_1, window_bounds = array<i64: 384, 32>}, {transform_indices = @transform_2, window_bounds = array<i64: 384, 32>}, {transform_indices = @transform_3, window_bounds = array<i64: 384, 9>}, {pipeline_mode = #tpu.pipeline_mode<synchronous>, transform_indices = @transform_4, window_bounds = array<i64: 32, 32>}, {pipeline_mode = #tpu.pipeline_mode<synchronous>, transform_indices = @transform_5, window_bounds = array<i64: 32, 72>}, {pipeline_mode = #tpu.pipeline_mode<synchronous>, transform_indices = @transform_6, window_bounds = array<i64: 1, 72>}, {pipeline_mode = #tpu.pipeline_mode<synchronous>, transform_indices = @transform_7, window_bounds = array<i64: 32, 8>}, {pipeline_mode = #tpu.pipeline_mode<synchronous>, transform_indices = @transform_8, window_bounds = array<i64: 8, 40>}, {transform_indices = @transform_9, window_bounds = array<i64: 64, 32>}]} {
    %c0_i32 = arith.constant 0 : i32
    %0 = arith.cmpi eq, %arg1, %c0_i32 : i32
    %1 = arith.extui %0 : i1 to i32
    %c0_i32_0 = arith.constant 0 : i32
    %2 = arith.cmpi ne, %1, %c0_i32_0 : i32
    scf.if %2 {
      %cst_37 = arith.constant 0.000000e+00 : f32
      %68 = vector.broadcast %cst_37 : f32 to vector<64x40xf32>
      %c0_38 = arith.constant 0 : index
      %c0_39 = arith.constant 0 : index
      %69 = vector.load %arg12[%c0_38, %c0_39] : memref<64x40xf32, #tpu.memory_space<vmem>>, vector<64x40xf32>
      tpu.vector_store %arg12[%c0_38, %c0_39], %68 {strides = array<i32>} : memref<64x40xf32, #tpu.memory_space<vmem>>, vector<64x40xf32>,
      %cst_40 = arith.constant -3.000000e+38 : f32
      %70 = vector.broadcast %cst_40 : f32 to vector<1x40xf32>
      %c0_41 = arith.constant 0 : index
      %c0_42 = arith.constant 0 : index
      %71 = vector.load %arg13[%c0_41, %c0_42] : memref<1x40xf32, #tpu.memory_space<vmem>>, vector<1x40xf32>
      tpu.vector_store %arg13[%c0_41, %c0_42], %70 {strides = array<i32>} : memref<1x40xf32, #tpu.memory_space<vmem>>, vector<1x40xf32>,
    } else {
    }
    %c0 = arith.constant 0 : index
    %c0_1 = arith.constant 0 : index
    %3 = vector.load %arg10[%c0, %c0_1] : memref<8x40xf32, #tpu.memory_space<vmem>>, vector<8x40xf32>
    %c0_2 = arith.constant 0 : index
    %c0_3 = arith.constant 0 : index
    %4 = vector.load %arg4[%c0_2, %c0_3] : memref<384x32xbf16, #tpu.memory_space<vmem>>, vector<384x32xbf16>
    %c0_4 = arith.constant 0 : index
    %c0_5 = arith.constant 0 : index
    %5 = vector.load %arg7[%c0_4, %c0_5] : memref<32x72xbf16, #tpu.memory_space<vmem>>, vector<32x72xbf16>
    %cst = arith.constant dense<0.000000e+00> : vector<384x72xf32>
    %6 = tpu.matmul %4, %5, %cst {dimension_numbers = #tpu.dot_dimension_numbers<[1], [0], [0], [1], [0, 0, 1, 1], [], []>} : vector<384x32xbf16>, vector<32x72xbf16>, vector<384x72xf32> -> vector<384x72xf32>
    %c0_6 = arith.constant 0 : index
    %c0_7 = arith.constant 0 : index
    %7 = vector.load %arg8[%c0_6, %c0_7] : memref<1x72xf32, #tpu.memory_space<vmem>>, vector<1x72xf32>
    %8 = vector.broadcast %7 : vector<1x72xf32> to vector<384x72xf32>
    %9 = arith.addf %6, %8 : vector<384x72xf32>
    %c0_8 = arith.constant 0 : index
    %c0_9 = arith.constant 0 : index
    %10 = vector.load %arg3[%c0_8, %c0_9] : memref<384x32xbf16, #tpu.memory_space<vmem>>, vector<384x32xbf16>
    %c0_10 = arith.constant 0 : index
    %c0_11 = arith.constant 0 : index
    %11 = vector.load %arg6[%c0_10, %c0_11] : memref<32x32xbf16, #tpu.memory_space<vmem>>, vector<32x32xbf16>
    %cst_12 = arith.constant dense<0.000000e+00> : vector<384x32xf32>
    %12 = tpu.matmul %10, %11, %cst_12 {dimension_numbers = #tpu.dot_dimension_numbers<[1], [0], [0], [1], [0, 0, 1, 1], [], []>} : vector<384x32xbf16>, vector<32x32xbf16>, vector<384x32xf32> -> vector<384x32xf32>
    %13 = vector.extract_strided_slice %9 {offsets = [0, 0], sizes = [384, 32], strides = [1, 1]} : vector<384x72xf32> to vector<384x32xf32>
    %14 = arith.addf %12, %13 : vector<384x32xf32>
    %cst_13 = arith.constant 0.000000e+00 : f32
    %15 = vector.broadcast %cst_13 : f32 to vector<384x32xf32>
    %16 = arith.cmpf oge, %14, %15 : vector<384x32xf32>
    %cst_14 = arith.constant 2.000000e-01 : f32
    %17 = vector.broadcast %cst_14 : f32 to vector<384x32xf32>
    %18 = arith.mulf %17, %14 : vector<384x32xf32>
    %19 = arith.select %16, %14, %18 : vector<384x32xi1>, vector<384x32xf32>
    %20 = vector.extract_strided_slice %9 {offsets = [0, 32], sizes = [384, 40], strides = [1, 1]} : vector<384x72xf32> to vector<384x40xf32>
    %c0_15 = arith.constant 0 : index
    %c0_16 = arith.constant 0 : index
    %21 = vector.load %arg5[%c0_15, %c0_16] : memref<384x9xf32, #tpu.memory_space<vmem>>, vector<384x9xf32>
    %c0_17 = arith.constant 0 : index
    %c0_18 = arith.constant 0 : index
    %22 = vector.load %arg9[%c0_17, %c0_18] : memref<32x8xf32, #tpu.memory_space<vmem>>, vector<32x8xf32>
    %cst_19 = arith.constant dense<0.000000e+00> : vector<384x8xf32>
    %23 = tpu.matmul %19, %22, %cst_19 {dimension_numbers = #tpu.dot_dimension_numbers<[1], [0], [0], [1], [0, 0, 1, 1], [], []>} : vector<384x32xf32>, vector<32x8xf32>, vector<384x8xf32> -> vector<384x8xf32>
    %24 = vector.extract_strided_slice %21 {offsets = [0, 0], sizes = [384, 8], strides = [1, 1]} : vector<384x9xf32> to vector<384x8xf32>
    %25 = arith.addf %23, %24 : vector<384x8xf32>
    %c64_i32 = arith.constant 64 : i32
    %26 = arith.muli %arg0, %c64_i32 : i32
    %27 = arith.sitofp %26 : i32 to f32
    %28 = vector.extract_strided_slice %21 {offsets = [0, 8], sizes = [384, 1], strides = [1, 1]} : vector<384x9xf32> to vector<384x1xf32>
    %29 = vector.broadcast %27 : f32 to vector<384x1xf32>
    %30 = arith.cmpf oge, %28, %29 : vector<384x1xf32>
    %cst_20 = arith.constant 6.400000e+01 : f32
    %31 = arith.addf %27, %cst_20 : f32
    %32 = vector.broadcast %31 : f32 to vector<384x1xf32>
    %33 = arith.cmpf olt, %28, %32 : vector<384x1xf32>
    %34 = arith.andi %30, %33 : vector<384x1xi1>
    %cst_21 = arith.constant -3.000000e+38 : f32
    %35 = vector.shape_cast %34 : vector<384x1xi1> to vector<384x1xi1>
    %36 = vector.broadcast %35 : vector<384x1xi1> to vector<384x8xi1>
    %37 = vector.broadcast %cst_21 : f32 to vector<384x8xf32>
    %38 = arith.select %36, %25, %37 : vector<384x8xi1>, vector<384x8xf32>
    %cst_22 = arith.constant dense<0.000000e+00> : vector<384x40xf32>
    %39 = tpu.matmul %38, %3, %cst_22 {dimension_numbers = #tpu.dot_dimension_numbers<[1], [0], [0], [1], [0, 0, 1, 1], [], []>} : vector<384x8xf32>, vector<8x40xf32>, vector<384x40xf32> -> vector<384x40xf32>
    %c0_23 = arith.constant 0 : index
    %c0_24 = arith.constant 0 : index
    %40 = vector.load %arg13[%c0_23, %c0_24] : memref<1x40xf32, #tpu.memory_space<vmem>>, vector<1x40xf32>
    %cst_25 = arith.constant dense<0xFF800000> : vector<40xf32>
    %41 = vector.multi_reduction <maximumf>, %39, %cst_25 [0] : vector<384x40xf32> to vector<40xf32>
    %42 = vector.shape_cast %41 : vector<40xf32> to vector<1x40xf32>
    %43 = arith.maximumf %40, %42 : vector<1x40xf32>
    %c0_26 = arith.constant 0 : index
    %c0_27 = arith.constant 0 : index
    %44 = vector.load %arg13[%c0_26, %c0_27] : memref<1x40xf32, #tpu.memory_space<vmem>>, vector<1x40xf32>
    tpu.vector_store %arg13[%c0_26, %c0_27], %43 {strides = array<i32>} : memref<1x40xf32, #tpu.memory_space<vmem>>, vector<1x40xf32>,
    %45 = arith.subf %40, %43 : vector<1x40xf32>
    %46 = math.exp %45 : vector<1x40xf32>
    %47 = vector.broadcast %43 : vector<1x40xf32> to vector<384x40xf32>
    %48 = arith.subf %39, %47 : vector<384x40xf32>
    %49 = math.exp %48 : vector<384x40xf32>
    %50 = arith.mulf %49, %20 : vector<384x40xf32>
    %51 = tpu.iota {dimensions = array<i32: 0>} : vector<64x384xi32>
    %52 = vector.broadcast %26 : i32 to vector<64x384xi32>
    %53 = arith.addi %51, %52 : vector<64x384xi32>
    %c0_28 = arith.constant 0 : index
    %c0_29 = arith.constant 0 : index
    %54 = vector.load %arg2[%c0_28, %c0_29] : memref<1x384xi32, #tpu.memory_space<vmem>>, vector<1x384xi32>
    %55 = vector.broadcast %54 : vector<1x384xi32> to vector<64x384xi32>
    %56 = arith.cmpi eq, %53, %55 : vector<64x384xi32>
    %57 = arith.extui %56 : vector<64x384xi1> to vector<64x384xi32>
    %58 = arith.sitofp %57 : vector<64x384xi32> to vector<64x384xf32>
    %c0_30 = arith.constant 0 : index
    %c0_31 = arith.constant 0 : index
    %59 = vector.load %arg12[%c0_30, %c0_31] : memref<64x40xf32, #tpu.memory_space<vmem>>, vector<64x40xf32>
    %60 = vector.broadcast %46 : vector<1x40xf32> to vector<64x40xf32>
    %61 = arith.mulf %59, %60 : vector<64x40xf32>
    %cst_32 = arith.constant dense<0.000000e+00> : vector<64x40xf32>
    %62 = tpu.matmul %58, %50, %cst_32 {dimension_numbers = #tpu.dot_dimension_numbers<[1], [0], [0], [1], [0, 0, 1, 1], [], []>} : vector<64x384xf32>, vector<384x40xf32>, vector<64x40xf32> -> vector<64x40xf32>
    %63 = arith.addf %61, %62 : vector<64x40xf32>
    %c0_33 = arith.constant 0 : index
    %c0_34 = arith.constant 0 : index
    %64 = vector.load %arg12[%c0_33, %c0_34] : memref<64x40xf32, #tpu.memory_space<vmem>>, vector<64x40xf32>
    tpu.vector_store %arg12[%c0_33, %c0_34], %63 {strides = array<i32>} : memref<64x40xf32, #tpu.memory_space<vmem>>, vector<64x40xf32>,
    %c0_i32_35 = arith.constant 0 : i32
    %65 = arith.cmpi eq, %arg1, %c0_i32_35 : i32
    %66 = arith.extui %65 : i1 to i32
    %c0_i32_36 = arith.constant 0 : i32
    %67 = arith.cmpi ne, %66, %c0_i32_36 : i32
    scf.if %67 {
      %c0_37 = arith.constant 0 : index
      %c0_38 = arith.constant 0 : index
      %68 = vector.load %arg12[%c0_37, %c0_38] : memref<64x40xf32, #tpu.memory_space<vmem>>, vector<64x40xf32>
      %69 = vector.extract_strided_slice %68 {offsets = [0, 0], sizes = [64, 8], strides = [1, 1]} : vector<64x40xf32> to vector<64x8xf32>
      %cst_39 = arith.constant 1.000000e-16 : f32
      %70 = vector.broadcast %cst_39 : f32 to vector<64x8xf32>
      %71 = arith.addf %69, %70 : vector<64x8xf32>
      %72 = tpu.reciprocal %71 {approx = true} : vector<64x8xf32> -> vector<64x8xf32>
      %73 = arith.mulf %71, %72 : vector<64x8xf32>
      %cst_40 = arith.constant 2.000000e+00 : f32
      %74 = vector.broadcast %cst_40 : f32 to vector<64x8xf32>
      %75 = arith.subf %74, %73 : vector<64x8xf32>
      %76 = arith.mulf %72, %75 : vector<64x8xf32>
      %77 = vector.extract_strided_slice %68 {offsets = [0, 8], sizes = [64, 32], strides = [1, 1]} : vector<64x40xf32> to vector<64x32xf32>
      %78 = vector.extract_strided_slice %3 {offsets = [0, 8], sizes = [8, 32], strides = [1, 1]} : vector<8x40xf32> to vector<8x32xf32>
      %cst_41 = arith.constant dense<0.000000e+00> : vector<64x32xf32>
      %79 = tpu.matmul %76, %78, %cst_41 {dimension_numbers = #tpu.dot_dimension_numbers<[1], [0], [0], [1], [0, 0, 1, 1], [], []>} : vector<64x8xf32>, vector<8x32xf32>, vector<64x32xf32> -> vector<64x32xf32>
      %80 = arith.mulf %77, %79 : vector<64x32xf32>
      %c0_42 = arith.constant 0 : index
      %c0_43 = arith.constant 0 : index
      %81 = vector.load %arg11[%c0_42, %c0_43] : memref<64x32xf32, #tpu.memory_space<vmem>>, vector<64x32xf32>
      tpu.vector_store %arg11[%c0_42, %c0_43], %80 {strides = array<i32>} : memref<64x32xf32, #tpu.memory_space<vmem>>, vector<64x32xf32>,
    } else {
    }
    return
  }
  func.func @transform_0(%arg0: i32, %arg1: i32) -> (i32, i32) {
    %c0_i32 = arith.constant 0 : i32
    %c0_i32_0 = arith.constant 0 : i32
    return %c0_i32, %arg1 : i32, i32
  }
  func.func @transform_1(%arg0: i32, %arg1: i32) -> (i32, i32) {
    %c0_i32 = arith.constant 0 : i32
    %c0_i32_0 = arith.constant 0 : i32
    return %arg1, %c0_i32 : i32, i32
  }
  func.func @transform_2(%arg0: i32, %arg1: i32) -> (i32, i32) {
    %c0_i32 = arith.constant 0 : i32
    %c0_i32_0 = arith.constant 0 : i32
    return %arg1, %c0_i32 : i32, i32
  }
  func.func @transform_3(%arg0: i32, %arg1: i32) -> (i32, i32) {
    %c0_i32 = arith.constant 0 : i32
    %c0_i32_0 = arith.constant 0 : i32
    return %arg1, %c0_i32 : i32, i32
  }
  func.func @transform_4(%arg0: i32, %arg1: i32) -> (i32, i32) {
    %c0_i32 = arith.constant 0 : i32
    %c0_i32_0 = arith.constant 0 : i32
    %c0_i32_1 = arith.constant 0 : i32
    return %c0_i32, %c0_i32_0 : i32, i32
  }
  func.func @transform_5(%arg0: i32, %arg1: i32) -> (i32, i32) {
    %c0_i32 = arith.constant 0 : i32
    %c0_i32_0 = arith.constant 0 : i32
    %c0_i32_1 = arith.constant 0 : i32
    return %c0_i32, %c0_i32_0 : i32, i32
  }
  func.func @transform_6(%arg0: i32, %arg1: i32) -> (i32, i32) {
    %c0_i32 = arith.constant 0 : i32
    %c0_i32_0 = arith.constant 0 : i32
    %c0_i32_1 = arith.constant 0 : i32
    return %c0_i32, %c0_i32_0 : i32, i32
  }
  func.func @transform_7(%arg0: i32, %arg1: i32) -> (i32, i32) {
    %c0_i32 = arith.constant 0 : i32
    %c0_i32_0 = arith.constant 0 : i32
    %c0_i32_1 = arith.constant 0 : i32
    return %c0_i32, %c0_i32_0 : i32, i32
  }
  func.func @transform_8(%arg0: i32, %arg1: i32) -> (i32, i32) {
    %c0_i32 = arith.constant 0 : i32
    %c0_i32_0 = arith.constant 0 : i32
    %c0_i32_1 = arith.constant 0 : i32
    return %c0_i32, %c0_i32_0 : i32, i32
  }
  func.func @transform_9(%arg0: i32, %arg1: i32) -> (i32, i32) {
    %c0_i32 = arith.constant 0 : i32
    %c0_i32_0 = arith.constant 0 : i32
    return %arg0, %c0_i32 : i32, i32
  }
}

</mosaic_0001>

<bundles_post_ra>
// kernel: tpu_custom_call.1
= control target key start
LH: loop header
LB: loop body
LE: loop exit
PB: predicated region body
PF: predicated region fallthrough
CT: control target
= control target key end

     0   :  { %14 = vsyncpa [#allocation5], 0  ;;  %s6549_s0 = inlined_call_operand.hbm [shape: s32[1,384], index: 0, kind: input, shape index: {}]   ;;  %s6550_s1 = inlined_call_operand.hbm [shape: bf16[384,32], index: 1, kind: input, shape index: {}]   ;;  %s6551_s2 = inlined_call_operand.hbm [shape: bf16[384,32], index: 2, kind: input, shape index: {}]   ;;  %s6552_s3 = inlined_call_operand.hbm [shape: f32[384,9], index: 3, kind: input, shape index: {}]   ;;  %s6553_s4 = inlined_call_operand.hbm [shape: bf16[32,32], index: 4, kind: input, shape index: {}]   ;;  %s6554_s5 = inlined_call_operand.hbm [shape: bf16[32,72], index: 5, kind: input, shape index: {}]   ;;  %s6555_s6 = inlined_call_operand.hbm [shape: f32[1,72], index: 6, kind: input, shape index: {}]   ;;  %s6556_s7 = inlined_call_operand.hbm [shape: f32[32,8], index: 7, kind: input, shape index: {}]   ;;  %s6557_s8 = inlined_call_operand.hbm [shape: f32[8,40], index: 8, kind: input, shape index: {}]   ;;  %s6558_s9 = inlined_call_operand.hbm [shape: f32[64,32], index: 9, kind: output, shape index: {}]  }
   0x1   :  { %15 = vsyncpa [#allocation8], 0 }
   0x2   :  { %16 = vsyncpa [#allocation11], 0 }
   0x3   :  { %17 = vsyncpa [#allocation14], 0 }
   0x4   :  { %18 = vsyncpa [#allocation17], 0 }
   0x5   :  { %19 = vsyncpa [#allocation6], 0  ;;  %s5156_s30 = smov [#allocation7]   ;;  %s4924_s13 = scalar_lea.hbm %s6550_s1, 3072 }
   0x6   :  { %s35_s10 = sshll.u32 %s5156_s30, 4  ;;  %p4925_p0 = scmp.ne.s32.totalorder %s6550_s1, %s4924_s13  ;;  %s36_s10 = int_to_ptr.vmem [resolvable:$true] %s35_s10 }
   0x7   :  { %p4928_p1 = scmp.lt.u32.totalorder %s4924_s13, %s6550_s1 }
   0x9   :  { %p4930_p2 = pnand %p4928_p1, %p4925_p0 }
   0xb   :  { %4933 = shalt.err (!%p4930_p2)
}
   0xc   :  { %s4934_s18 = scalar_lea.vmem %s36_s10, 3072  ;;  %p4939_p4 = scmp.lt.s32.totalorder %s36_s10, %s36_s10 }
   0xd   :  { %p4935_p3 = scmp.ne.s32.totalorder %s36_s10, %s4934_s18  ;;  %p4940_p5 = scmp.lt.s32.totalorder %s4934_s18, %s4934_s18 }
   0xf   :  { %p4941_p6 = por %p4940_p5, %p4939_p4 }
  0x11   :  { %p4942_p7 = pnand %p4941_p6, %p4935_p3 }
  0x13   :  { %4945 = shalt.err (!%p4942_p7)
}
  0x14   :  { %s5157_s19 = smov 64   ;;  %s5158_s20 = smov 4  }
  0x15   :  { %41 = dma.hbm_to_vmem [thread:$0]  %s6550_s1, 3072, %s36_s10, [#allocation8], %s5157_s19, %s5157_s19, %s5158_s20  }
  0x16   :  { %s5159_s23 = smov [#allocation10]   ;;  %s4946_s27 = scalar_lea.hbm %s6552_s3, 6144 }
  0x17   :  { %s59_s24 = sshll.u32 %s5159_s23, 4  ;;  %p4947_p8 = scmp.ne.s32.totalorder %s6552_s3, %s4946_s27  ;;  %s60_s24 = int_to_ptr.vmem [resolvable:$true] %s59_s24 }
  0x18   :  { %p4950_p9 = scmp.lt.u32.totalorder %s4946_s27, %s6552_s3 }
  0x1a   :  { %p4952_p10 = pnand %p4950_p9, %p4947_p8 }
  0x1c   :  { %4955 = shalt.err (!%p4952_p10)
}
  0x1d   :  { %s4956_s12 = scalar_lea.vmem %s60_s24, 6144  ;;  %p4961_p12 = scmp.lt.s32.totalorder %s60_s24, %s60_s24 }
  0x1e   :  { %p4957_p11 = scmp.ne.s32.totalorder %s60_s24, %s4956_s12  ;;  %p4962_p13 = scmp.lt.s32.totalorder %s4956_s12, %s4956_s12 }
  0x20   :  { %p4963_p0 = por %p4962_p13, %p4961_p12 }
  0x22   :  { %p4964_p1 = pnand %p4963_p0, %p4957_p11 }
  0x24   :  { %4967 = shalt.err (!%p4964_p1)
}
  0x25   :  { %s5160_s1 = smov 128   ;;  %s5161_s10 = smov 8  }
  0x26   :  { %65 = dma.hbm_to_vmem [thread:$0]  %s6552_s3, 6144, %s60_s24, [#allocation11], %s5160_s1, %s5160_s1, %s5161_s10  }
  0x27   :  { %s5162_s15 = smov [#allocation13]   ;;  %s5163_s17 = smov [#allocation16]  }
  0x28   :  { %s83_s16 = sshll.u32 %s5162_s15, 4  ;;  %s105_s18 = sshll.u32 %s5163_s17, 4  ;;  %s84_s16 = int_to_ptr.vmem [resolvable:$true] %s83_s16  ;;  %s5257_s18 = int_to_ptr.vmem [resolvable:$true] %s105_s18 }
  0x29   :  { %s4968_s23 = scalar_lea.hbm %s6554_s5, 256 }
  0x2a   :  { %p4969_p2 = scmp.ne.s32.totalorder %s6554_s5, %s4968_s23  ;;  %p4972_p3 = scmp.lt.u32.totalorder %s4968_s23, %s6554_s5 }
  0x2c   :  { %p4974_p4 = pnand %p4972_p3, %p4969_p2 }
  0x2e   :  { %4977 = shalt.err (!%p4974_p4)
}
  0x2f   :  { %s4978_s3 = scalar_lea.vmem %s84_s16, 256  ;;  %p4983_p6 = scmp.lt.s32.totalorder %s84_s16, %s84_s16 }
  0x30   :  { %p4979_p5 = scmp.ne.s32.totalorder %s84_s16, %s4978_s3  ;;  %p4984_p7 = scmp.lt.s32.totalorder %s4978_s3, %s4978_s3 }
  0x32   :  { %p4985_p8 = por %p4984_p7, %p4983_p6 }
  0x34   :  { %p4986_p9 = pnand %p4985_p8, %p4979_p5 }
  0x36   :  { %4989 = shalt.err (!%p4986_p9)
}
  0x37   :  { %89 = dma.hbm_to_vmem [thread:$0]  %s6554_s5, 256, %s84_s16, [#allocation14], %s5157_s19, %s5157_s19, %s5158_s20  }
  0x38   :  { %s4990_s12 = scalar_lea.hbm %s6556_s7, 512 }
  0x39   :  { %p4991_p10 = scmp.ne.s32.totalorder %s6556_s7, %s4990_s12  ;;  %p4994_p11 = scmp.lt.u32.totalorder %s4990_s12, %s6556_s7 }
  0x3b   :  { %p4996_p12 = pnand %p4994_p11, %p4991_p10 }
  0x3d   :  { %4999 = shalt.err (!%p4996_p12)
}
  0x3e   :  { %s5000_s21 = scalar_lea.vmem %s5257_s18, 512  ;;  %p5005_p0 = scmp.lt.s32.totalorder %s5257_s18, %s5257_s18 }
  0x3f   :  { %p5001_p13 = scmp.ne.s32.totalorder %s5257_s18, %s5000_s21  ;;  %p5006_p1 = scmp.lt.s32.totalorder %s5000_s21, %s5000_s21 }
  0x41   :  { %p5007_p2 = por %p5006_p1, %p5005_p0 }
  0x43   :  { %p5008_p3 = pnand %p5007_p2, %p5001_p13 }
  0x45   :  { %5011 = shalt.err (!%p5008_p3)
}
  0x46   :  { %111 = dma.hbm_to_vmem [thread:$0]  %s6556_s7, 512, %s5257_s18, [#allocation17], %s5160_s1, %s5160_s1, %s5161_s10  }
  0x47   :  { %s5164_s22 = smov [#allocation4]   ;;  %s5165_s25 = smov [#allocation9]  }
  0x48   :  { %s26_s23 = sshll.u32 %s5164_s22, 4  ;;  %s47_s26 = sshll.u32 %s5165_s25, 4  ;;  %s27_s23 = int_to_ptr.vmem [resolvable:$true] %s26_s23  ;;  %s5294_s26 = int_to_ptr.vmem [resolvable:$true] %s47_s26 }
  0x49   :  { %s5012_s3 = scalar_lea.hbm %s6549_s0, 48 }
  0x4a   :  { %p5013_p4 = scmp.ne.s32.totalorder %s6549_s0, %s5012_s3  ;;  %p5016_p5 = scmp.lt.u32.totalorder %s5012_s3, %s6549_s0 }
  0x4c   :  { %p5018_p6 = pnand %p5016_p5, %p5013_p4 }
  0x4e   :  { %5021 = shalt.err (!%p5018_p6)
}
  0x4f   :  { %s5022_s7 = scalar_lea.vmem %s27_s23, 48  ;;  %s5026_s18 = scalar_lea.vmem %s27_s23, 64 }
  0x50   :  { %p5023_p7 = scmp.ne.s32.totalorder %s27_s23, %s5022_s7  ;;  %p5027_p8 = scmp.lt.s32.totalorder %s27_s23, %s27_s23 }
  0x51   :  { %p5028_p9 = scmp.lt.s32.totalorder %s5026_s18, %s5022_s7 }
  0x53   :  { %p5029_p10 = por %p5028_p9, %p5027_p8 }
  0x55   :  { %p5030_p11 = pnand %p5029_p10, %p5023_p7 }
  0x57   :  { %5033 = shalt.err (!%p5030_p11)
}
  0x58   :  { %29 = dma.hbm_to_vmem [thread:$0]  %s6549_s0, 48, %s27_s23, [#allocation5]  }
  0x59   :  { %s5034_s17 = scalar_lea.hbm %s6551_s2, 3072 }
  0x5a   :  { %p5035_p12 = scmp.ne.s32.totalorder %s6551_s2, %s5034_s17  ;;  %p5038_p13 = scmp.lt.u32.totalorder %s5034_s17, %s6551_s2 }
  0x5c   :  { %p5040_p0 = pnand %p5038_p13, %p5035_p12 }
  0x5e   :  { %5043 = shalt.err (!%p5040_p0)
}
  0x5f   :  { %s5044_s25 = scalar_lea.vmem %s5294_s26, 3072  ;;  %p5049_p2 = scmp.lt.s32.totalorder %s5294_s26, %s5294_s26 }
  0x60   :  { %p5045_p1 = scmp.ne.s32.totalorder %s5294_s26, %s5044_s25  ;;  %p5050_p3 = scmp.lt.s32.totalorder %s5044_s25, %s5044_s25 }
  0x62   :  { %p5051_p4 = por %p5050_p3, %p5049_p2 }
  0x64   :  { %p5052_p5 = pnand %p5051_p4, %p5045_p1 }
  0x66   :  { %5055 = shalt.err (!%p5052_p5)
}
  0x67   :  { %53 = dma.hbm_to_vmem [thread:$0]  %s6551_s2, 3072, %s5294_s26, [#allocation8], %s5157_s19, %s5157_s19, %s5158_s20  }
  0x68   :  { %s5166_s27 = smov [#allocation12]   ;;  %s5167_s3 = smov [#allocation15]  }
  0x69   :  { %s71_s28 = sshll.u32 %s5166_s27, 4  ;;  %s96_s24 = sshll.u32 %s5167_s3, 4  ;;  %s72_s28 = int_to_ptr.vmem [resolvable:$true] %s71_s28  ;;  %s97_s24 = int_to_ptr.vmem [resolvable:$true] %s96_s24 }
  0x6a   :  { %s5056_s11 = scalar_lea.hbm %s6553_s4, 256 }
  0x6b   :  { %p5057_p6 = scmp.ne.s32.totalorder %s6553_s4, %s5056_s11  ;;  %p5060_p7 = scmp.lt.u32.totalorder %s5056_s11, %s6553_s4 }
  0x6d   :  { %p5062_p8 = pnand %p5060_p7, %p5057_p6 }
  0x6f   :  { %5065 = shalt.err (!%p5062_p8)
}
  0x70   :  { %s5066_s2 = scalar_lea.vmem %s72_s28, 256  ;;  %p5071_p10 = scmp.lt.s32.totalorder %s72_s28, %s72_s28 }
  0x71   :  { %p5067_p9 = scmp.ne.s32.totalorder %s72_s28, %s5066_s2  ;;  %p5072_p11 = scmp.lt.s32.totalorder %s5066_s2, %s5066_s2 }
  0x73   :  { %p5073_p12 = por %p5072_p11, %p5071_p10 }
  0x75   :  { %p5074_p13 = pnand %p5073_p12, %p5067_p9 }
  0x77   :  { %5077 = shalt.err (!%p5074_p13)
}
  0x78   :  { %77 = dma.hbm_to_vmem [thread:$0]  %s6553_s4, 256, %s72_s28, [#allocation11], %s5157_s19, %s5157_s19, %s5158_s20  }
  0x79   :  { %s5078_s21 = scalar_lea.hbm %s6555_s6, 16 }
  0x7a   :  { %p5079_p0 = scmp.ne.s32.totalorder %s6555_s6, %s5078_s21  ;;  %p5082_p1 = scmp.lt.u32.totalorder %s5078_s21, %s6555_s6 }
  0x7c   :  { %p5084_p2 = pnand %p5082_p1, %p5079_p0 }
  0x7e   :  { %5087 = shalt.err (!%p5084_p2)
}
  0x7f   :  { %s5088_s0 = scalar_lea.vmem %s97_s24, 16  ;;  %s5092_s23 = scalar_lea.vmem %s97_s24, 32 }
  0x80   :  { %p5089_p3 = scmp.ne.s32.totalorder %s97_s24, %s5088_s0  ;;  %p5093_p4 = scmp.lt.s32.totalorder %s97_s24, %s97_s24 }
  0x81   :  { %p5094_p5 = scmp.lt.s32.totalorder %s5092_s23, %s5088_s0 }
  0x83   :  { %p5095_p6 = por %p5094_p5, %p5093_p4 }
  0x85   :  { %p5096_p7 = pnand %p5095_p6, %p5089_p3 }
  0x87   :  { %5099 = shalt.err (!%p5096_p7)
}
  0x88   :  { %99 = dma.hbm_to_vmem [thread:$0]  %s6555_s6, 16, %s97_s24, [#allocation14]  }
  0x89   :  { %s5168_s20 = smov [#allocation18]   ;;  %s5100_s29 = scalar_lea.hbm %s6557_s8, 128 }
  0x8a   :  { %s118_s27 = sshll.u32 %s5168_s20, 4  ;;  %p5101_p8 = scmp.ne.s32.totalorder %s6557_s8, %s5100_s29  ;;  %s119_s27 = int_to_ptr.vmem [resolvable:$true] %s118_s27 }
  0x8b   :  { %p5104_p9 = scmp.lt.u32.totalorder %s5100_s29, %s6557_s8 }
  0x8d   :  { %p5106_p10 = pnand %p5104_p9, %p5101_p8 }
  0x8f   :  { %5109 = shalt.err (!%p5106_p10)
}
  0x90   :  { %s5110_s12 = scalar_lea.vmem %s119_s27, 128  ;;  %p5115_p12 = scmp.lt.s32.totalorder %s119_s27, %s119_s27 }
  0x91   :  { %p5111_p11 = scmp.ne.s32.totalorder %s119_s27, %s5110_s12  ;;  %p5116_p13 = scmp.lt.s32.totalorder %s5110_s12, %s5110_s12 }
  0x93   :  { %p5117_p0 = por %p5116_p13, %p5115_p12 }
  0x95   :  { %p5118_p1 = pnand %p5117_p0, %p5111_p11 }
  0x97   :  { %5121 = shalt.err (!%p5118_p1)
}
  0x98   :  { %121 = dma.hbm_to_vmem [thread:$0]  %s6557_s8, 128, %s119_s27, [#allocation17]  }
  0x99   :  { %5144 = dma.done.wait [#allocation5], 48  }
  0x9a   :  { %5145 = vsyncadd [#allocation5], 4294967248 }
  0x9b   :  { %5146 = dma.done.wait [#allocation8], 6144  }
  0x9c   :  { %5147 = vsyncadd [#allocation8], 4294961152 }
  0x9d   :  { %5148 = dma.done.wait [#allocation11], 6400  }
  0x9e   :  { %5149 = vsyncadd [#allocation11], 4294960896 }
  0x9f   :  { %5150 = dma.done.wait [#allocation14], 272  }
  0xa0   :  { %5151 = vsyncadd [#allocation14], 4294967024 }
  0xa1   :  { %5152 = dma.done.wait [#allocation17], 640  }
  0xa2   :  { %5153 = vsyncadd [#allocation17], 4294966656  ;;  %v5169_v0 = vmov 8   ;;  %v4709_v1 = vld [vmem:[#allocation13] sm:$0xff]   ;;  %v4710_v2 = vld [vmem:[#allocation12] sm:$0xff]   ;;  %vm357_vm0 = vcmask 261120  }
  0xa3   :  { %4707 = vset.pattern.permute.xlu0 %v5169_v0  ;;  %4708 = vset.pattern.permute.xlu1 %v5169_v0  ;;  %v4711_v3 = vld [vmem:[#allocation13 + $0x8] sm:$0xff]   ;;  %v4712_v4 = vld [vmem:[#allocation12 + $0x8] sm:$0xff]   ;;  %v4713_v5 = vld [vmem:[#allocation9] sm:$0xff]   ;;  %v5170_v40 = vmov 0   ;;  %s5171_s8 = smov 96   ;;  %s5175_s13 = smov 120  }
  0xa4   :  { %4298 = vmatprep.subr.bf16.mxu0 %v4709_v1  ;;  %4350 = vmatprep.subr.bf16.mxu1 %v4710_v2  ;;  %v4714_v6 = vld [vmem:[#allocation7] sm:$0xff]   ;;  %v4715_v7 = vld [vmem:[#allocation9 + $0x8] sm:$0xff]   ;;  %v4717_v9 = vld [vmem:[#allocation9 + $0x10] sm:$0xff]   ;;  %s5176_s2 = smov [#allocation19]  }
  0xa5   :  { %4299 = vmatpush3.bf16.msra.mxu0 %v4709_v1  ;;  %4351 = vmatpush3.bf16.msra.mxu1 %v4710_v2  ;;  %v4716_v8 = vld [vmem:[#allocation7 + $0x8] sm:$0xff]   ;;  %v4718_v10 = vld [vmem:[#allocation7 + $0x10] sm:$0xff]   ;;  %v4719_v11 = vld [vmem:[#allocation9 + $0x18] sm:$0xff]   ;;  %s3787_s26 = sshll.u32 %s5176_s2, 4  ;;  %s3788_s26 = int_to_ptr.vmem [resolvable:$true] %s3787_s26 }
  0xa6   :  { %4300 = vmatprep.subr.bf16.mxu0 %v4711_v3  ;;  %4352 = vmatprep.subr.bf16.mxu1 %v4712_v4  ;;  %v4720_v12 = vld [vmem:[#allocation7 + $0x18] sm:$0xff]   ;;  %v4721_v13 = vld [vmem:[#allocation9 + $0x20] sm:$0xff]   ;;  %v4723_v15 = vld [vmem:[#allocation9 + $0x28] sm:$0xff]   ;;  %s5122_s14 = scalar_lea.vmem %s3788_s26, 1024  ;;  %p5127_p3 = scmp.lt.s32.totalorder %s3788_s26, %s3788_s26 }
  0xa7   :  { %4302 = vmatprep.mubr.msk.bf16.mxu0 %vm357_vm0, %v4713_v5  ;;  %4354 = vmatprep.mubr.msk.bf16.mxu1 %vm357_vm0, %v4714_v6  ;;  %v4722_v14 = vld [vmem:[#allocation7 + $0x20] sm:$0xff]   ;;  %v4724_v16 = vld [vmem:[#allocation7 + $0x28] sm:$0xff]   ;;  %v4725_v17 = vld [vmem:[#allocation9 + $0x30] sm:$0xff]   ;;  %p5123_p2 = scmp.ne.s32.totalorder %s3788_s26, %s5122_s14  ;;  %p5128_p4 = scmp.lt.s32.totalorder %s5122_s14, %s5122_s14 }
  0xa8   :  { %v4726_v18 = vld [vmem:[#allocation7 + $0x30] sm:$0xff]   ;;  %v4727_v19 = vld [vmem:[#allocation9 + $0x38] sm:$0xff]   ;;  %v4729_v21 = vld [vmem:[#allocation9 + $0x40] sm:$0xff]  }
  0xa9   :  { %4301 = vmatpush3.bf16.msra.mxu0 %v4711_v3  ;;  %4353 = vmatpush3.bf16.msra.mxu1 %v4712_v4  ;;  %v4728_v20 = vld [vmem:[#allocation7 + $0x38] sm:$0xff]   ;;  %v4730_v22 = vld [vmem:[#allocation7 + $0x40] sm:$0xff]   ;;  %v4731_v23 = vld [vmem:[#allocation9 + $0x48] sm:$0xff]   ;;  %p5129_p5 = por %p5128_p4, %p5127_p3 }
  0xaa   :  { %v4732_v24 = vld [vmem:[#allocation7 + $0x48] sm:$0xff]   ;;  %v4733_v25 = vld [vmem:[#allocation9 + $0x50] sm:$0xff]   ;;  %v4735_v27 = vld [vmem:[#allocation9 + $0x58] sm:$0xff]  }
  0xab   :  { %v4734_v26 = vld [vmem:[#allocation7 + $0x50] sm:$0xff]   ;;  %v4736_v28 = vld [vmem:[#allocation7 + $0x58] sm:$0xff]   ;;  %v4737_v29 = vld [vmem:[#allocation9 + $0x60] sm:$0xff]   ;;  %p5130_p6 = pnand %p5129_p5, %p5123_p2 }
  0xac   :  { %4303 = vmatmul.mubr.msk.bf16.vlgmr.msra.gmra.mrb[0].mxu0 %vm357_vm0, %v4715_v7  ;;  %4355 = vmatmul.mubr.msk.bf16.vlgmr.msra.gmra.mrb[0].mxu1 %vm357_vm0, %v4716_v8  ;;  %v4738_v30 = vld [vmem:[#allocation7 + $0x60] sm:$0xff]   ;;  %v1282_v32 = vld [vmem:[#allocation10 + $0x10] sm:$0xff]  ;;  %v1281_v33 = vld [vmem:[#allocation10 + $0x8] sm:$0xff] }
  0xad   :  { %4306 = vmatprep.mubr.msk.bf16.mxu0 %vm357_vm0, %v4717_v9  ;;  %4358 = vmatprep.mubr.msk.bf16.mxu1 %vm357_vm0, %v4718_v10  ;;  %v1280_v31 = vld [vmem:[#allocation10] sm:$0xff]  ;;  %vm1786_vm3 = vcmp.ge.f32.partialorder %v1282_v32, 0.0  ;;  %vm1836_vm4 = vcmp.lt.f32.partialorder %v1282_v32, 64.0  ;;  %v1283_v34 = vld [vmem:[#allocation10 + $0x18] sm:$0xff]  ;;  %v4739_v36 = vld [vmem:[#allocation9 + $0x68] sm:$0xff]   ;;  %vm1785_vm6 = vcmp.ge.f32.partialorder %v1281_v33, 0.0 }
  0xae   :  { %vm1784_vm1 = vcmp.ge.f32.partialorder %v1280_v31, 0.0  ;;  %vm1834_vm2 = vcmp.lt.f32.partialorder %v1280_v31, 64.0  ;;  %v1284_v35 = vld [vmem:[#allocation10 + $0x20] sm:$0xff]  ;;  %vm1835_vm7 = vcmp.lt.f32.partialorder %v1281_v33, 64.0  ;;  %vm1787_vm8 = vcmp.ge.f32.partialorder %v1283_v34, 0.0  ;;  %v1285_v37 = vld [vmem:[#allocation10 + $0x28] sm:$0xff]  ;;  %vm1884_vm10 = vmand %vm1786_vm3, %vm1836_vm4 }
  0xaf   :  { %vm1882_vm5 = vmand %vm1784_vm1, %vm1834_vm2  ;;  %vm1837_vm9 = vcmp.lt.f32.partialorder %v1283_v34, 64.0  ;;  %v4740_v38 = vld [vmem:[#allocation7 + $0x68] sm:$0xff]   ;;  %v4741_v39 = vld [vmem:[#allocation9 + $0x70] sm:$0xff]   ;;  %vm1788_vm11 = vcmp.ge.f32.partialorder %v1284_v35, 0.0  ;;  %vm1838_vm12 = vcmp.lt.f32.partialorder %v1284_v35, 64.0  ;;  %v1932_v43 = vsel %vm1884_vm10, 1, %v5170_v40 }
  0xb0   :  { %v1930_v41 = vsel %vm1882_vm5, 1, %v5170_v40  ;;  %v4742_v42 = vld [vmem:[#allocation7 + $0x70] sm:$0xff]   ;;  %vm1883_vm13 = vmand %vm1785_vm6, %vm1835_vm7  ;;  %vm1789_vm14 = vcmp.ge.f32.partialorder %v1285_v37, 0.0  ;;  %vm1839_vm15 = vcmp.lt.f32.partialorder %v1285_v37, 64.0  ;;  %1985 = vperm.xlu1 %4708, %v1932_v43   ;;  %v1287_v46 = vld [vmem:[#allocation10 + $0x38] sm:$0xff] }
  0xb1   :  { %1979 = vperm.xlu0 %4707, %v1930_v41   ;;  %v1286_v44 = vld [vmem:[#allocation10 + $0x30] sm:$0xff]  ;;  %v1931_v45 = vsel %vm1883_vm13, 1, %v5170_v40  ;;  %vm1885_vm1 = vmand %vm1787_vm8, %vm1837_vm9  ;;  %vm1791_vm6 = vcmp.ge.f32.partialorder %v1287_v46, 0.0  ;;  %vm1841_vm7 = vcmp.lt.f32.partialorder %v1287_v46, 64.0  ;;  %v1288_v48 = vld [vmem:[#allocation10 + $0x40] sm:$0xff] }
  0xb2   :  { %v1933_v47 = vsel %vm1885_vm1, 1, %v5170_v40  ;;  %vm1886_vm2 = vmand %vm1788_vm11, %vm1838_vm12  ;;  %vm1790_vm4 = vcmp.ge.f32.partialorder %v1286_v44, 0.0  ;;  %vm1840_vm5 = vcmp.lt.f32.partialorder %v1286_v44, 64.0  ;;  %v1289_v50 = vld [vmem:[#allocation10 + $0x48] sm:$0xff]  ;;  %v4743_v51 = vld [vmem:[#allocation9 + $0x78] sm:$0xff]   ;;  %vm1792_vm10 = vcmp.ge.f32.partialorder %v1288_v48, 0.0 }
  0xb3   :  { %vm1887_vm3 = vmand %vm1789_vm14, %vm1839_vm15  ;;  %v1934_v49 = vsel %vm1886_vm2, 1, %v5170_v40  ;;  %v4744_v53 = vld [vmem:[#allocation7 + $0x78] sm:$0xff]   ;;  %v4745_v54 = vld [vmem:[#allocation9 + $0x80] sm:$0xff]   ;;  %vm1842_vm11 = vcmp.lt.f32.partialorder %v1288_v48, 64.0  ;;  %vm1793_vm12 = vcmp.ge.f32.partialorder %v1289_v50, 0.0  ;;  %vm1843_vm13 = vcmp.lt.f32.partialorder %v1289_v50, 64.0 }
  0xb4   :  { %4307 = vmatmul.mubr.msk.bf16.gmra.mrb[4].mxu0 %vm357_vm0, %v4719_v11  ;;  %4359 = vmatmul.mubr.msk.bf16.gmra.mrb[4].mxu1 %vm357_vm0, %v4720_v12  ;;  %v1935_v52 = vsel %vm1887_vm3, 1, %v5170_v40  ;;  %vm1888_vm8 = vmand %vm1790_vm4, %vm1840_vm5  ;;  %v4746_v55 = vld [vmem:[#allocation7 + $0x80] sm:$0xff]   ;;  %v1290_v56 = vld [vmem:[#allocation10 + $0x50] sm:$0xff] }
  0xb5   :  { %4310 = vmatprep.mubr.msk.bf16.mxu0 %vm357_vm0, %v4721_v13  ;;  %4362 = vmatprep.mubr.msk.bf16.mxu1 %vm357_vm0, %v4722_v14  ;;  %vm1889_vm9 = vmand %vm1791_vm6, %vm1841_vm7  ;;  %v1936_v57 = vsel %vm1888_vm8, 1, %v5170_v40  ;;  %v1291_v58 = vld [vmem:[#allocation10 + $0x58] sm:$0xff]  ;;  %vm1794_vm1 = vcmp.ge.f32.partialorder %v1290_v56, 0.0  ;;  %vm1844_vm2 = vcmp.lt.f32.partialorder %v1290_v56, 64.0  ;;  %v1292_v60 = vld [vmem:[#allocation10 + $0x60] sm:$0xff] }
  0xb6   :  { %1982 = vperm.xlu0 %4707, %v1931_v45   ;;  %1988 = vperm.xlu1 %4708, %v1933_v47   ;;  %v1937_v59 = vsel %vm1889_vm9, 1, %v5170_v40  ;;  %vm1890_vm14 = vmand %vm1792_vm10, %vm1842_vm11  ;;  %vm1795_vm3 = vcmp.ge.f32.partialorder %v1291_v58, 0.0  ;;  %vm1845_vm4 = vcmp.lt.f32.partialorder %v1291_v58, 64.0  ;;  %v1293_v62 = vld [vmem:[#allocation10 + $0x68] sm:$0xff]  ;;  %v4749_v2 = vld [vmem:[#allocation9 + $0x90] sm:$0xff]   ;;  %vm1796_vm7 = vcmp.ge.f32.partialorder %v1292_v60, 0.0 }
  0xb7   :  { %vm1891_vm15 = vmand %vm1793_vm12, %vm1843_vm13  ;;  %v1938_v61 = vsel %vm1890_vm14, 1, %v5170_v40  ;;  %v4747_v63 = vld [vmem:[#allocation9 + $0x88] sm:$0xff]   ;;  %vm1846_vm8 = vcmp.lt.f32.partialorder %v1292_v60, 64.0  ;;  %v4750_v3 = vld [vmem:[#allocation7 + $0x90] sm:$0xff]   ;;  %vm1797_vm9 = vcmp.ge.f32.partialorder %v1293_v62, 0.0  ;;  %vm1847_vm10 = vcmp.lt.f32.partialorder %v1293_v62, 64.0 }
  0xb8   :  { %v1939_v0 = vsel %vm1891_vm15, 1, %v5170_v40  ;;  %vm1892_vm5 = vmand %vm1794_vm1, %vm1844_vm2  ;;  %v4748_v1 = vld [vmem:[#allocation7 + $0x88] sm:$0xff]   ;;  %v1294_v4 = vld [vmem:[#allocation10 + $0x70] sm:$0xff] }
  0xb9   :  { %vm1893_vm6 = vmand %vm1795_vm3, %vm1845_vm4  ;;  %v1940_v5 = vsel %vm1892_vm5, 1, %v5170_v40  ;;  %v1295_v6 = vld [vmem:[#allocation10 + $0x78] sm:$0xff]  ;;  %vm1798_vm13 = vcmp.ge.f32.partialorder %v1294_v4, 0.0  ;;  %vm1848_vm14 = vcmp.lt.f32.partialorder %v1294_v4, 64.0  ;;  %v1296_v8 = vld [vmem:[#allocation10 + $0x80] sm:$0xff] }
  0xba   :  { %1991 = vperm.xlu0 %4707, %v1934_v49   ;;  %1994 = vperm.xlu1 %4708, %v1935_v52   ;;  %v1941_v7 = vsel %vm1893_vm6, 1, %v5170_v40  ;;  %vm1894_vm11 = vmand %vm1796_vm7, %vm1846_vm8  ;;  %vm1799_vm15 = vcmp.ge.f32.partialorder %v1295_v6, 0.0  ;;  %vm1849_vm1 = vcmp.lt.f32.partialorder %v1295_v6, 64.0  ;;  %v4751_v9 = vld [vmem:[#allocation9 + $0x98] sm:$0xff]   ;;  %v1297_v11 = vld [vmem:[#allocation10 + $0x88] sm:$0xff]  ;;  %vm1800_vm4 = vcmp.ge.f32.partialorder %v1296_v8, 0.0 }
  0xbb   :  { %vm1895_vm12 = vmand %vm1797_vm9, %vm1847_vm10  ;;  %v1942_v10 = vsel %vm1894_vm11, 1, %v5170_v40  ;;  %v1328_v13 = vld [vmem:[#allocation16] sm:$0xff]  ;;  %v1329_v14 = vld [vmem:[#allocation16 + $0x8] sm:$0xff]  ;;  %vm1850_vm5 = vcmp.lt.f32.partialorder %v1296_v8, 64.0  ;;  %vm1801_vm6 = vcmp.ge.f32.partialorder %v1297_v11, 0.0  ;;  %vm1851_vm7 = vcmp.lt.f32.partialorder %v1297_v11, 64.0 }
  0xbc   :  { %4311 = vmatmul.mubr.msk.bf16.gmra.mrb[8].mxu0 %vm357_vm0, %v4723_v15  ;;  %4363 = vmatmul.mubr.msk.bf16.gmra.mrb[8].mxu1 %vm357_vm0, %v4724_v16  ;;  %v1943_v12 = vsel %vm1895_vm12, 1, %v5170_v40  ;;  %vm1896_vm2 = vmand %vm1798_vm13, %vm1848_vm14  ;;  %v4752_v15 = vld [vmem:[#allocation7 + $0x98] sm:$0xff]   ;;  %v4753_v16 = vld [vmem:[#allocation9 + $0xa0] sm:$0xff]  }
  0xbd   :  { %4314 = vmatprep.mubr.msk.bf16.mxu0 %vm357_vm0, %v4725_v17  ;;  %4366 = vmatprep.mubr.msk.bf16.mxu1 %vm357_vm0, %v4726_v18  ;;  %vm1897_vm3 = vmand %vm1799_vm15, %vm1849_vm1  ;;  %v4754_v17 = vld [vmem:[#allocation7 + $0xa0] sm:$0xff]   ;;  %v1298_v18 = vld [vmem:[#allocation10 + $0x90] sm:$0xff] }
  0xbe   :  { %1997 = vperm.xlu0 %4707, %v1936_v57   ;;  %2000 = vperm.xlu1 %4708, %v1937_v59   ;;  %vm1898_vm8 = vmand %vm1800_vm4, %vm1850_vm5  ;;  %vm1802_vm10 = vcmp.ge.f32.partialorder %v1298_v18, 0.0  ;;  %vm1852_vm11 = vcmp.lt.f32.partialorder %v1298_v18, 64.0  ;;  %v1302_v31 = vld [vmem:[#allocation10 + $0xb0] sm:$0xff]  ;;  %v1303_v33 = vld [vmem:[#allocation10 + $0xb8] sm:$0xff] }
  0xbf   :  { %vm1899_vm9 = vmand %vm1801_vm6, %vm1851_vm7  ;;  %vm1806_vm7 = vcmp.ge.f32.partialorder %v1302_v31, 0.0  ;;  %v1304_v35 = vld [vmem:[#allocation10 + $0xc0] sm:$0xff]  ;;  %v1305_v37 = vld [vmem:[#allocation10 + $0xc8] sm:$0xff] }
  0xc0   :  { %vm1900_vm14 = vmand %vm1802_vm10, %vm1852_vm11  ;;  %vm1857_vm10 = vcmp.lt.f32.partialorder %v1303_v33, 64.0  ;;  %v4760_v41 = vld [vmem:[#allocation7 + $0xb8] sm:$0xff]   ;;  %v1308_v49 = vld [vmem:[#allocation10 + $0xe0] sm:$0xff] }
  0xc1   :  { %v1948_v32 = vsel %vm1900_vm14, 1, %v5170_v40  ;;  %vm1858_vm14 = vcmp.lt.f32.partialorder %v1304_v35, 64.0  ;;  %v1307_v44 = vld [vmem:[#allocation10 + $0xd8] sm:$0xff]  ;;  %v1312_v57 = vld [vmem:[#allocation10 + $0x100] sm:$0xff]  ;;  %v1313_v59 = vld [vmem:[#allocation10 + $0x108] sm:$0xff] }
  0xc2   :  { %2003 = vperm.xlu0 %4707, %v1938_v61   ;;  %2006 = vperm.xlu1 %4708, %v1939_v0   ;;  %v1330_v46 = vld [vmem:[#allocation16 + $0x10] sm:$0xff]  ;;  %v1331_v47 = vld [vmem:[#allocation16 + $0x18] sm:$0xff]  ;;  %v1321_v11 = vld [vmem:[#allocation10 + $0x148] sm:$0xff] }
  0xc3   :  { %v4618_v48 = vpack.c.bf16 %v1331_v47, %v1330_v46  ;;  %v1314_v61 = vld [vmem:[#allocation10 + $0x110] sm:$0xff] }
  0xc4   :  { %4315 = vmatmul.mubr.msk.bf16.gmra.mrb[12].mxu0 %vm357_vm0, %v4727_v19  ;;  %4367 = vmatmul.mubr.msk.bf16.gmra.mrb[12].mxu1 %vm357_vm0, %v4728_v20  ;;  %v1944_v19 = vsel %vm1896_vm2, 1, %v5170_v40  ;;  %v1299_v20 = vld [vmem:[#allocation10 + $0x98] sm:$0xff] }
  0xc5   :  { %4318 = vmatprep.mubr.msk.bf16.mxu0 %vm357_vm0, %v4729_v21  ;;  %4370 = vmatprep.mubr.msk.bf16.mxu1 %vm357_vm0, %v4730_v22  ;;  %v4614_v21 = vpack.c.bf16 %v1329_v14, %v1328_v13  ;;  %v1945_v22 = vsel %vm1897_vm3, 1, %v5170_v40  ;;  %vm1803_vm12 = vcmp.ge.f32.partialorder %v1299_v20, 0.0  ;;  %vm1853_vm13 = vcmp.lt.f32.partialorder %v1299_v20, 64.0  ;;  %v1322_v13 = vld [vmem:[#allocation10 + $0x150] sm:$0xff] }
  0xc6   :  { %2009 = vperm.xlu0 %4707, %v1940_v5   ;;  %2012 = vperm.xlu1 %4708, %v1941_v7   ;;  %vm1901_vm15 = vmand %vm1803_vm12, %vm1853_vm13  ;;  %vm1808_vm13 = vcmp.ge.f32.partialorder %v1304_v35, 0.0  ;;  %v1318_v5 = vld [vmem:[#allocation10 + $0x130] sm:$0xff]  ;;  %v1319_v7 = vld [vmem:[#allocation10 + $0x138] sm:$0xff] }
  0xc7   :  { %4615 = vmatprep.subr.bf16.mxu0 %v4614_v21  ;;  %v1949_v34 = vsel %vm1901_vm15, 1, %v5170_v40  ;;  %vm1809_vm15 = vcmp.ge.f32.partialorder %v1305_v37, 0.0 }
  0xc8   :  { %4617 = vmatpush3.bf16.msra.mxu0 %v4614_v21  ;;  %v1326_v21 = vld [vmem:[#allocation10 + $0x170] sm:$0xff] }
  0xc9   :  { %4619 = vmatprep.subr.bf16.mxu0 %v4618_v48 }
  0xca   :  { %2015 = vperm.xlu0 %4707, %v1942_v10   ;;  %2018 = vperm.xlu1 %4708, %v1943_v12  }
  0xcc   :  { %4319 = vmatmul.mubr.msk.bf16.gmra.mrb[16].mxu0 %vm357_vm0, %v4731_v23  ;;  %4371 = vmatmul.mubr.msk.bf16.gmra.mrb[16].mxu1 %vm357_vm0, %v4732_v24  ;;  %v1300_v23 = vld [vmem:[#allocation10 + $0xa0] sm:$0xff]  ;;  %v1946_v24 = vsel %vm1898_vm8, 1, %v5170_v40  ;;  %vm1856_vm8 = vcmp.lt.f32.partialorder %v1302_v31, 64.0 }
  0xcd   :  { %4322 = vmatprep.mubr.msk.bf16.mxu0 %vm357_vm0, %v4733_v25  ;;  %4374 = vmatprep.mubr.msk.bf16.mxu1 %vm357_vm0, %v4734_v26  ;;  %v1301_v25 = vld [vmem:[#allocation10 + $0xa8] sm:$0xff]  ;;  %vm1804_vm1 = vcmp.ge.f32.partialorder %v1300_v23, 0.0  ;;  %vm1854_vm2 = vcmp.lt.f32.partialorder %v1300_v23, 64.0  ;;  %vm1904_vm11 = vmand %vm1806_vm7, %vm1856_vm8  ;;  %vm1861_vm7 = vcmp.lt.f32.partialorder %v1307_v44, 64.0  ;;  %v1327_v23 = vld [vmem:[#allocation10 + $0x178] sm:$0xff] }
  0xce   :  { %2021 = vperm.xlu0 %4707, %v1944_v19   ;;  %2024 = vperm.xlu1 %4708, %v1945_v22   ;;  %v4755_v26 = vld [vmem:[#allocation9 + $0xa8] sm:$0xff]   ;;  %vm1805_vm3 = vcmp.ge.f32.partialorder %v1301_v25, 0.0  ;;  %vm1855_vm4 = vcmp.lt.f32.partialorder %v1301_v25, 64.0  ;;  %vm1902_vm5 = vmand %vm1804_vm1, %vm1854_vm2  ;;  %vm1859_vm1 = vcmp.lt.f32.partialorder %v1305_v37, 64.0  ;;  %v1952_v43 = vsel %vm1904_vm11, 1, %v5170_v40 }
  0xcf   :  { %vm1903_vm6 = vmand %vm1805_vm3, %vm1855_vm4  ;;  %4621 = vmatpush3.bf16.msra.mxu0 %v4618_v48  ;;  %vm1862_vm11 = vcmp.lt.f32.partialorder %v1308_v49, 64.0  ;;  %v1325_v19 = vld [vmem:[#allocation10 + $0x168] sm:$0xff] }
  0xd0   :  { %vm1906_vm2 = vmand %vm1808_vm13, %vm1858_vm14 }
  0xd1   :  { %vm1907_vm3 = vmand %vm1809_vm15, %vm1859_vm1  ;;  %v1954_v50 = vsel %vm1906_vm2, 1, %v5170_v40 }
  0xd2   :  { %2027 = vperm.xlu0 %4707, %v1946_v24   ;;  %v1955_v52 = vsel %vm1907_vm3, 1, %v5170_v40 }
  0xd4   :  { %4323 = vmatmul.mubr.msk.bf16.gmra.mrb[20].mxu0 %vm357_vm0, %v4735_v27  ;;  %4375 = vmatmul.mubr.msk.bf16.gmra.mrb[20].mxu1 %vm357_vm0, %v4736_v28  ;;  %v1947_v27 = vsel %vm1899_vm9, 1, %v5170_v40  ;;  %v4756_v28 = vld [vmem:[#allocation7 + $0xa8] sm:$0xff]   ;;  %vm1807_vm9 = vcmp.ge.f32.partialorder %v1303_v33, 0.0 }
  0xd5   :  { %4326 = vmatprep.mubr.msk.bf16.mxu0 %vm357_vm0, %v4737_v29  ;;  %4378 = vmatprep.mubr.msk.bf16.mxu1 %vm357_vm0, %v4738_v30  ;;  %v4757_v29 = vld [vmem:[#allocation9 + $0xb0] sm:$0xff]   ;;  %vm1905_vm12 = vmand %vm1807_vm9, %vm1857_vm10  ;;  %vm1812_vm10 = vcmp.ge.f32.partialorder %v1308_v49, 0.0 }
  0xd6   :  { %v4758_v30 = vld [vmem:[#allocation7 + $0xb0] sm:$0xff]   ;;  %2030 = vperm.xlu1 %4708, %v1947_v27   ;;  %2033 = vperm.xlu0 %4707, %v1948_v32   ;;  %v1953_v45 = vsel %vm1905_vm12, 1, %v5170_v40  ;;  %vm1910_vm14 = vmand %vm1812_vm10, %vm1862_vm11  ;;  %vm1867_vm10 = vcmp.lt.f32.partialorder %v1313_v59, 64.0 }
  0xd7   :  { %v1958_v58 = vsel %vm1910_vm14, 1, %v5170_v40  ;;  %vm1868_vm14 = vcmp.lt.f32.partialorder %v1314_v61, 64.0 }
  0xda   :  { %2036 = vperm.xlu1 %4708, %v1949_v34  }
  0xdc   :  { %4327 = vmatmul.mubr.msk.bf16.gmra.mrb[24].mxu0 %vm357_vm0, %v4739_v36  ;;  %4379 = vmatmul.mubr.msk.bf16.gmra.mrb[24].mxu1 %vm357_vm0, %v4740_v38  ;;  %v1950_v36 = vsel %vm1902_vm5, 1, %v5170_v40  ;;  %v4759_v38 = vld [vmem:[#allocation9 + $0xb8] sm:$0xff]  }
  0xdd   :  { %4330 = vmatprep.mubr.msk.bf16.mxu0 %vm357_vm0, %v4741_v39  ;;  %4382 = vmatprep.mubr.msk.bf16.mxu1 %vm357_vm0, %v4742_v42  ;;  %v1951_v39 = vsel %vm1903_vm6, 1, %v5170_v40  ;;  %v1306_v42 = vld [vmem:[#allocation10 + $0xd0] sm:$0xff]  ;;  %vm1811_vm6 = vcmp.ge.f32.partialorder %v1307_v44, 0.0 }
  0xde   :  { %2039 = vperm.xlu0 %4707, %v1950_v36   ;;  %2042 = vperm.xlu1 %4708, %v1951_v39   ;;  %vm1810_vm4 = vcmp.ge.f32.partialorder %v1306_v42, 0.0  ;;  %vm1860_vm5 = vcmp.lt.f32.partialorder %v1306_v42, 64.0  ;;  %vm1909_vm9 = vmand %vm1811_vm6, %vm1861_vm7  ;;  %vm1816_vm7 = vcmp.ge.f32.partialorder %v1312_v57, 0.0 }
  0xdf   :  { %vm1908_vm8 = vmand %vm1810_vm4, %vm1860_vm5  ;;  %v1957_v56 = vsel %vm1909_vm9, 1, %v5170_v40  ;;  %vm1817_vm9 = vcmp.ge.f32.partialorder %v1313_v59, 0.0 }
  0xe2   :  { %2045 = vperm.xlu0 %4707, %v1952_v43   ;;  %2048 = vperm.xlu1 %4708, %v1953_v45  }
  0xe4   :  { %4331 = vmatmul.mubr.msk.bf16.gmra.mrb[28].mxu0 %vm357_vm0, %v4743_v51  ;;  %4383 = vmatmul.mubr.msk.bf16.gmra.mrb[28].mxu1 %vm357_vm0, %v4744_v53  ;;  %v1309_v51 = vld [vmem:[#allocation10 + $0xe8] sm:$0xff]  ;;  %v1310_v53 = vld [vmem:[#allocation10 + $0xf0] sm:$0xff] }
  0xe5   :  { %4334 = vmatprep.mubr.msk.bf16.mxu0 %vm357_vm0, %v4745_v54  ;;  %4386 = vmatprep.mubr.msk.bf16.mxu1 %vm357_vm0, %v4746_v55  ;;  %vm1813_vm12 = vcmp.ge.f32.partialorder %v1309_v51, 0.0  ;;  %vm1863_vm13 = vcmp.lt.f32.partialorder %v1309_v51, 64.0  ;;  %v1956_v54 = vsel %vm1908_vm8, 1, %v5170_v40  ;;  %v1311_v55 = vld [vmem:[#allocation10 + $0xf8] sm:$0xff]  ;;  %vm1814_vm1 = vcmp.ge.f32.partialorder %v1310_v53, 0.0 }
  0xe6   :  { %2051 = vperm.xlu0 %4707, %v1954_v50   ;;  %2054 = vperm.xlu1 %4708, %v1955_v52   ;;  %vm1911_vm15 = vmand %vm1813_vm12, %vm1863_vm13  ;;  %vm1864_vm2 = vcmp.lt.f32.partialorder %v1310_v53, 64.0  ;;  %vm1815_vm3 = vcmp.ge.f32.partialorder %v1311_v55, 0.0  ;;  %vm1865_vm4 = vcmp.lt.f32.partialorder %v1311_v55, 64.0  ;;  %vm1866_vm8 = vcmp.lt.f32.partialorder %v1312_v57, 64.0 }
  0xe7   :  { %v1959_v60 = vsel %vm1911_vm15, 1, %v5170_v40  ;;  %vm1912_vm5 = vmand %vm1814_vm1, %vm1864_vm2  ;;  %vm1818_vm13 = vcmp.ge.f32.partialorder %v1314_v61, 0.0 }
  0xe8   :  { %vm1913_vm6 = vmand %vm1815_vm3, %vm1865_vm4  ;;  %v1960_v62 = vsel %vm1912_vm5, 1, %v5170_v40 }
  0xe9   :  { %v1961_v0 = vsel %vm1913_vm6, 1, %v5170_v40  ;;  %vm1914_vm11 = vmand %vm1816_vm7, %vm1866_vm8 }
  0xea   :  { %2057 = vperm.xlu0 %4707, %v1956_v54   ;;  %2060 = vperm.xlu1 %4708, %v1957_v56   ;;  %vm1915_vm12 = vmand %vm1817_vm9, %vm1867_vm10  ;;  %vm1822_vm10 = vcmp.ge.f32.partialorder %v1318_v5, 0.0 }
  0xeb   :  { %v1963_v4 = vsel %vm1915_vm12, 1, %v5170_v40  ;;  %vm1916_vm2 = vmand %vm1818_vm13, %vm1868_vm14  ;;  %vm1823_vm12 = vcmp.ge.f32.partialorder %v1319_v7, 0.0  ;;  %vm1873_vm13 = vcmp.lt.f32.partialorder %v1319_v7, 64.0 }
  0xec   :  { %4335 = vmatmul.mubr.msk.bf16.gmra.mrb[32].mxu0 %vm357_vm0, %v4747_v63  ;;  %4387 = vmatmul.mubr.msk.bf16.gmra.mrb[32].mxu1 %vm357_vm0, %v4748_v1  ;;  %v1315_v63 = vld [vmem:[#allocation10 + $0x118] sm:$0xff]  ;;  %v1316_v1 = vld [vmem:[#allocation10 + $0x120] sm:$0xff]  ;;  %v1964_v6 = vsel %vm1916_vm2, 1, %v5170_v40 }
  0xed   :  { %4338 = vmatprep.mubr.msk.bf16.mxu0 %vm357_vm0, %v4749_v2  ;;  %4390 = vmatprep.mubr.msk.bf16.mxu1 %vm357_vm0, %v4750_v3  ;;  %vm1819_vm15 = vcmp.ge.f32.partialorder %v1315_v63, 0.0  ;;  %vm1869_vm1 = vcmp.lt.f32.partialorder %v1315_v63, 64.0  ;;  %v1962_v2 = vsel %vm1914_vm11, 1, %v5170_v40  ;;  %v1317_v3 = vld [vmem:[#allocation10 + $0x128] sm:$0xff]  ;;  %vm1820_vm4 = vcmp.ge.f32.partialorder %v1316_v1, 0.0 }
  0xee   :  { %2063 = vperm.xlu0 %4707, %v1958_v58   ;;  %2066 = vperm.xlu1 %4708, %v1959_v60   ;;  %vm1917_vm3 = vmand %vm1819_vm15, %vm1869_vm1  ;;  %vm1870_vm5 = vcmp.lt.f32.partialorder %v1316_v1, 64.0  ;;  %vm1821_vm6 = vcmp.ge.f32.partialorder %v1317_v3, 0.0  ;;  %vm1871_vm7 = vcmp.lt.f32.partialorder %v1317_v3, 64.0  ;;  %vm1872_vm11 = vcmp.lt.f32.partialorder %v1318_v5, 64.0 }
  0xef   :  { %v1965_v8 = vsel %vm1917_vm3, 1, %v5170_v40  ;;  %vm1918_vm8 = vmand %vm1820_vm4, %vm1870_vm5  ;;  %vm1825_vm3 = vcmp.ge.f32.partialorder %v1321_v11, 0.0  ;;  %vm1875_vm4 = vcmp.lt.f32.partialorder %v1321_v11, 64.0 }
  0xf0   :  { %vm1919_vm9 = vmand %vm1821_vm6, %vm1871_vm7  ;;  %v1966_v10 = vsel %vm1918_vm8, 1, %v5170_v40  ;;  %vm1826_vm7 = vcmp.ge.f32.partialorder %v1322_v13, 0.0  ;;  %vm1876_vm8 = vcmp.lt.f32.partialorder %v1322_v13, 64.0 }
  0xf1   :  { %v1967_v12 = vsel %vm1919_vm9, 1, %v5170_v40  ;;  %vm1920_vm14 = vmand %vm1822_vm10, %vm1872_vm11 }
  0xf2   :  { %2069 = vperm.xlu0 %4707, %v1960_v62   ;;  %2072 = vperm.xlu1 %4708, %v1961_v0   ;;  %vm1921_vm15 = vmand %vm1823_vm12, %vm1873_vm13  ;;  %v1968_v14 = vsel %vm1920_vm14, 1, %v5170_v40 }
  0xf3   :  { %vm1923_vm6 = vmand %vm1825_vm3, %vm1875_vm4  ;;  %vm1830_vm4 = vcmp.ge.f32.partialorder %v1326_v21, 0.0 }
  0xf4   :  { %4339 = vmatmul.mubr.msk.bf16.gmra.mrb[36].mxu0 %vm357_vm0, %v4751_v9  ;;  %4391 = vmatmul.mubr.msk.bf16.gmra.mrb[36].mxu1 %vm357_vm0, %v4752_v15  ;;  %v1320_v9 = vld [vmem:[#allocation10 + $0x140] sm:$0xff]  ;;  %v1323_v15 = vld [vmem:[#allocation10 + $0x158] sm:$0xff]  ;;  %v1971_v20 = vsel %vm1923_vm6, 1, %v5170_v40  ;;  %vm1924_vm11 = vmand %vm1826_vm7, %vm1876_vm8  ;;  %vm1831_vm6 = vcmp.ge.f32.partialorder %v1327_v23, 0.0  ;;  %vm1881_vm7 = vcmp.lt.f32.partialorder %v1327_v23, 64.0 }
  0xf5   :  { %4342 = vmatprep.mubr.msk.bf16.mxu0 %vm357_vm0, %v4753_v16  ;;  %4394 = vmatprep.mubr.msk.bf16.mxu1 %vm357_vm0, %v4754_v17  ;;  %vm1824_vm1 = vcmp.ge.f32.partialorder %v1320_v9, 0.0  ;;  %vm1874_vm2 = vcmp.lt.f32.partialorder %v1320_v9, 64.0  ;;  %v1969_v16 = vsel %vm1921_vm15, 1, %v5170_v40  ;;  %vm1827_vm9 = vcmp.ge.f32.partialorder %v1323_v15, 0.0  ;;  %v1324_v17 = vld [vmem:[#allocation10 + $0x160] sm:$0xff] }
  0xf6   :  { %2075 = vperm.xlu0 %4707, %v1962_v2   ;;  %2078 = vperm.xlu1 %4708, %v1963_v4   ;;  %vm1922_vm5 = vmand %vm1824_vm1, %vm1874_vm2  ;;  %vm1877_vm10 = vcmp.lt.f32.partialorder %v1323_v15, 64.0  ;;  %vm1828_vm13 = vcmp.ge.f32.partialorder %v1324_v17, 0.0  ;;  %vm1878_vm14 = vcmp.lt.f32.partialorder %v1324_v17, 64.0  ;;  %vm1829_vm15 = vcmp.ge.f32.partialorder %v1325_v19, 0.0 }
  0xf7   :  { %v1970_v18 = vsel %vm1922_vm5, 1, %v5170_v40  ;;  %vm1925_vm12 = vmand %vm1827_vm9, %vm1877_vm10  ;;  %vm1879_vm1 = vcmp.lt.f32.partialorder %v1325_v19, 64.0  ;;  %v1972_v22 = vsel %vm1924_vm11, 1, %v5170_v40  ;;  %vm1880_vm5 = vcmp.lt.f32.partialorder %v1326_v21, 64.0 }
  0xf8   :  { %v1973_v24 = vsel %vm1925_vm12, 1, %v5170_v40  ;;  %vm1926_vm2 = vmand %vm1828_vm13, %vm1878_vm14 }
  0xf9   :  { %vm1927_vm3 = vmand %vm1829_vm15, %vm1879_vm1  ;;  %v1974_v25 = vsel %vm1926_vm2, 1, %v5170_v40 }
  0xfa   :  { %2081 = vperm.xlu0 %4707, %v1964_v6   ;;  %2084 = vperm.xlu1 %4708, %v1965_v8   ;;  %vm1928_vm8 = vmand %vm1830_vm4, %vm1880_vm5 }
  0xfb   :  { %vm1929_vm9 = vmand %vm1831_vm6, %vm1881_vm7  ;;  %v1976_v27 = vsel %vm1928_vm8, 1, %v5170_v40 }
  0xfc   :  { %4343 = vmatmul.mubr.msk.bf16.gmra.mrb[40].mxu0 %vm357_vm0, %v4755_v26  ;;  %4395 = vmatmul.mubr.msk.bf16.gmra.mrb[40].mxu1 %vm357_vm0, %v4756_v28  ;;  %v1975_v26 = vsel %vm1927_vm3, 1, %v5170_v40  ;;  %v1977_v28 = vsel %vm1929_vm9, 1, %v5170_v40 }
  0xfd   :  { %4346 = vmatprep.mubr.msk.bf16.mxu0 %vm357_vm0, %v4757_v29  ;;  %4398 = vmatprep.mubr.msk.bf16.mxu1 %vm357_vm0, %v4758_v30  ;;  %v5468_v29 = vld [vmem:[#allocation15] ss:$0 sm:$0xff] }
  0xfe   :  { %2087 = vperm.xlu0 %4707, %v1966_v10   ;;  %2090 = vperm.xlu1 %4708, %v1967_v12  }
 0x102   :  { %2093 = vperm.xlu0 %4707, %v1968_v14   ;;  %2096 = vperm.xlu1 %4708, %v1969_v16  }
 0x104   :  { %4347 = vmatmul.mubr.msk.bf16.gmra.mrb[44].mxu0 %vm357_vm0, %v4759_v38  ;;  %4399 = vmatmul.mubr.msk.bf16.gmra.mrb[44].mxu1 %vm357_vm0, %v4760_v41 }
 0x106   :  { %2099 = vperm.xlu0 %4707, %v1970_v18   ;;  %2102 = vperm.xlu1 %4708, %v1971_v20  }
 0x10a   :  { %2105 = vperm.xlu0 %4707, %v1972_v22   ;;  %2108 = vperm.xlu1 %4708, %v1973_v24  }
 0x10e   :  { %2111 = vperm.xlu0 %4707, %v1974_v25   ;;  %2114 = vperm.xlu1 %4708, %v1975_v26  }
 0x112   :  { %2117 = vperm.xlu0 %4707, %v1976_v27   ;;  %2120 = vperm.xlu1 %4708, %v1977_v28  }
 0x17f   :  { %v4304_v30 = vpop.f32.mrb[0].mxu0  ;;  %v4356_v32 = vpop.f32.mrb[0].mxu1 }
 0x180   :  { %v473_v31 = vadd.f32 %v4304_v30, %v5468_v29  ;;  %v464_v33 = vpop.f32.mrb[1].mxu0  ;;  %v945_v35 = vpop.f32.mrb[1].mxu1 }
 0x181   :  { %v465_v34 = vadd.f32 %v5468_v29, %v464_v33  ;;  %v4305_v36 = vpop.f32.mrb[2].mxu0  ;;  %v4357_v39 = vpop.f32.mrb[2].mxu1 }
 0x182   :  { %v954_v37 = vadd.f32 %v4356_v32, %v473_v31  ;;  %v476_v38 = vadd.f32 %v4305_v36, %v5468_v29  ;;  %2979 = vrot.lane.b32.xlu0 %v473_v31, %s5171_s8  ;;  %v467_v40 = vpop.f32.mrb[3].mxu0  ;;  %v948_v42 = vpop.f32.mrb[3].mxu1 }
 0x183   :  { %v946_v41 = vadd.f32 %v945_v35, %v465_v34  ;;  %v468_v43 = vadd.f32 %v5468_v29, %v467_v40 }
 0x184   :  { %v957_v44 = vadd.f32 %v4357_v39, %v476_v38  ;;  %2981 = vrot.lane.b32.xlu1 %v476_v38, %s5171_s8  ;;  %v1186_v47 = vmul.f32 0.2, %v954_v37  ;;  %vm1138_vm11 = vcmp.ge.f32.partialorder %v954_v37, 0.0 }
 0x185   :  { %vm1136_vm10 = vcmp.ge.f32.partialorder %v946_v41, 0.0  ;;  %v1184_v45 = vmul.f32 0.2, %v946_v41  ;;  %v949_v46 = vadd.f32 %v948_v42, %v468_v43 }
 0x186   :  { %2975 = vrot.lane.b32.xlu0 %v465_v34, %s5171_s8  ;;  %v1187_v54 = vmul.f32 0.2, %v957_v44  ;;  %vm1139_vm13 = vcmp.ge.f32.partialorder %v957_v44, 0.0  ;;  %v1234_v63 = vsel %vm1138_vm11, %v954_v37, %v1186_v47 }
 0x187   :  { %vm1137_vm12 = vcmp.ge.f32.partialorder %v949_v46, 0.0  ;;  %v1185_v48 = vmul.f32 0.2, %v949_v46  ;;  %v4308_v49 = vpop.f32.mrb[4].mxu0  ;;  %v1232_v50 = vsel %vm1136_vm10, %v946_v41, %v1184_v45  ;;  %v4360_v52 = vpop.f32.mrb[4].mxu1 }
 0x188   :  { %v489_v51 = vadd.f32 %v4308_v49, %v5468_v29  ;;  %v480_v53 = vpop.f32.mrb[5].mxu0  ;;  %2977 = vrot.lane.b32.xlu1 %v468_v43, %s5171_s8  ;;  %4410 = vmatprep.mubr.msk.f32.mxu0 %vm357_vm0, %v1232_v50  ;;  %v961_v57 = vpop.f32.mrb[5].mxu1  ;;  %v1235_v6 = vsel %vm1139_vm13, %v957_v44, %v1187_v54 }
 0x189   :  { %v1233_v55 = vsel %vm1137_vm12, %v949_v46, %v1185_v48  ;;  %v481_v56 = vadd.f32 %v5468_v29, %v480_v53  ;;  %v4309_v58 = vpop.f32.mrb[6].mxu0  ;;  %v4361_v61 = vpop.f32.mrb[6].mxu1 }
 0x18a   :  { %v970_v59 = vadd.f32 %v4360_v52, %v489_v51  ;;  %v492_v60 = vadd.f32 %v4309_v58, %v5468_v29  ;;  %v483_v62 = vpop.f32.mrb[7].mxu0  ;;  %2987 = vrot.lane.b32.xlu0 %v489_v51, %s5171_s8  ;;  %4411 = vmatmul.mubr.msk.f32.vlgmr.msra.gmra.mrb[48].mxu0 %vm357_vm0, %v1233_v55  ;;  %v964_v2 = vpop.f32.mrb[7].mxu1 }
 0x18b   :  { %v962_v0 = vadd.f32 %v961_v57, %v481_v56  ;;  %v484_v1 = vadd.f32 %v5468_v29, %v483_v62  ;;  %4413 = vmatprep.mubr.msk.f32.mxu0 %vm357_vm0, %v1234_v63 }
 0x18c   :  { %v973_v3 = vadd.f32 %v4361_v61, %v492_v60  ;;  %2989 = vrot.lane.b32.xlu1 %v492_v60, %s5171_s8  ;;  %v1190_v7 = vmul.f32 0.2, %v970_v59  ;;  %vm1142_vm15 = vcmp.ge.f32.partialorder %v970_v59, 0.0 }
 0x18d   :  { %vm1140_vm14 = vcmp.ge.f32.partialorder %v962_v0, 0.0  ;;  %v1188_v4 = vmul.f32 0.2, %v962_v0  ;;  %v965_v5 = vadd.f32 %v964_v2, %v484_v1 }
 0x18e   :  { %2983 = vrot.lane.b32.xlu0 %v481_v56, %s5171_s8  ;;  %4414 = vmatmul.mubr.msk.f32.gmra.mrb[50].mxu0 %vm357_vm0, %v1235_v6  ;;  %v1191_v14 = vmul.f32 0.2, %v973_v3  ;;  %vm1143_vm2 = vcmp.ge.f32.partialorder %v973_v3, 0.0  ;;  %v1238_v23 = vsel %vm1142_vm15, %v970_v59, %v1190_v7 }
 0x18f   :  { %vm1141_vm1 = vcmp.ge.f32.partialorder %v965_v5, 0.0  ;;  %v1189_v8 = vmul.f32 0.2, %v965_v5  ;;  %v4312_v9 = vpop.f32.mrb[8].mxu0  ;;  %v1236_v10 = vsel %vm1140_vm14, %v962_v0, %v1188_v4  ;;  %v4364_v12 = vpop.f32.mrb[8].mxu1 }
 0x190   :  { %v505_v11 = vadd.f32 %v4312_v9, %v5468_v29  ;;  %v496_v13 = vpop.f32.mrb[9].mxu0  ;;  %2985 = vrot.lane.b32.xlu1 %v484_v1, %s5171_s8  ;;  %4416 = vmatprep.mubr.msk.f32.mxu0 %vm357_vm0, %v1236_v10  ;;  %v977_v16 = vpop.f32.mrb[9].mxu1  ;;  %v1239_v31 = vsel %vm1143_vm2, %v973_v3, %v1191_v14 }
 0x191   :  { %v497_v15 = vadd.f32 %v5468_v29, %v496_v13  ;;  %v4313_v17 = vpop.f32.mrb[10].mxu0  ;;  %v1237_v18 = vsel %vm1141_vm1, %v965_v5, %v1189_v8  ;;  %v4365_v21 = vpop.f32.mrb[10].mxu1 }
 0x192   :  { %v986_v19 = vadd.f32 %v4364_v12, %v505_v11  ;;  %v508_v20 = vadd.f32 %v4313_v17, %v5468_v29  ;;  %v499_v22 = vpop.f32.mrb[11].mxu0  ;;  %2995 = vrot.lane.b32.xlu0 %v505_v11, %s5171_s8  ;;  %4417 = vmatmul.mubr.msk.f32.gmra.mrb[52].mxu0 %vm357_vm0, %v1237_v18  ;;  %v980_v26 = vpop.f32.mrb[11].mxu1 }
 0x193   :  { %v978_v24 = vadd.f32 %v977_v16, %v497_v15  ;;  %v500_v25 = vadd.f32 %v5468_v29, %v499_v22  ;;  %4419 = vmatprep.mubr.msk.f32.mxu0 %vm357_vm0, %v1238_v23 }
 0x194   :  { %v989_v27 = vadd.f32 %v4365_v21, %v508_v20  ;;  %2997 = vrot.lane.b32.xlu1 %v508_v20, %s5171_s8  ;;  %v1194_v32 = vmul.f32 0.2, %v986_v19  ;;  %vm1146_vm4 = vcmp.ge.f32.partialorder %v986_v19, 0.0 }
 0x195   :  { %vm1144_vm3 = vcmp.ge.f32.partialorder %v978_v24, 0.0  ;;  %v1192_v28 = vmul.f32 0.2, %v978_v24  ;;  %v981_v30 = vadd.f32 %v980_v26, %v500_v25 }
 0x196   :  { %2991 = vrot.lane.b32.xlu0 %v497_v15, %s5171_s8  ;;  %4420 = vmatmul.mubr.msk.f32.gmra.mrb[54].mxu0 %vm357_vm0, %v1239_v31  ;;  %v1195_v39 = vmul.f32 0.2, %v989_v27  ;;  %vm1147_vm6 = vcmp.ge.f32.partialorder %v989_v27, 0.0  ;;  %v1242_v48 = vsel %vm1146_vm4, %v986_v19, %v1194_v32 }
 0x197   :  { %vm1145_vm5 = vcmp.ge.f32.partialorder %v981_v30, 0.0  ;;  %v1193_v33 = vmul.f32 0.2, %v981_v30  ;;  %v4316_v34 = vpop.f32.mrb[12].mxu0  ;;  %v1240_v35 = vsel %vm1144_vm3, %v978_v24, %v1192_v28  ;;  %v4368_v37 = vpop.f32.mrb[12].mxu1 }
 0x198   :  { %v5506_v36 = vadd.f32 %v4316_v34, %v5468_v29  ;;  %v512_v38 = vpop.f32.mrb[13].mxu0  ;;  %2993 = vrot.lane.b32.xlu1 %v500_v25, %s5171_s8  ;;  %4422 = vmatprep.mubr.msk.f32.mxu0 %vm357_vm0, %v1240_v35  ;;  %v993_v41 = vpop.f32.mrb[13].mxu1  ;;  %v1243_v55 = vsel %vm1147_vm6, %v989_v27, %v1195_v39 }
 0x199   :  { %v513_v40 = vadd.f32 %v5468_v29, %v512_v38  ;;  %v4317_v42 = vpop.f32.mrb[14].mxu0  ;;  %v1241_v43 = vsel %vm1145_vm5, %v981_v30, %v1193_v33  ;;  %v4369_v46 = vpop.f32.mrb[14].mxu1 }
 0x19a   :  { %v1002_v44 = vadd.f32 %v4368_v37, %v5506_v36  ;;  %v5513_v45 = vadd.f32 %v4317_v42, %v5468_v29  ;;  %v515_v47 = vpop.f32.mrb[15].mxu0  ;;  %4423 = vmatmul.mubr.msk.f32.gmra.mrb[56].mxu0 %vm357_vm0, %v1241_v43  ;;  %v996_v51 = vpop.f32.mrb[15].mxu1 }
 0x19b   :  { %v994_v49 = vadd.f32 %v993_v41, %v513_v40  ;;  %v516_v50 = vadd.f32 %v5468_v29, %v515_v47  ;;  %2999 = vrot.lane.b32.xlu0 %v513_v40, %s5171_s8  ;;  %4425 = vmatprep.mubr.msk.f32.mxu0 %vm357_vm0, %v1242_v48 }
 0x19c   :  { %v1005_v52 = vadd.f32 %v4369_v46, %v5513_v45  ;;  %v1198_v56 = vmul.f32 0.2, %v1002_v44  ;;  %vm1150_vm8 = vcmp.ge.f32.partialorder %v1002_v44, 0.0 }
 0x19d   :  { %vm1148_vm7 = vcmp.ge.f32.partialorder %v994_v49, 0.0  ;;  %v1196_v53 = vmul.f32 0.2, %v994_v49  ;;  %v997_v54 = vadd.f32 %v996_v51, %v516_v50  ;;  %3001 = vrot.lane.b32.xlu1 %v516_v50, %s5171_s8 }
 0x19e   :  { %4426 = vmatmul.mubr.msk.f32.gmra.mrb[58].mxu0 %vm357_vm0, %v1243_v55  ;;  %v1199_v63 = vmul.f32 0.2, %v1005_v52  ;;  %vm1151_vm10 = vcmp.ge.f32.partialorder %v1005_v52, 0.0  ;;  %v1246_v8 = vsel %vm1150_vm8, %v1002_v44, %v1198_v56 }
 0x19f   :  { %vm1149_vm9 = vcmp.ge.f32.partialorder %v997_v54, 0.0  ;;  %v1197_v57 = vmul.f32 0.2, %v997_v54  ;;  %v4320_v58 = vpop.f32.mrb[16].mxu0  ;;  %v1244_v59 = vsel %vm1148_vm7, %v994_v49, %v1196_v53  ;;  %v4372_v61 = vpop.f32.mrb[16].mxu1 }
 0x1a0   :  { %v537_v60 = vadd.f32 %v4320_v58, %v5468_v29  ;;  %v528_v62 = vpop.f32.mrb[17].mxu0  ;;  %4428 = vmatprep.mubr.msk.f32.mxu0 %vm357_vm0, %v1244_v59  ;;  %v1009_v1 = vpop.f32.mrb[17].mxu1  ;;  %v1247_v15 = vsel %vm1151_vm10, %v1005_v52, %v1199_v63 }
 0x1a1   :  { %v529_v0 = vadd.f32 %v5468_v29, %v528_v62  ;;  %v4321_v2 = vpop.f32.mrb[18].mxu0  ;;  %v1245_v3 = vsel %vm1149_vm9, %v997_v54, %v1197_v57  ;;  %v4373_v6 = vpop.f32.mrb[18].mxu1 }
 0x1a2   :  { %v1018_v4 = vadd.f32 %v4372_v61, %v537_v60  ;;  %v540_v5 = vadd.f32 %v4321_v2, %v5468_v29  ;;  %v531_v7 = vpop.f32.mrb[19].mxu0  ;;  %3011 = vrot.lane.b32.xlu0 %v537_v60, %s5171_s8  ;;  %4429 = vmatmul.mubr.msk.f32.gmra.mrb[60].mxu0 %vm357_vm0, %v1245_v3  ;;  %v1012_v11 = vpop.f32.mrb[19].mxu1 }
 0x1a3   :  { %v1010_v9 = vadd.f32 %v1009_v1, %v529_v0  ;;  %v532_v10 = vadd.f32 %v5468_v29, %v531_v7  ;;  %4431 = vmatprep.mubr.msk.f32.mxu0 %vm357_vm0, %v1246_v8 }
 0x1a4   :  { %v1021_v12 = vadd.f32 %v4373_v6, %v540_v5  ;;  %3013 = vrot.lane.b32.xlu1 %v540_v5, %s5171_s8  ;;  %v1202_v16 = vmul.f32 0.2, %v1018_v4  ;;  %vm1154_vm12 = vcmp.ge.f32.partialorder %v1018_v4, 0.0 }
 0x1a5   :  { %vm1152_vm11 = vcmp.ge.f32.partialorder %v1010_v9, 0.0  ;;  %v1200_v13 = vmul.f32 0.2, %v1010_v9  ;;  %v1013_v14 = vadd.f32 %v1012_v11, %v532_v10 }
 0x1a6   :  { %3007 = vrot.lane.b32.xlu0 %v529_v0, %s5171_s8  ;;  %4432 = vmatmul.mubr.msk.f32.gmra.mrb[62].mxu0 %vm357_vm0, %v1247_v15  ;;  %v1203_v23 = vmul.f32 0.2, %v1021_v12  ;;  %vm1155_vm14 = vcmp.ge.f32.partialorder %v1021_v12, 0.0  ;;  %v1250_v33 = vsel %vm1154_vm12, %v1018_v4, %v1202_v16 }
 0x1a7   :  { %vm1153_vm13 = vcmp.ge.f32.partialorder %v1013_v14, 0.0  ;;  %v1201_v17 = vmul.f32 0.2, %v1013_v14  ;;  %v4324_v18 = vpop.f32.mrb[20].mxu0  ;;  %v1248_v19 = vsel %vm1152_vm11, %v1010_v9, %v1200_v13  ;;  %v4376_v21 = vpop.f32.mrb[20].mxu1 }
 0x1a8   :  { %v553_v20 = vadd.f32 %v4324_v18, %v5468_v29  ;;  %v544_v22 = vpop.f32.mrb[21].mxu0  ;;  %3009 = vrot.lane.b32.xlu1 %v532_v10, %s5171_s8  ;;  %4434 = vmatprep.mubr.msk.f32.mxu0 %vm357_vm0, %v1248_v19  ;;  %v1025_v25 = vpop.f32.mrb[21].mxu1  ;;  %v1251_v41 = vsel %vm1155_vm14, %v1021_v12, %v1203_v23 }
 0x1a9   :  { %v545_v24 = vadd.f32 %v5468_v29, %v544_v22  ;;  %v4325_v26 = vpop.f32.mrb[22].mxu0  ;;  %v1249_v27 = vsel %vm1153_vm13, %v1013_v14, %v1201_v17  ;;  %v4377_v31 = vpop.f32.mrb[22].mxu1 }
 0x1aa   :  { %v1034_v28 = vadd.f32 %v4376_v21, %v553_v20  ;;  %v556_v30 = vadd.f32 %v4325_v26, %v5468_v29  ;;  %v547_v32 = vpop.f32.mrb[23].mxu0  ;;  %3019 = vrot.lane.b32.xlu0 %v553_v20, %s5171_s8  ;;  %4435 = vmatmul.mubr.msk.f32.gmra.mrb[64].mxu0 %vm357_vm0, %v1249_v27  ;;  %v1028_v37 = vpop.f32.mrb[23].mxu1 }
 0x1ab   :  { %v1026_v34 = vadd.f32 %v1025_v25, %v545_v24  ;;  %v548_v35 = vadd.f32 %v5468_v29, %v547_v32  ;;  %4437 = vmatprep.mubr.msk.f32.mxu0 %vm357_vm0, %v1250_v33 }
 0x1ac   :  { %v1037_v38 = vadd.f32 %v4377_v31, %v556_v30  ;;  %3021 = vrot.lane.b32.xlu1 %v556_v30, %s5171_s8  ;;  %v1206_v42 = vmul.f32 0.2, %v1034_v28  ;;  %vm1158_vm1 = vcmp.ge.f32.partialorder %v1034_v28, 0.0 }
 0x1ad   :  { %vm1156_vm15 = vcmp.ge.f32.partialorder %v1026_v34, 0.0  ;;  %v1204_v39 = vmul.f32 0.2, %v1026_v34  ;;  %v1029_v40 = vadd.f32 %v1028_v37, %v548_v35 }
 0x1ae   :  { %3015 = vrot.lane.b32.xlu0 %v545_v24, %s5171_s8  ;;  %4438 = vmatmul.mubr.msk.f32.gmra.mrb[66].mxu0 %vm357_vm0, %v1251_v41  ;;  %v1207_v50 = vmul.f32 0.2, %v1037_v38  ;;  %vm1159_vm3 = vcmp.ge.f32.partialorder %v1037_v38, 0.0  ;;  %v1254_v59 = vsel %vm1158_vm1, %v1034_v28, %v1206_v42 }
 0x1af   :  { %vm1157_vm2 = vcmp.ge.f32.partialorder %v1029_v40, 0.0  ;;  %v1205_v43 = vmul.f32 0.2, %v1029_v40  ;;  %v4328_v44 = vpop.f32.mrb[24].mxu0  ;;  %v1252_v46 = vsel %vm1156_vm15, %v1026_v34, %v1204_v39  ;;  %v4380_v48 = vpop.f32.mrb[24].mxu1 }
 0x1b0   :  { %v569_v47 = vadd.f32 %v4328_v44, %v5468_v29  ;;  %v560_v49 = vpop.f32.mrb[25].mxu0  ;;  %3017 = vrot.lane.b32.xlu1 %v548_v35, %s5171_s8  ;;  %4440 = vmatprep.mubr.msk.f32.mxu0 %vm357_vm0, %v1252_v46  ;;  %v1041_v52 = vpop.f32.mrb[25].mxu1  ;;  %v1255_v2 = vsel %vm1159_vm3, %v1037_v38, %v1207_v50 }
 0x1b1   :  { %v561_v51 = vadd.f32 %v5468_v29, %v560_v49  ;;  %v4329_v53 = vpop.f32.mrb[26].mxu0  ;;  %v1253_v54 = vsel %vm1157_vm2, %v1029_v40, %v1205_v43  ;;  %v4381_v57 = vpop.f32.mrb[26].mxu1 }
 0x1b2   :  { %v1050_v55 = vadd.f32 %v4380_v48, %v569_v47  ;;  %v572_v56 = vadd.f32 %v4329_v53, %v5468_v29  ;;  %v563_v58 = vpop.f32.mrb[27].mxu0  ;;  %3027 = vrot.lane.b32.xlu0 %v569_v47, %s5171_s8  ;;  %4441 = vmatmul.mubr.msk.f32.gmra.mrb[68].mxu0 %vm357_vm0, %v1253_v54  ;;  %v1044_v62 = vpop.f32.mrb[27].mxu1  ;;  %v165_v47 = vld [vmem:[#allocation18] sm:$0xff] }
 0x1b3   :  { %v1042_v60 = vadd.f32 %v1041_v52, %v561_v51  ;;  %v564_v61 = vadd.f32 %v5468_v29, %v563_v58  ;;  %4443 = vmatprep.mubr.msk.f32.mxu0 %vm357_vm0, %v1254_v59  ;;  %4482 = vmatprep.subr.mxu1 %v165_v47 }
 0x1b4   :  { %v1053_v63 = vadd.f32 %v4381_v57, %v572_v56  ;;  %3029 = vrot.lane.b32.xlu1 %v572_v56, %s5171_s8  ;;  %v1210_v3 = vmul.f32 0.2, %v1050_v55  ;;  %vm1162_vm5 = vcmp.ge.f32.partialorder %v1050_v55, 0.0  ;;  %4483 = vmatpush3.msra.mxu1 %v165_v47 }
 0x1b5   :  { %vm1160_vm4 = vcmp.ge.f32.partialorder %v1042_v60, 0.0  ;;  %v1208_v0 = vmul.f32 0.2, %v1042_v60  ;;  %v1045_v1 = vadd.f32 %v1044_v62, %v564_v61 }
 0x1b6   :  { %3023 = vrot.lane.b32.xlu0 %v561_v51, %s5171_s8  ;;  %4444 = vmatmul.mubr.msk.f32.gmra.mrb[70].mxu0 %vm357_vm0, %v1255_v2  ;;  %v1211_v10 = vmul.f32 0.2, %v1053_v63  ;;  %vm1163_vm7 = vcmp.ge.f32.partialorder %v1053_v63, 0.0  ;;  %v1258_v19 = vsel %vm1162_vm5, %v1050_v55, %v1210_v3 }
 0x1b7   :  { %vm1161_vm6 = vcmp.ge.f32.partialorder %v1045_v1, 0.0  ;;  %v1209_v4 = vmul.f32 0.2, %v1045_v1  ;;  %v4332_v5 = vpop.f32.mrb[28].mxu0  ;;  %v1256_v6 = vsel %vm1160_vm4, %v1042_v60, %v1208_v0  ;;  %v4384_v8 = vpop.f32.mrb[28].mxu1 }
 0x1b8   :  { %v585_v7 = vadd.f32 %v4332_v5, %v5468_v29  ;;  %v576_v9 = vpop.f32.mrb[29].mxu0  ;;  %3025 = vrot.lane.b32.xlu1 %v564_v61, %s5171_s8  ;;  %4446 = vmatprep.mubr.msk.f32.mxu0 %vm357_vm0, %v1256_v6  ;;  %v1057_v12 = vpop.f32.mrb[29].mxu1  ;;  %v1259_v26 = vsel %vm1163_vm7, %v1053_v63, %v1211_v10 }
 0x1b9   :  { %v577_v11 = vadd.f32 %v5468_v29, %v576_v9  ;;  %v4333_v13 = vpop.f32.mrb[30].mxu0  ;;  %v1257_v14 = vsel %vm1161_vm6, %v1045_v1, %v1209_v4  ;;  %v4385_v17 = vpop.f32.mrb[30].mxu1 }
 0x1ba   :  { %v1066_v15 = vadd.f32 %v4384_v8, %v585_v7  ;;  %v588_v16 = vadd.f32 %v4333_v13, %v5468_v29  ;;  %v579_v18 = vpop.f32.mrb[31].mxu0  ;;  %3035 = vrot.lane.b32.xlu0 %v585_v7, %s5171_s8  ;;  %4447 = vmatmul.mubr.msk.f32.gmra.mrb[72].mxu0 %vm357_vm0, %v1257_v14  ;;  %v1060_v22 = vpop.f32.mrb[31].mxu1 }
 0x1bb   :  { %v1058_v20 = vadd.f32 %v1057_v12, %v577_v11  ;;  %v580_v21 = vadd.f32 %v5468_v29, %v579_v18  ;;  %4449 = vmatprep.mubr.msk.f32.mxu0 %vm357_vm0, %v1258_v19 }
 0x1bc   :  { %v1069_v23 = vadd.f32 %v4385_v17, %v588_v16  ;;  %3037 = vrot.lane.b32.xlu1 %v588_v16, %s5171_s8  ;;  %v1214_v27 = vmul.f32 0.2, %v1066_v15  ;;  %vm1166_vm9 = vcmp.ge.f32.partialorder %v1066_v15, 0.0 }
 0x1bd   :  { %vm1164_vm8 = vcmp.ge.f32.partialorder %v1058_v20, 0.0  ;;  %v1212_v24 = vmul.f32 0.2, %v1058_v20  ;;  %v1061_v25 = vadd.f32 %v1060_v22, %v580_v21 }
 0x1be   :  { %3031 = vrot.lane.b32.xlu0 %v577_v11, %s5171_s8  ;;  %4450 = vmatmul.mubr.msk.f32.gmra.mrb[74].mxu0 %vm357_vm0, %v1259_v26  ;;  %v1215_v35 = vmul.f32 0.2, %v1069_v23  ;;  %vm1167_vm11 = vcmp.ge.f32.partialorder %v1069_v23, 0.0  ;;  %v1262_v46 = vsel %vm1166_vm9, %v1066_v15, %v1214_v27 }
 0x1bf   :  { %vm1165_vm10 = vcmp.ge.f32.partialorder %v1061_v25, 0.0  ;;  %v1213_v28 = vmul.f32 0.2, %v1061_v25  ;;  %v4336_v30 = vpop.f32.mrb[32].mxu0  ;;  %v1260_v31 = vsel %vm1164_vm8, %v1058_v20, %v1212_v24  ;;  %v4388_v33 = vpop.f32.mrb[32].mxu1 }
 0x1c0   :  { %v601_v32 = vadd.f32 %v4336_v30, %v5468_v29  ;;  %v592_v34 = vpop.f32.mrb[33].mxu0  ;;  %3033 = vrot.lane.b32.xlu1 %v580_v21, %s5171_s8  ;;  %4452 = vmatprep.mubr.msk.f32.mxu0 %vm357_vm0, %v1260_v31  ;;  %v1073_v38 = vpop.f32.mrb[33].mxu1  ;;  %v1263_v54 = vsel %vm1167_vm11, %v1069_v23, %v1215_v35 }
 0x1c1   :  { %v593_v37 = vadd.f32 %v5468_v29, %v592_v34  ;;  %v4337_v39 = vpop.f32.mrb[34].mxu0  ;;  %v1261_v40 = vsel %vm1165_vm10, %v1061_v25, %v1213_v28  ;;  %v4389_v43 = vpop.f32.mrb[34].mxu1 }
 0x1c2   :  { %v1082_v41 = vadd.f32 %v4388_v33, %v601_v32  ;;  %v604_v42 = vadd.f32 %v4337_v39, %v5468_v29  ;;  %v595_v44 = vpop.f32.mrb[35].mxu0  ;;  %3043 = vrot.lane.b32.xlu0 %v601_v32, %s5171_s8  ;;  %4453 = vmatmul.mubr.msk.f32.gmra.mrb[76].mxu0 %vm357_vm0, %v1261_v40  ;;  %v1076_v50 = vpop.f32.mrb[35].mxu1 }
 0x1c3   :  { %v1074_v48 = vadd.f32 %v1073_v38, %v593_v37  ;;  %v596_v49 = vadd.f32 %v5468_v29, %v595_v44  ;;  %4455 = vmatprep.mubr.msk.f32.mxu0 %vm357_vm0, %v1262_v46 }
 0x1c4   :  { %v1085_v51 = vadd.f32 %v4389_v43, %v604_v42  ;;  %3045 = vrot.lane.b32.xlu1 %v604_v42, %s5171_s8  ;;  %v1218_v55 = vmul.f32 0.2, %v1082_v41  ;;  %vm1170_vm13 = vcmp.ge.f32.partialorder %v1082_v41, 0.0 }
 0x1c5   :  { %vm1168_vm12 = vcmp.ge.f32.partialorder %v1074_v48, 0.0  ;;  %v1216_v52 = vmul.f32 0.2, %v1074_v48  ;;  %v1077_v53 = vadd.f32 %v1076_v50, %v596_v49 }
 0x1c6   :  { %3039 = vrot.lane.b32.xlu0 %v593_v37, %s5171_s8  ;;  %4456 = vmatmul.mubr.msk.f32.gmra.mrb[78].mxu0 %vm357_vm0, %v1263_v54  ;;  %v1219_v62 = vmul.f32 0.2, %v1085_v51  ;;  %vm1171_vm15 = vcmp.ge.f32.partialorder %v1085_v51, 0.0  ;;  %v1266_v7 = vsel %vm1170_vm13, %v1082_v41, %v1218_v55  ;;  %vm2218_vm13 = vcmask 64512  }
 0x1c7   :  { %vm1169_vm14 = vcmp.ge.f32.partialorder %v1077_v53, 0.0  ;;  %v1217_v56 = vmul.f32 0.2, %v1077_v53  ;;  %v4340_v57 = vpop.f32.mrb[36].mxu0  ;;  %v1264_v58 = vsel %vm1168_vm12, %v1074_v48, %v1216_v52  ;;  %v4392_v60 = vpop.f32.mrb[36].mxu1 }
 0x1c8   :  { %v617_v59 = vadd.f32 %v4340_v57, %v5468_v29  ;;  %v608_v61 = vpop.f32.mrb[37].mxu0  ;;  %3041 = vrot.lane.b32.xlu1 %v596_v49, %s5171_s8  ;;  %4458 = vmatprep.mubr.msk.f32.mxu0 %vm357_vm0, %v1264_v58  ;;  %v1089_v0 = vpop.f32.mrb[37].mxu1  ;;  %v1267_v14 = vsel %vm1171_vm15, %v1085_v51, %v1219_v62 }
 0x1c9   :  { %v609_v63 = vadd.f32 %v5468_v29, %v608_v61  ;;  %v4341_v1 = vpop.f32.mrb[38].mxu0  ;;  %v1265_v2 = vsel %vm1169_vm14, %v1077_v53, %v1217_v56  ;;  %v4393_v5 = vpop.f32.mrb[38].mxu1 }
 0x1ca   :  { %v1098_v3 = vadd.f32 %v4392_v60, %v617_v59  ;;  %v620_v4 = vadd.f32 %v4341_v1, %v5468_v29  ;;  %v611_v6 = vpop.f32.mrb[39].mxu0  ;;  %3003 = vrot.lane.b32.xlu0 %v5506_v36, %s5171_s8  ;;  %4459 = vmatmul.mubr.msk.f32.gmra.mrb[80].mxu0 %vm357_vm0, %v1265_v2  ;;  %v1092_v10 = vpop.f32.mrb[39].mxu1 }
 0x1cb   :  { %v1090_v8 = vadd.f32 %v1089_v0, %v609_v63  ;;  %v612_v9 = vadd.f32 %v5468_v29, %v611_v6  ;;  %4461 = vmatprep.mubr.msk.f32.mxu0 %vm357_vm0, %v1266_v7  ;;  %v1980_v6 = vpop.permute.xlu0 %1979  ;;  %v1986_v7 = vpop.permute.xlu1 %1985 }
 0x1cc   :  { %v1101_v11 = vadd.f32 %v4393_v5, %v620_v4  ;;  %3005 = vrot.lane.b32.xlu1 %v5513_v45, %s5171_s8  ;;  %v1222_v36 = vmul.f32 0.2, %v1098_v3  ;;  %vm1174_vm2 = vcmp.ge.f32.partialorder %v1098_v3, 0.0  ;;  %vm2122_vm14 = vcmp.eq.s32.totalorder %v1980_v6, 1 }
 0x1cd   :  { %vm1172_vm1 = vcmp.ge.f32.partialorder %v1090_v8, 0.0  ;;  %v1220_v12 = vmul.f32 0.2, %v1090_v8  ;;  %v1093_v13 = vadd.f32 %v1092_v10, %v612_v9 }
 0x1ce   :  { %3047 = vrot.lane.b32.xlu0 %v609_v63, %s5171_s8  ;;  %4462 = vmatmul.mubr.msk.f32.gmra.mrb[82].mxu0 %vm357_vm0, %v1267_v14  ;;  %v1223_v45 = vmul.f32 0.2, %v1101_v11  ;;  %vm1175_vm4 = vcmp.ge.f32.partialorder %v1101_v11, 0.0  ;;  %v1270_v30 = vsel %vm1174_vm2, %v1098_v3, %v1222_v36 }
 0x1cf   :  { %vm1173_vm3 = vcmp.ge.f32.partialorder %v1093_v13, 0.0  ;;  %v1221_v15 = vmul.f32 0.2, %v1093_v13  ;;  %v4344_v16 = vpop.f32.mrb[40].mxu0  ;;  %v1268_v17 = vsel %vm1172_vm1, %v1090_v8, %v1220_v12  ;;  %v4396_v19 = vpop.f32.mrb[40].mxu1  ;;  %vm2124_vm1 = vcmp.eq.s32.totalorder %v1986_v7, 1 }
 0x1d0   :  { %v633_v18 = vadd.f32 %v4344_v16, %v5468_v29  ;;  %v624_v20 = vpop.f32.mrb[41].mxu0  ;;  %3049 = vrot.lane.b32.xlu1 %v612_v9, %s5171_s8  ;;  %4464 = vmatprep.mubr.msk.f32.mxu0 %vm357_vm0, %v1268_v17  ;;  %v1105_v22 = vpop.f32.mrb[41].mxu1  ;;  %v1271_v38 = vsel %vm1175_vm4, %v1101_v11, %v1223_v45 }
 0x1d1   :  { %v625_v21 = vadd.f32 %v5468_v29, %v624_v20  ;;  %v4345_v23 = vpop.f32.mrb[42].mxu0  ;;  %v1269_v24 = vsel %vm1173_vm3, %v1093_v13, %v1221_v15  ;;  %v4397_v27 = vpop.f32.mrb[42].mxu1 }
 0x1d2   :  { %v1114_v25 = vadd.f32 %v4396_v19, %v633_v18  ;;  %v636_v26 = vadd.f32 %v4345_v23, %v5468_v29  ;;  %v627_v28 = vpop.f32.mrb[43].mxu0  ;;  %3051 = vrot.lane.b32.xlu0 %v617_v59, %s5171_s8  ;;  %4465 = vmatmul.mubr.msk.f32.gmra.mrb[84].mxu0 %vm357_vm0, %v1269_v24  ;;  %v1108_v33 = vpop.f32.mrb[43].mxu1  ;;  %v4876_v24 = vld [vmem:[#allocation10] sm:$0xff] }
 0x1d3   :  { %v1106_v31 = vadd.f32 %v1105_v22, %v625_v21  ;;  %v628_v32 = vadd.f32 %v5468_v29, %v627_v28  ;;  %4467 = vmatprep.mubr.msk.f32.mxu0 %vm357_vm0, %v1270_v30  ;;  %v1983_v8 = vpop.permute.xlu0 %1982  ;;  %v1989_v9 = vpop.permute.xlu1 %1988 }
 0x1d4   :  { %v1117_v34 = vadd.f32 %v4397_v27, %v636_v26  ;;  %3053 = vrot.lane.b32.xlu1 %v620_v4, %s5171_s8  ;;  %v1226_v39 = vmul.f32 0.2, %v1114_v25  ;;  %vm1178_vm6 = vcmp.ge.f32.partialorder %v1114_v25, 0.0  ;;  %vm2123_vm15 = vcmp.eq.s32.totalorder %v1983_v8, 1 }
 0x1d5   :  { %vm1176_vm5 = vcmp.ge.f32.partialorder %v1106_v31, 0.0  ;;  %v1224_v35 = vmul.f32 0.2, %v1106_v31  ;;  %v1109_v37 = vadd.f32 %v1108_v33, %v628_v32  ;;  %vm2125_vm2 = vcmp.eq.s32.totalorder %v1989_v9, 1  ;;  %v4886_v9 = vld [vmem:[#allocation10 + $0x50] sm:$0xff] }
 0x1d6   :  { %3055 = vrot.lane.b32.xlu0 %v625_v21, %s5171_s8  ;;  %4468 = vmatmul.mubr.msk.f32.gmra.mrb[86].mxu0 %vm357_vm0, %v1271_v38  ;;  %v1227_v47 = vmul.f32 0.2, %v1117_v34  ;;  %vm1179_vm8 = vcmp.ge.f32.partialorder %v1117_v34, 0.0  ;;  %v1274_v56 = vsel %vm1178_vm6, %v1114_v25, %v1226_v39  ;;  %v4875_v21 = vld [vmem:[#allocation10 + $0x8] sm:$0xff] }
 0x1d7   :  { %vm1177_vm7 = vcmp.ge.f32.partialorder %v1109_v37, 0.0  ;;  %v1225_v40 = vmul.f32 0.2, %v1109_v37  ;;  %v4348_v41 = vpop.f32.mrb[44].mxu0  ;;  %v1272_v42 = vsel %vm1176_vm5, %v1106_v31, %v1224_v35  ;;  %v4400_v44 = vpop.f32.mrb[44].mxu1  ;;  %v4878_v35 = vld [vmem:[#allocation10 + $0x10] sm:$0xff] }
 0x1d8   :  { %v649_v43 = vadd.f32 %v4348_v41, %v5468_v29  ;;  %v640_v46 = vpop.f32.mrb[45].mxu0  ;;  %3057 = vrot.lane.b32.xlu1 %v628_v32, %s5171_s8  ;;  %4470 = vmatprep.mubr.msk.f32.mxu0 %vm357_vm0, %v1272_v42  ;;  %v1121_v49 = vpop.f32.mrb[45].mxu1  ;;  %v1275_v63 = vsel %vm1179_vm8, %v1117_v34, %v1227_v47  ;;  %v4877_v32 = vld [vmem:[#allocation10 + $0x18] sm:$0xff]  ;;  %v4879_v41 = vld [vmem:[#allocation10 + $0x28] sm:$0xff] }
 0x1d9   :  { %v641_v48 = vadd.f32 %v5468_v29, %v640_v46  ;;  %v4349_v50 = vpop.f32.mrb[46].mxu0  ;;  %v1273_v51 = vsel %vm1177_vm7, %v1109_v37, %v1225_v40  ;;  %v4401_v54 = vpop.f32.mrb[46].mxu1  ;;  %v4880_v46 = vld [vmem:[#allocation10 + $0x20] sm:$0xff] }
 0x1da   :  { %v1130_v52 = vadd.f32 %v4400_v44, %v649_v43  ;;  %v652_v53 = vadd.f32 %v4349_v50, %v5468_v29  ;;  %v643_v55 = vpop.f32.mrb[47].mxu0  ;;  %3059 = vrot.lane.b32.xlu0 %v633_v18, %s5171_s8  ;;  %4471 = vmatmul.mubr.msk.f32.gmra.mrb[88].mxu0 %vm357_vm0, %v1273_v51  ;;  %v1124_v59 = vpop.f32.mrb[47].mxu1 }
 0x1db   :  { %v1122_v57 = vadd.f32 %v1121_v49, %v641_v48  ;;  %v644_v58 = vadd.f32 %v5468_v29, %v643_v55  ;;  %4473 = vmatprep.mubr.msk.f32.mxu0 %vm357_vm0, %v1274_v56  ;;  %v1992_v10 = vpop.permute.xlu0 %1991  ;;  %v1995_v11 = vpop.permute.xlu1 %1994  ;;  %v4882_v55 = vld [vmem:[#allocation10 + $0x30] sm:$0xff] }
 0x1dc   :  { %v1133_v60 = vadd.f32 %v4401_v54, %v652_v53  ;;  %3061 = vrot.lane.b32.xlu1 %v636_v26, %s5171_s8  ;;  %v1230_v0 = vmul.f32 0.2, %v1130_v52  ;;  %vm1182_vm10 = vcmp.ge.f32.partialorder %v1130_v52, 0.0  ;;  %vm2126_vm3 = vcmp.eq.s32.totalorder %v1992_v10, 1 }
 0x1dd   :  { %vm1180_vm9 = vcmp.ge.f32.partialorder %v1122_v57, 0.0  ;;  %v1228_v61 = vmul.f32 0.2, %v1122_v57  ;;  %v1125_v62 = vadd.f32 %v1124_v59, %v644_v58  ;;  %vm2127_vm4 = vcmp.eq.s32.totalorder %v1995_v11, 1 }
 0x1de   :  { %3063 = vrot.lane.b32.xlu0 %v641_v48, %s5171_s8  ;;  %4474 = vmatmul.mubr.msk.f32.gmra.mrb[90].mxu0 %vm357_vm0, %v1275_v63  ;;  %v1231_v2 = vmul.f32 0.2, %v1133_v60  ;;  %vm1183_vm12 = vcmp.ge.f32.partialorder %v1133_v60, 0.0  ;;  %v1278_v4 = vsel %vm1182_vm10, %v1130_v52, %v1230_v0  ;;  %v4881_v52 = vld [vmem:[#allocation10 + $0x38] sm:$0xff] }
 0x1df   :  { %vm1181_vm11 = vcmp.ge.f32.partialorder %v1125_v62, 0.0  ;;  %v1229_v1 = vmul.f32 0.2, %v1125_v62  ;;  %v1276_v29 = vsel %vm1180_vm9, %v1122_v57, %v1228_v61  ;;  %v1998_v12 = vpop.permute.xlu0 %1997  ;;  %v5644_v13 = vpop.permute.xlu1 %2000 }
 0x1e0   :  { %3065 = vrot.lane.b32.xlu1 %v644_v58, %s5171_s8  ;;  %4476 = vmatprep.mubr.msk.f32.mxu0 %vm357_vm0, %v1276_v29  ;;  %v1279_v5 = vsel %vm1183_vm12, %v1133_v60, %v1231_v2  ;;  %vm2128_vm5 = vcmp.eq.s32.totalorder %v1998_v12, 1  ;;  %vm2129_vm6 = vcmp.eq.s32.totalorder %v5644_v13, 1 }
 0x1e1   :  { %v1277_v3 = vsel %vm1181_vm11, %v1125_v62, %v1229_v1  ;;  %v4883_v62 = vld [vmem:[#allocation10 + $0x48] sm:$0xff]  ;;  %v4884_v1 = vld [vmem:[#allocation10 + $0x40] sm:$0xff] }
 0x1e2   :  { %3067 = vrot.lane.b32.xlu0 %v649_v43, %s5171_s8  ;;  %4477 = vmatmul.mubr.msk.f32.gmra.mrb[92].mxu0 %vm357_vm0, %v1277_v3 }
 0x1e3   :  { %4479 = vmatprep.mubr.msk.f32.mxu0 %vm357_vm0, %v1278_v4  ;;  %v5646_v14 = vpop.permute.xlu0 %2003  ;;  %v5648_v36 = vpop.permute.xlu1 %2006 }
 0x1e4   :  { %3069 = vrot.lane.b32.xlu1 %v652_v53, %s5171_s8  ;;  %vm2130_vm7 = vcmp.eq.s32.totalorder %v5646_v14, 1  ;;  %vm2131_vm8 = vcmp.eq.s32.totalorder %v5648_v36, 1  ;;  %v4887_v36 = vld [vmem:[#allocation10 + $0x68] sm:$0xff] }
 0x1e6   :  { %4480 = vmatmul.mubr.msk.f32.gmra.mrb[94].mxu0 %vm357_vm0, %v1279_v5  ;;  %v4885_v5 = vld [vmem:[#allocation10 + $0x58] sm:$0xff] }
 0x1e7   :  { %v5650_v15 = vpop.permute.xlu0 %2009  ;;  %v5652_v16 = vpop.permute.xlu1 %2012 }
 0x1e8   :  { %vm2132_vm9 = vcmp.eq.s32.totalorder %v5650_v15, 1  ;;  %vm2133_vm10 = vcmp.eq.s32.totalorder %v5652_v16, 1 }
 0x1eb   :  { %v5654_v17 = vpop.permute.xlu0 %2015  ;;  %v5656_v18 = vpop.permute.xlu1 %2018 }
 0x1ec   :  { %vm2134_vm11 = vcmp.eq.s32.totalorder %v5654_v17, 1  ;;  %vm2135_vm12 = vcmp.eq.s32.totalorder %v5656_v18, 1 }
 0x1ef   :  { %v5658_v19 = vpop.permute.xlu0 %2021  ;;  %v5660_v20 = vpop.permute.xlu1 %2024 }
 0x1f3   :  { %v5662_v26 = vpop.permute.xlu0 %2027  ;;  %v5664_v30 = vpop.permute.xlu1 %2030 }
 0x1f7   :  { %v5669_v44 = vpop.permute.xlu0 %2033  ;;  %v5672_v48 = vpop.permute.xlu1 %2036 }
 0x1fb   :  { %v5677_v57 = vpop.permute.xlu0 %2039  ;;  %v5679_v60 = vpop.permute.xlu1 %2042 }
 0x1ff   :  { %v5686_v8 = vpop.permute.xlu0 %2045  ;;  %v5690_v11 = vpop.permute.xlu1 %2048 }
 0x203   :  { %v5697_v15 = vpop.permute.xlu0 %2051 }
 0x25d   :  { %v4412_v45 = vpop.f32.mrb[48].mxu0 }
 0x25e   :  { %v1548_v22 = vadd.f32 %v4875_v21, %v4412_v45  ;;  %v1542_v23 = vpop.f32.mrb[49].mxu0 }
 0x25f   :  { %v1543_v25 = vadd.f32 %v4876_v24, %v1542_v23 }
 0x260   :  { %v2171_v31 = vsel %vm2123_vm15, %v1548_v22, -3e+38  ;;  %v4888_v22 = vld [vmem:[#allocation10 + $0x60] sm:$0xff]  ;;  %vm2137_vm15 = vcmp.eq.s32.totalorder %v5660_v20, 1 }
 0x261   :  { %v2170_v27 = vsel %vm2122_vm14, %v1543_v25, -3e+38  ;;  %v4415_v28 = vpop.f32.mrb[50].mxu0  ;;  %v5699_v25 = vpop.permute.xlu1 %2054  ;;  %vm2136_vm14 = vcmp.eq.s32.totalorder %v5658_v19, 1 }
 0x262   :  { %v1558_v33 = vadd.f32 %v4877_v32, %v4415_v28  ;;  %v1552_v34 = vpop.f32.mrb[51].mxu0  ;;  %4484 = vmatprep.mubr.msk.f32.mxu1 %vm2218_vm13, %v2170_v27  ;;  %v4889_v28 = vld [vmem:[#allocation10 + $0x78] sm:$0xff] }
 0x263   :  { %v1553_v37 = vadd.f32 %v4878_v35, %v1552_v34  ;;  %4485 = vmatmul.mubr.msk.f32.vlgmr.msra.gmra.mrb[48].mxu1 %vm2218_vm13, %v2171_v31 }
 0x264   :  { %v2173_v40 = vsel %vm2125_vm2, %v1558_v33, -3e+38  ;;  %v4890_v33 = vld [vmem:[#allocation10 + $0x70] sm:$0xff]  ;;  %vm2139_vm2 = vcmp.eq.s32.totalorder %v5664_v30, 1 }
 0x265   :  { %v2172_v38 = vsel %vm2124_vm1, %v1553_v37, -3e+38  ;;  %v4418_v39 = vpop.f32.mrb[52].mxu0  ;;  %v4891_v37 = vld [vmem:[#allocation10 + $0x88] sm:$0xff]  ;;  %vm2138_vm1 = vcmp.eq.s32.totalorder %v5662_v26, 1 }
 0x266   :  { %v1568_v42 = vadd.f32 %v4879_v41, %v4418_v39  ;;  %v1562_v43 = vpop.f32.mrb[53].mxu0  ;;  %4487 = vmatprep.mubr.msk.f32.mxu1 %vm2218_vm13, %v2172_v38  ;;  %v4892_v41 = vld [vmem:[#allocation10 + $0x80] sm:$0xff] }
 0x267   :  { %v1563_v47 = vadd.f32 %v4880_v46, %v1562_v43  ;;  %4488 = vmatmul.mubr.msk.f32.gmra.mrb[50].mxu1 %vm2218_vm13, %v2173_v40  ;;  %v5706_v40 = vpop.permute.xlu0 %2057  ;;  %v5710_v43 = vpop.permute.xlu1 %2060 }
 0x268   :  { %v2175_v51 = vsel %vm2127_vm4, %v1568_v42, -3e+38  ;;  %vm2141_vm4 = vcmp.eq.s32.totalorder %v5672_v48, 1 }
 0x269   :  { %v2174_v49 = vsel %vm2126_vm3, %v1563_v47, -3e+38  ;;  %v4421_v50 = vpop.f32.mrb[54].mxu0  ;;  %v4893_v47 = vld [vmem:[#allocation10 + $0x98] sm:$0xff]  ;;  %vm2140_vm3 = vcmp.eq.s32.totalorder %v5669_v44, 1 }
 0x26a   :  { %v1578_v53 = vadd.f32 %v4881_v52, %v4421_v50  ;;  %v1572_v54 = vpop.f32.mrb[55].mxu0  ;;  %4490 = vmatprep.mubr.msk.f32.mxu1 %vm2218_vm13, %v2174_v49 }
 0x26b   :  { %v1573_v56 = vadd.f32 %v4882_v55, %v1572_v54  ;;  %4491 = vmatmul.mubr.msk.f32.gmra.mrb[52].mxu1 %vm2218_vm13, %v2175_v51  ;;  %v4894_v51 = vld [vmem:[#allocation10 + $0x90] sm:$0xff]  ;;  %v5717_v26 = vpop.permute.xlu0 %2063  ;;  %v5719_v54 = vpop.permute.xlu1 %2066 }
 0x26c   :  { %v2177_v61 = vsel %vm2129_vm6, %v1578_v53, -3e+38  ;;  %vm2143_vm6 = vcmp.eq.s32.totalorder %v5679_v60, 1 }
 0x26d   :  { %v2176_v58 = vsel %vm2128_vm5, %v1573_v56, -3e+38  ;;  %v4424_v59 = vpop.f32.mrb[56].mxu0  ;;  %v4895_v56 = vld [vmem:[#allocation10 + $0xa8] sm:$0xff]  ;;  %vm2142_vm5 = vcmp.eq.s32.totalorder %v5677_v57, 1 }
 0x26e   :  { %v1588_v63 = vadd.f32 %v4883_v62, %v4424_v59  ;;  %v1582_v0 = vpop.f32.mrb[57].mxu0  ;;  %4493 = vmatprep.mubr.msk.f32.mxu1 %vm2218_vm13, %v2176_v58 }
 0x26f   :  { %v1583_v29 = vadd.f32 %v4884_v1, %v1582_v0  ;;  %4494 = vmatmul.mubr.msk.f32.gmra.mrb[54].mxu1 %vm2218_vm13, %v2177_v61  ;;  %v4896_v61 = vld [vmem:[#allocation10 + $0xa0] sm:$0xff]  ;;  %v4897_v0 = vld [vmem:[#allocation10 + $0xb8] sm:$0xff] }
 0x270   :  { %v2179_v4 = vsel %vm2131_vm8, %v1588_v63, -3e+38  ;;  %vm2145_vm8 = vcmp.eq.s32.totalorder %v5690_v11, 1 }
 0x271   :  { %v2178_v2 = vsel %vm2130_vm7, %v1583_v29, -3e+38  ;;  %v4427_v3 = vpop.f32.mrb[58].mxu0  ;;  %vm2144_vm7 = vcmp.eq.s32.totalorder %v5686_v8, 1 }
 0x272   :  { %v1598_v6 = vadd.f32 %v4885_v5, %v4427_v3  ;;  %v1592_v7 = vpop.f32.mrb[59].mxu0  ;;  %4496 = vmatprep.mubr.msk.f32.mxu1 %vm2218_vm13, %v2178_v2  ;;  %v2070_v2 = vpop.permute.xlu0 %2069  ;;  %v4898_v3 = vld [vmem:[#allocation10 + $0xb0] sm:$0xff] }
 0x273   :  { %v1593_v10 = vadd.f32 %v4886_v9, %v1592_v7  ;;  %4497 = vmatmul.mubr.msk.f32.gmra.mrb[56].mxu1 %vm2218_vm13, %v2179_v4  ;;  %v2073_v5 = vpop.permute.xlu1 %2072  ;;  %v4899_v7 = vld [vmem:[#allocation10 + $0xc8] sm:$0xff] }
 0x274   :  { %v2181_v14 = vsel %vm2133_vm10, %v1598_v6, -3e+38  ;;  %vm2147_vm10 = vcmp.eq.s32.totalorder %v5699_v25, 1 }
 0x275   :  { %v2180_v12 = vsel %vm2132_vm9, %v1593_v10, -3e+38  ;;  %v4430_v13 = vpop.f32.mrb[60].mxu0  ;;  %vm2146_vm9 = vcmp.eq.s32.totalorder %v5697_v15, 1 }
 0x276   :  { %v1608_v45 = vadd.f32 %v4887_v36, %v4430_v13  ;;  %v1602_v21 = vpop.f32.mrb[61].mxu0  ;;  %4499 = vmatprep.mubr.msk.f32.mxu1 %vm2218_vm13, %v2180_v12  ;;  %v4900_v12 = vld [vmem:[#allocation10 + $0xc0] sm:$0xff]  ;;  %v2076_v8 = vpop.permute.xlu0 %2075 }
 0x277   :  { %v1603_v23 = vadd.f32 %v4888_v22, %v1602_v21  ;;  %4500 = vmatmul.mubr.msk.f32.gmra.mrb[58].mxu1 %vm2218_vm13, %v2181_v14  ;;  %v2079_v11 = vpop.permute.xlu1 %2078  ;;  %v4901_v21 = vld [vmem:[#allocation10 + $0xd8] sm:$0xff] }
 0x278   :  { %v2183_v27 = vsel %vm2135_vm12, %v1608_v45, -3e+38  ;;  %vm2149_vm12 = vcmp.eq.s32.totalorder %v5710_v43, 1 }
 0x279   :  { %v2182_v24 = vsel %vm2134_vm11, %v1603_v23, -3e+38  ;;  %v4433_v16 = vpop.f32.mrb[62].mxu0  ;;  %vm2148_vm11 = vcmp.eq.s32.totalorder %v5706_v40, 1 }
 0x27a   :  { %v1618_v31 = vadd.f32 %v4889_v28, %v4433_v16  ;;  %v1612_v32 = vpop.f32.mrb[63].mxu0  ;;  %4502 = vmatprep.mubr.msk.f32.mxu1 %vm2218_vm13, %v2182_v24  ;;  %v4902_v24 = vld [vmem:[#allocation10 + $0xd0] sm:$0xff]  ;;  %v4903_v28 = vld [vmem:[#allocation10 + $0xe8] sm:$0xff] }
 0x27b   :  { %v1613_v34 = vadd.f32 %v4890_v33, %v1612_v32  ;;  %4503 = vmatmul.mubr.msk.f32.gmra.mrb[60].mxu1 %vm2218_vm13, %v2183_v27  ;;  %v2082_v33 = vpop.permute.xlu0 %2081 }
 0x27c   :  { %v2185_v35 = vsel %vm2137_vm15, %v1618_v31, -3e+38  ;;  %vm2151_vm15 = vcmp.eq.s32.totalorder %v5719_v54, 1 }
 0x27d   :  { %v2184_v17 = vsel %vm2136_vm14, %v1613_v34, -3e+38  ;;  %v4436_v18 = vpop.f32.mrb[64].mxu0  ;;  %v4904_v34 = vld [vmem:[#allocation10 + $0xe0] sm:$0xff]  ;;  %vm2150_vm14 = vcmp.eq.s32.totalorder %v5717_v26, 1 }
 0x27e   :  { %v1628_v38 = vadd.f32 %v4891_v37, %v4436_v18  ;;  %v1622_v39 = vpop.f32.mrb[65].mxu0  ;;  %4505 = vmatprep.mubr.msk.f32.mxu1 %vm2218_vm13, %v2184_v17  ;;  %v2085_v18 = vpop.permute.xlu1 %2084  ;;  %v4908_v26 = vld [vmem:[#allocation10 + $0x100] sm:$0xff] }
 0x27f   :  { %v1623_v42 = vadd.f32 %v4892_v41, %v1622_v39  ;;  %4506 = vmatmul.mubr.msk.f32.gmra.mrb[62].mxu1 %vm2218_vm13, %v2185_v35  ;;  %v4905_v39 = vld [vmem:[#allocation10 + $0xf8] sm:$0xff] }
 0x280   :  { %v2187_v46 = vsel %vm2139_vm2, %v1628_v38, -3e+38  ;;  %vm2153_vm2 = vcmp.eq.s32.totalorder %v2073_v5, 1 }
 0x281   :  { %v2186_v19 = vsel %vm2138_vm1, %v1623_v42, -3e+38  ;;  %v4439_v20 = vpop.f32.mrb[66].mxu0  ;;  %v4906_v42 = vld [vmem:[#allocation10 + $0xf0] sm:$0xff]  ;;  %vm2152_vm1 = vcmp.eq.s32.totalorder %v2070_v2, 1 }
 0x282   :  { %v1638_v49 = vadd.f32 %v4893_v47, %v4439_v20  ;;  %v1632_v50 = vpop.f32.mrb[67].mxu0  ;;  %4508 = vmatprep.mubr.msk.f32.mxu1 %vm2218_vm13, %v2186_v19  ;;  %v2088_v19 = vpop.permute.xlu0 %2087 }
 0x283   :  { %v1633_v52 = vadd.f32 %v4894_v51, %v1632_v50  ;;  %4509 = vmatmul.mubr.msk.f32.gmra.mrb[64].mxu1 %vm2218_vm13, %v2187_v46  ;;  %v2091_v47 = vpop.permute.xlu1 %2090  ;;  %v4907_v50 = vld [vmem:[#allocation10 + $0x108] sm:$0xff] }
 0x284   :  { %v2189_v55 = vsel %vm2141_vm4, %v1638_v49, -3e+38  ;;  %vm2155_vm4 = vcmp.eq.s32.totalorder %v2079_v11, 1 }
 0x285   :  { %v2188_v53 = vsel %vm2140_vm3, %v1633_v52, -3e+38  ;;  %v4442_v30 = vpop.f32.mrb[68].mxu0  ;;  %vm2154_vm3 = vcmp.eq.s32.totalorder %v2076_v8, 1  ;;  %v4914_v8 = vld [vmem:[#allocation10 + $0x130] sm:$0xff] }
 0x286   :  { %v1648_v58 = vadd.f32 %v4895_v56, %v4442_v30  ;;  %v1642_v59 = vpop.f32.mrb[69].mxu0  ;;  %4511 = vmatprep.mubr.msk.f32.mxu1 %vm2218_vm13, %v2188_v53  ;;  %v4909_v56 = vld [vmem:[#allocation10 + $0x118] sm:$0xff] }
 0x287   :  { %v1643_v62 = vadd.f32 %v4896_v61, %v1642_v59  ;;  %4512 = vmatmul.mubr.msk.f32.gmra.mrb[66].mxu1 %vm2218_vm13, %v2189_v55  ;;  %v2094_v61 = vpop.permute.xlu0 %2093 }
 0x288   :  { %v2191_v63 = vsel %vm2143_vm6, %v1648_v58, -3e+38  ;;  %vm2157_vm6 = vcmp.eq.s32.totalorder %v2085_v18, 1 }
 0x289   :  { %v2190_v44 = vsel %vm2142_vm5, %v1643_v62, -3e+38  ;;  %v4445_v48 = vpop.f32.mrb[70].mxu0  ;;  %v4910_v62 = vld [vmem:[#allocation10 + $0x110] sm:$0xff]  ;;  %vm2156_vm5 = vcmp.eq.s32.totalorder %v2082_v33, 1 }
 0x28a   :  { %v1658_v1 = vadd.f32 %v4897_v0, %v4445_v48  ;;  %v1652_v29 = vpop.f32.mrb[71].mxu0  ;;  %4514 = vmatprep.mubr.msk.f32.mxu1 %vm2218_vm13, %v2190_v44  ;;  %v2097_v48 = vpop.permute.xlu1 %2096 }
 0x28b   :  { %v1653_v4 = vadd.f32 %v4898_v3, %v1652_v29  ;;  %4515 = vmatmul.mubr.msk.f32.gmra.mrb[68].mxu1 %vm2218_vm13, %v2191_v63  ;;  %v4911_v29 = vld [vmem:[#allocation10 + $0x128] sm:$0xff] }
 0x28c   :  { %v2193_v6 = vsel %vm2145_vm8, %v1658_v1, -3e+38  ;;  %vm2159_vm8 = vcmp.eq.s32.totalorder %v2091_v47, 1 }
 0x28d   :  { %v2192_v57 = vsel %vm2144_vm7, %v1653_v4, -3e+38  ;;  %v4448_v60 = vpop.f32.mrb[72].mxu0  ;;  %v4912_v4 = vld [vmem:[#allocation10 + $0x120] sm:$0xff]  ;;  %vm2158_vm7 = vcmp.eq.s32.totalorder %v2088_v19, 1 }
 0x28e   :  { %v1668_v9 = vadd.f32 %v4899_v7, %v4448_v60  ;;  %v1662_v10 = vpop.f32.mrb[73].mxu0  ;;  %4517 = vmatprep.mubr.msk.f32.mxu1 %vm2218_vm13, %v2192_v57  ;;  %v2100_v57 = vpop.permute.xlu0 %2099  ;;  %v4920_v19 = vld [vmem:[#allocation10 + $0x160] sm:$0xff] }
 0x28f   :  { %v1663_v13 = vadd.f32 %v4900_v12, %v1662_v10  ;;  %4518 = vmatmul.mubr.msk.f32.gmra.mrb[70].mxu1 %vm2218_vm13, %v2193_v6  ;;  %v2103_v7 = vpop.permute.xlu1 %2102  ;;  %v4913_v10 = vld [vmem:[#allocation10 + $0x138] sm:$0xff] }
 0x290   :  { %v2195_v45 = vsel %vm2147_vm10, %v1668_v9, -3e+38  ;;  %vm2161_vm10 = vcmp.eq.s32.totalorder %v2097_v48, 1 }
 0x291   :  { %v2194_v14 = vsel %vm2146_vm9, %v1663_v13, -3e+38  ;;  %v4451_v36 = vpop.f32.mrb[74].mxu0  ;;  %vm2160_vm9 = vcmp.eq.s32.totalorder %v2094_v61, 1 }
 0x292   :  { %v1678_v22 = vadd.f32 %v4901_v21, %v4451_v36  ;;  %v1672_v23 = vpop.f32.mrb[75].mxu0  ;;  %4520 = vmatprep.mubr.msk.f32.mxu1 %vm2218_vm13, %v2194_v14  ;;  %v4915_v21 = vld [vmem:[#allocation10 + $0x148] sm:$0xff] }
 0x293   :  { %v1673_v16 = vadd.f32 %v4902_v24, %v1672_v23  ;;  %4521 = vmatmul.mubr.msk.f32.gmra.mrb[72].mxu1 %vm2218_vm13, %v2195_v45  ;;  %v2106_v24 = vpop.permute.xlu0 %2105 }
 0x294   :  { %v2197_v27 = vsel %vm2149_vm12, %v1678_v22, -3e+38  ;;  %vm2163_vm12 = vcmp.eq.s32.totalorder %v2103_v7, 1 }
 0x295   :  { %v2196_v15 = vsel %vm2148_vm11, %v1673_v16, -3e+38  ;;  %v4454_v25 = vpop.f32.mrb[76].mxu0  ;;  %v4916_v16 = vld [vmem:[#allocation10 + $0x140] sm:$0xff]  ;;  %vm2162_vm11 = vcmp.eq.s32.totalorder %v2100_v57, 1 }
 0x296   :  { %v1688_v31 = vadd.f32 %v4903_v28, %v4454_v25  ;;  %v1682_v32 = vpop.f32.mrb[77].mxu0  ;;  %4523 = vmatprep.mubr.msk.f32.mxu1 %vm2218_vm13, %v2196_v15  ;;  %v2109_v25 = vpop.permute.xlu1 %2108 }
 0x297   :  { %v1683_v17 = vadd.f32 %v4904_v34, %v1682_v32  ;;  %4524 = vmatmul.mubr.msk.f32.gmra.mrb[74].mxu1 %vm2218_vm13, %v2197_v27  ;;  %v4917_v32 = vld [vmem:[#allocation10 + $0x158] sm:$0xff] }
 0x298   :  { %v2199_v38 = vsel %vm2151_vm15, %v1688_v31, -3e+38  ;;  %vm2165_vm15 = vcmp.eq.s32.totalorder %v2109_v25, 1 }
 0x299   :  { %v2198_v35 = vsel %vm2150_vm14, %v1683_v17, -3e+38  ;;  %v4457_v37 = vpop.f32.mrb[78].mxu0  ;;  %v4918_v17 = vld [vmem:[#allocation10 + $0x150] sm:$0xff]  ;;  %vm2164_vm14 = vcmp.eq.s32.totalorder %v2106_v24, 1 }
 0x29a   :  { %v1698_v40 = vadd.f32 %v4905_v39, %v4457_v37  ;;  %v1692_v41 = vpop.f32.mrb[79].mxu0  ;;  %4526 = vmatprep.mubr.msk.f32.mxu1 %vm2218_vm13, %v2198_v35  ;;  %v2112_v35 = vpop.permute.xlu0 %2111 }
 0x29b   :  { %v1693_v43 = vadd.f32 %v4906_v42, %v1692_v41  ;;  %4527 = vmatmul.mubr.msk.f32.gmra.mrb[76].mxu1 %vm2218_vm13, %v2199_v38  ;;  %v2115_v39 = vpop.permute.xlu1 %2114  ;;  %v4919_v41 = vld [vmem:[#allocation10 + $0x168] sm:$0xff] }
 0x29c   :  { %v2201_v49 = vsel %vm2153_vm2, %v1698_v40, -3e+38  ;;  %vm2167_vm2 = vcmp.eq.s32.totalorder %v2115_v39, 1 }
 0x29d   :  { %v2200_v20 = vsel %vm2152_vm1, %v1693_v43, -3e+38  ;;  %v4460_v46 = vpop.f32.mrb[80].mxu0  ;;  %vm2166_vm1 = vcmp.eq.s32.totalorder %v2112_v35, 1 }
 0x29e   :  { %v1708_v51 = vadd.f32 %v4907_v50, %v4460_v46  ;;  %v1702_v52 = vpop.f32.mrb[81].mxu0  ;;  %4529 = vmatprep.mubr.msk.f32.mxu1 %vm2218_vm13, %v2200_v20  ;;  %v4921_v50 = vld [vmem:[#allocation10 + $0x178] sm:$0xff] }
 0x29f   :  { %v1703_v53 = vadd.f32 %v4908_v26, %v1702_v52  ;;  %4530 = vmatmul.mubr.msk.f32.gmra.mrb[78].mxu1 %vm2218_vm13, %v2201_v49  ;;  %v2118_v26 = vpop.permute.xlu0 %2117 }
 0x2a0   :  { %v2203_v55 = vsel %vm2155_vm4, %v1708_v51, -3e+38 }
 0x2a1   :  { %v2202_v30 = vsel %vm2154_vm3, %v1703_v53, -3e+38  ;;  %v4463_v54 = vpop.f32.mrb[82].mxu0  ;;  %v4922_v53 = vld [vmem:[#allocation10 + $0x170] sm:$0xff]  ;;  %vm2168_vm3 = vcmp.eq.s32.totalorder %v2118_v26, 1 }
 0x2a2   :  { %v1718_v58 = vadd.f32 %v4909_v56, %v4463_v54  ;;  %v1712_v59 = vpop.f32.mrb[83].mxu0  ;;  %4532 = vmatprep.mubr.msk.f32.mxu1 %vm2218_vm13, %v2202_v30  ;;  %v2121_v54 = vpop.permute.xlu1 %2120 }
 0x2a3   :  { %v1713_v44 = vadd.f32 %v4910_v62, %v1712_v59  ;;  %4533 = vmatmul.mubr.msk.f32.gmra.mrb[80].mxu1 %vm2218_vm13, %v2203_v55  ;;  %vm2169_vm4 = vcmp.eq.s32.totalorder %v2121_v54, 1 }
 0x2a4   :  { %v2205_v1 = vsel %vm2157_vm6, %v1718_v58, -3e+38  ;;  %v5172_v58 = vmov -3e+38   ;;  %vm154_vm6 = vcmask 326656  }
 0x2a5   :  { %v2204_v63 = vsel %vm2156_vm5, %v1713_v44, -3e+38  ;;  %v4466_v0 = vpop.f32.mrb[84].mxu0  ;;  %vm163_vm5 = vcmask 319488  }
 0x2a6   :  { %v1728_v2 = vadd.f32 %v4911_v29, %v4466_v0  ;;  %v1722_v3 = vpop.f32.mrb[85].mxu0  ;;  %4535 = vmatprep.mubr.msk.f32.mxu1 %vm2218_vm13, %v2204_v63  ;;  %164 = vst.msk [vmem:[#allocation3] sm:$0x1] %vm163_vm5, %v5172_v58 }
 0x2a7   :  { %v1723_v5 = vadd.f32 %v4912_v4, %v1722_v3  ;;  %4536 = vmatmul.mubr.msk.f32.gmra.mrb[82].mxu1 %vm2218_vm13, %v2205_v1 }
 0x2a8   :  { %v2207_v9 = vsel %vm2159_vm8, %v1728_v2, -3e+38 }
 0x2a9   :  { %v2206_v60 = vsel %vm2158_vm7, %v1723_v5, -3e+38  ;;  %v4469_v6 = vpop.f32.mrb[86].mxu0 }
 0x2aa   :  { %v1738_v12 = vadd.f32 %v4913_v10, %v4469_v6  ;;  %v1732_v13 = vpop.f32.mrb[87].mxu0  ;;  %4538 = vmatprep.mubr.msk.f32.mxu1 %vm2218_vm13, %v2206_v60 }
 0x2ab   :  { %v1733_v14 = vadd.f32 %v4914_v8, %v1732_v13  ;;  %4539 = vmatmul.mubr.msk.f32.gmra.mrb[84].mxu1 %vm2218_vm13, %v2207_v9 }
 0x2ac   :  { %v2209_v45 = vsel %vm2161_vm10, %v1738_v12, -3e+38 }
 0x2ad   :  { %v2208_v36 = vsel %vm2160_vm9, %v1733_v14, -3e+38  ;;  %v4472_v11 = vpop.f32.mrb[88].mxu0 }
 0x2ae   :  { %v1748_v22 = vadd.f32 %v4915_v21, %v4472_v11  ;;  %v1742_v23 = vpop.f32.mrb[89].mxu0  ;;  %4541 = vmatprep.mubr.msk.f32.mxu1 %vm2218_vm13, %v2208_v36 }
 0x2af   :  { %v1743_v15 = vadd.f32 %v4916_v16, %v1742_v23  ;;  %4542 = vmatmul.mubr.msk.f32.gmra.mrb[86].mxu1 %vm2218_vm13, %v2209_v45 }
 0x2b0   :  { %v2211_v31 = vsel %vm2163_vm12, %v1748_v22, -3e+38 }
 0x2b1   :  { %v2210_v27 = vsel %vm2162_vm11, %v1743_v15, -3e+38  ;;  %v4475_v28 = vpop.f32.mrb[90].mxu0 }
 0x2b2   :  { %v1758_v33 = vadd.f32 %v4917_v32, %v4475_v28  ;;  %v1752_v34 = vpop.f32.mrb[91].mxu0  ;;  %4544 = vmatprep.mubr.msk.f32.mxu1 %vm2218_vm13, %v2210_v27 }
 0x2b3   :  { %v1753_v18 = vadd.f32 %v4918_v17, %v1752_v34  ;;  %4545 = vmatmul.mubr.msk.f32.gmra.mrb[88].mxu1 %vm2218_vm13, %v2211_v31 }
 0x2b4   :  { %v2213_v40 = vsel %vm2165_vm15, %v1758_v33, -3e+38 }
 0x2b5   :  { %v2212_v37 = vsel %vm2164_vm14, %v1753_v18, -3e+38  ;;  %v4478_v38 = vpop.f32.mrb[92].mxu0 }
 0x2b6   :  { %v1768_v42 = vadd.f32 %v4919_v41, %v4478_v38  ;;  %v1762_v43 = vpop.f32.mrb[93].mxu0  ;;  %4547 = vmatprep.mubr.msk.f32.mxu1 %vm2218_vm13, %v2212_v37 }
 0x2b7   :  { %v1763_v20 = vadd.f32 %v4920_v19, %v1762_v43  ;;  %4548 = vmatmul.mubr.msk.f32.gmra.mrb[90].mxu1 %vm2218_vm13, %v2213_v40 }
 0x2b8   :  { %v2215_v49 = vsel %vm2167_vm2, %v1768_v42, -3e+38 }
 0x2b9   :  { %v2214_v46 = vsel %vm2166_vm1, %v1763_v20, -3e+38  ;;  %v4481_v47 = vpop.f32.mrb[94].mxu0 }
 0x2ba   :  { %v1778_v51 = vadd.f32 %v4921_v50, %v4481_v47  ;;  %v1772_v52 = vpop.f32.mrb[95].mxu0  ;;  %4550 = vmatprep.mubr.msk.f32.mxu1 %vm2218_vm13, %v2214_v46 }
 0x2bb   :  { %v1773_v30 = vadd.f32 %v4922_v53, %v1772_v52  ;;  %4551 = vmatmul.mubr.msk.f32.gmra.mrb[92].mxu1 %vm2218_vm13, %v2215_v49 }
 0x2bc   :  { %v2217_v56 = vsel %vm2169_vm4, %v1778_v51, -3e+38 }
 0x2bd   :  { %v2216_v55 = vsel %vm2168_vm3, %v1773_v30, -3e+38 }
 0x2be   :  { %4553 = vmatprep.mubr.msk.f32.mxu1 %vm2218_vm13, %v2216_v55 }
 0x2bf   :  { %4554 = vmatmul.mubr.msk.f32.gmra.mrb[94].mxu1 %vm2218_vm13, %v2217_v56 }
 0x336   :  { %v5762_v59 = vpop.f32.mrb[48].mxu1 }
 0x337   :  { %v5764_v61 = vpop.f32.mrb[49].mxu1  ;;  %v2671_v63 = vsel %vm154_vm6, %v5762_v59, -inf }
 0x338   :  { %v2670_v29 = vsel %vm154_vm6, %v5764_v61, -inf }
 0x33a   :  { %v5766_v62 = vpop.f32.mrb[50].mxu1 }
 0x33b   :  { %v5768_v44 = vpop.f32.mrb[51].mxu1  ;;  %v2673_v57 = vsel %vm154_vm6, %v5766_v62, -inf }
 0x33c   :  { %v2672_v7 = vsel %vm154_vm6, %v5768_v44, -inf }
 0x33e   :  { %v5770_v48 = vpop.f32.mrb[52].mxu1 }
 0x33f   :  { %v2676_v0 = vsel %vm154_vm6, %v5770_v48, -inf  ;;  %v5776_v1 = vpop.f32.mrb[53].mxu1 }
 0x340   :  { %v2677_v2 = vmax.f32 %v2671_v63, %v2676_v0  ;;  %v2674_v3 = vsel %vm154_vm6, %v5776_v1, -inf }
 0x341   :  { %v2675_v4 = vmax.f32 %v2670_v29, %v2674_v3 }
 0x342   :  { %v5782_v5 = vpop.f32.mrb[54].mxu1 }
 0x343   :  { %v2680_v60 = vsel %vm154_vm6, %v5782_v5, -inf  ;;  %v5788_v6 = vpop.f32.mrb[55].mxu1 }
 0x344   :  { %v2681_v9 = vmax.f32 %v2673_v57, %v2680_v60  ;;  %v2678_v10 = vsel %vm154_vm6, %v5788_v6, -inf  ;;  %v5864_v60 = vpop.permute.xlu0 %2979 }
 0x345   :  { %v2679_v12 = vmax.f32 %v2672_v7, %v2678_v10  ;;  %6576 = vst [vmem:[#allocation26_spill] sm:$0xff] %v5864_v60 }
 0x346   :  { %v5794_v13 = vpop.f32.mrb[56].mxu1 }
 0x347   :  { %v2684_v8 = vsel %vm154_vm6, %v5794_v13, -inf  ;;  %v5798_v14 = vpop.f32.mrb[57].mxu1 }
 0x348   :  { %v2685_v36 = vmax.f32 %v2677_v2, %v2684_v8  ;;  %v2682_v11 = vsel %vm154_vm6, %v5798_v14, -inf }
 0x349   :  { %v2683_v45 = vmax.f32 %v2675_v4, %v2682_v11 }
 0x34a   :  { %v5802_v21 = vpop.f32.mrb[58].mxu1 }
 0x34b   :  { %v2688_v22 = vsel %vm154_vm6, %v5802_v21, -inf  ;;  %v5806_v23 = vpop.f32.mrb[59].mxu1 }
 0x34c   :  { %v2689_v24 = vmax.f32 %v2681_v9, %v2688_v22  ;;  %v2686_v16 = vsel %vm154_vm6, %v5806_v23, -inf }
 0x34d   :  { %v2687_v15 = vmax.f32 %v2679_v12, %v2686_v16  ;;  %v5868_v12 = vpop.permute.xlu1 %2981 }
 0x34e   :  { %v5810_v25 = vpop.f32.mrb[60].mxu1  ;;  %6577 = vst [vmem:[#allocation27_spill] sm:$0xff] %v5868_v12 }
 0x34f   :  { %v2692_v27 = vsel %vm154_vm6, %v5810_v25, -inf  ;;  %v5814_v28 = vpop.f32.mrb[61].mxu1 }
 0x350   :  { %v2693_v31 = vmax.f32 %v2685_v36, %v2692_v27  ;;  %v2690_v32 = vsel %vm154_vm6, %v5814_v28, -inf }
 0x351   :  { %v2691_v33 = vmax.f32 %v2683_v45, %v2690_v32  ;;  %v5173_v45 = vmov 0.0  }
 0x352   :  { %v5818_v34 = vpop.f32.mrb[62].mxu1  ;;  %155 = vst.msk [vmem:[#allocation2] sm:$0xff] %vm154_vm6, %v5173_v45  ;;  %156 = vst.msk [vmem:[#allocation2 + $0x8] sm:$0xff] %vm154_vm6, %v5173_v45 }
 0x353   :  { %v2696_v17 = vsel %vm154_vm6, %v5818_v34, -inf  ;;  %v5822_v18 = vpop.f32.mrb[63].mxu1  ;;  %157 = vst.msk [vmem:[#allocation2 + $0x10] sm:$0xff] %vm154_vm6, %v5173_v45  ;;  %158 = vst.msk [vmem:[#allocation2 + $0x18] sm:$0xff] %vm154_vm6, %v5173_v45 }
 0x354   :  { %v2697_v35 = vmax.f32 %v2689_v24, %v2696_v17  ;;  %v2694_v37 = vsel %vm154_vm6, %v5822_v18, -inf  ;;  %159 = vst.msk [vmem:[#allocation2 + $0x20] sm:$0xff] %vm154_vm6, %v5173_v45  ;;  %160 = vst.msk [vmem:[#allocation2 + $0x28] sm:$0xff] %vm154_vm6, %v5173_v45 }
 0x355   :  { %v2695_v38 = vmax.f32 %v2687_v15, %v2694_v37  ;;  %161 = vst.msk [vmem:[#allocation2 + $0x30] sm:$0xff] %vm154_vm6, %v5173_v45  ;;  %162 = vst.msk [vmem:[#allocation2 + $0x38] sm:$0xff] %vm154_vm6, %v5173_v45  ;;  %v5886_v15 = vpop.permute.xlu0 %2975 }
 0x356   :  { %v5826_v39 = vpop.f32.mrb[64].mxu1  ;;  %6578 = vst [vmem:[#allocation28_spill] sm:$0xff] %v5886_v15 }
 0x357   :  { %v2700_v40 = vsel %vm154_vm6, %v5826_v39, -inf  ;;  %v5830_v41 = vpop.f32.mrb[65].mxu1 }
 0x358   :  { %v2701_v42 = vmax.f32 %v2693_v31, %v2700_v40  ;;  %v2698_v43 = vsel %vm154_vm6, %v5830_v41, -inf }
 0x359   :  { %v2699_v19 = vmax.f32 %v2691_v33, %v2698_v43  ;;  %v5894_v33 = vpop.permute.xlu1 %2977  ;;  %v5904_v43 = vpop.permute.xlu0 %2987 }
 0x35a   :  { %v5834_v20 = vpop.f32.mrb[66].mxu1  ;;  %6579 = vst [vmem:[#allocation29_spill] sm:$0xff] %v5894_v33  ;;  %6580 = vst [vmem:[#allocation30_spill] sm:$0xff] %v5904_v43 }
 0x35b   :  { %v2704_v46 = vsel %vm154_vm6, %v5834_v20, -inf  ;;  %v5838_v47 = vpop.f32.mrb[67].mxu1 }
 0x35c   :  { %v2705_v49 = vmax.f32 %v2697_v35, %v2704_v46  ;;  %v2702_v50 = vsel %vm154_vm6, %v5838_v47, -inf }
 0x35d   :  { %v2703_v51 = vmax.f32 %v2695_v38, %v2702_v50  ;;  %v5908_v50 = vpop.permute.xlu1 %2989 }
 0x35e   :  { %v5842_v52 = vpop.f32.mrb[68].mxu1  ;;  %6581 = vst [vmem:[#allocation31_spill] sm:$0xff] %v5908_v50 }
 0x35f   :  { %v2708_v26 = vsel %vm154_vm6, %v5842_v52, -inf  ;;  %v5846_v53 = vpop.f32.mrb[69].mxu1 }
 0x360   :  { %v2709_v30 = vmax.f32 %v2701_v42, %v2708_v26  ;;  %v2706_v54 = vsel %vm154_vm6, %v5846_v53, -inf }
 0x361   :  { %v2707_v55 = vmax.f32 %v2699_v19, %v2706_v54 }
 0x362   :  { %v5850_v56 = vpop.f32.mrb[70].mxu1 }
 0x363   :  { %v2712_v58 = vsel %vm154_vm6, %v5850_v56, -inf  ;;  %v5854_v63 = vpop.f32.mrb[71].mxu1 }
 0x364   :  { %v2713_v0 = vmax.f32 %v2705_v49, %v2712_v58  ;;  %v2710_v29 = vsel %vm154_vm6, %v5854_v63, -inf }
 0x365   :  { %v2711_v2 = vmax.f32 %v2703_v51, %v2710_v29 }
 0x366   :  { %v5858_v3 = vpop.f32.mrb[72].mxu1 }
 0x367   :  { %v2716_v4 = vsel %vm154_vm6, %v5858_v3, -inf  ;;  %v5862_v57 = vpop.f32.mrb[73].mxu1 }
 0x368   :  { %v2717_v7 = vmax.f32 %v2709_v30, %v2716_v4  ;;  %v2714_v9 = vsel %vm154_vm6, %v5862_v57, -inf }
 0x369   :  { %v2715_v10 = vmax.f32 %v2707_v55, %v2714_v9 }
 0x36a   :  { %v5870_v8 = vpop.f32.mrb[74].mxu1 }
 0x36b   :  { %v2720_v36 = vsel %vm154_vm6, %v5870_v8, -inf  ;;  %v5874_v11 = vpop.f32.mrb[75].mxu1 }
 0x36c   :  { %v2721_v22 = vmax.f32 %v2713_v0, %v2720_v36  ;;  %v2718_v24 = vsel %vm154_vm6, %v5874_v11, -inf  ;;  %v5918_v0 = vpop.permute.xlu0 %2983 }
 0x36d   :  { %v2719_v16 = vmax.f32 %v2711_v2, %v2718_v24  ;;  %6582 = vst [vmem:[#allocation32_spill] sm:$0xff] %v5918_v0 }
 0x36e   :  { %v5888_v27 = vpop.f32.mrb[76].mxu1 }
 0x36f   :  { %v2724_v31 = vsel %vm154_vm6, %v5888_v27, -inf  ;;  %v5892_v32 = vpop.f32.mrb[77].mxu1 }
 0x370   :  { %v2725_v17 = vmax.f32 %v2717_v7, %v2724_v31  ;;  %v2722_v35 = vsel %vm154_vm6, %v5892_v32, -inf  ;;  %v5926_v7 = vpop.permute.xlu1 %2985 }
 0x371   :  { %v2723_v37 = vmax.f32 %v2715_v10, %v2722_v35  ;;  %6583 = vst [vmem:[#allocation33_spill] sm:$0xff] %v5926_v7 }
 0x372   :  { %v5898_v38 = vpop.f32.mrb[78].mxu1 }
 0x373   :  { %v2728_v40 = vsel %vm154_vm6, %v5898_v38, -inf  ;;  %v5902_v42 = vpop.f32.mrb[79].mxu1 }
 0x374   :  { %v2729_v19 = vmax.f32 %v2721_v22, %v2728_v40  ;;  %v2726_v46 = vsel %vm154_vm6, %v5902_v42, -inf  ;;  %v5940_v40 = vpop.permute.xlu1 %2997 }
 0x375   :  { %v2727_v49 = vmax.f32 %v2719_v16, %v2726_v46  ;;  %v5936_v16 = vpop.permute.xlu0 %2995  ;;  %6585 = vst [vmem:[#allocation35_spill] sm:$0xff] %v5940_v40  ;;  %v5960_v40 = vld [vmem:[#allocation4] sm:$0x7] }
 0x376   :  { %v5910_v51 = vpop.f32.mrb[80].mxu1  ;;  %6584 = vst [vmem:[#allocation34_spill] sm:$0xff] %v5936_v16  ;;  %6590 = vst [vmem:[#allocation40_spill] sm:$0xff] %v5960_v40 }
 0x377   :  { %v2732_v26 = vsel %vm154_vm6, %v5910_v51, -inf  ;;  %v5914_v30 = vpop.f32.mrb[81].mxu1 }
 0x378   :  { %v2733_v54 = vmax.f32 %v2725_v17, %v2732_v26  ;;  %v2730_v55 = vsel %vm154_vm6, %v5914_v30, -inf }
 0x379   :  { %v2731_v58 = vmax.f32 %v2723_v37, %v2730_v55  ;;  %v2778_v37 = vlaneseq }
 0x37a   :  { %v5920_v29 = vpop.f32.mrb[82].mxu1 }
 0x37b   :  { %v2736_v2 = vsel %vm154_vm6, %v5920_v29, -inf  ;;  %v5924_v4 = vpop.f32.mrb[83].mxu1 }
 0x37c   :  { %v2737_v9 = vmax.f32 %v2729_v19, %v2736_v2  ;;  %v2734_v10 = vsel %vm154_vm6, %v5924_v4, -inf }
 0x37d   :  { %v2735_v36 = vmax.f32 %v2727_v49, %v2734_v10  ;;  %v5952_v10 = vpop.permute.xlu0 %2991 }
 0x37e   :  { %v5930_v45 = vpop.f32.mrb[84].mxu1  ;;  %6587 = vst [vmem:[#allocation37_spill] sm:$0xff] %v5952_v10 }
 0x37f   :  { %v2740_v22 = vsel %vm154_vm6, %v5930_v45, -inf  ;;  %v5934_v24 = vpop.f32.mrb[85].mxu1 }
 0x380   :  { %v2741_v31 = vmax.f32 %v2733_v54, %v2740_v22  ;;  %v2738_v17 = vsel %vm154_vm6, %v5934_v24, -inf  ;;  %v5950_v54 = vshrl.u32 %v2778_v37, 7 }
 0x381   :  { %v2739_v35 = vmax.f32 %v2731_v58, %v2738_v17 }
 0x382   :  { %v5942_v19 = vpop.f32.mrb[86].mxu1  ;;  %6586 = vst [vmem:[#allocation36_spill] sm:$0xff] %v5950_v54  ;;  %v3192_v16 = vsub.s32 1, %v5950_v54  ;;  %v3196_v37 = vsub.s32 2, %v5950_v54 }
 0x383   :  { %v2744_v46 = vsel %vm154_vm6, %v5942_v19, -inf  ;;  %v5946_v49 = vpop.f32.mrb[87].mxu1 }
 0x384   :  { %v2745_v26 = vmax.f32 %v2737_v9, %v2744_v46  ;;  %v2742_v55 = vsel %vm154_vm6, %v5946_v49, -inf  ;;  %v5963_v9 = vpop.permute.xlu1 %2993  ;;  %v5969_v10 = vrot.slane %v5960_v40, %v3192_v16  ;;  %v5974_v43 = vrot.slane %v5960_v40, %v3196_v37 }
 0x385   :  { %v2743_v2 = vmax.f32 %v2735_v36, %v2742_v55  ;;  %6591 = vst [vmem:[#allocation41_spill] sm:$0xff] %v5963_v9 }
 0x386   :  { %v5954_v58 = vpop.f32.mrb[88].mxu1  ;;  %6592 = vst [vmem:[#allocation42_spill] sm:$0xff] %v5969_v10  ;;  %6593 = vst [vmem:[#allocation43_spill] sm:$0xff] %v5974_v43  ;;  %vm3199_vm7 = vcmp.eq.s32.totalorder %v5950_v54, %v5969_v10  ;;  %vm3200_vm8 = vcmp.eq.s32.totalorder %v5950_v54, %v5974_v43 }
 0x387   :  { %6588 = vst [vmem:[#allocation38_spill] sm:$0xff] %v5954_v58  ;;  %v2748_v22 = vsel %vm154_vm6, %v5954_v58, -inf  ;;  %v5958_v17 = vpop.f32.mrb[89].mxu1 }
 0x388   :  { %6589 = vst [vmem:[#allocation39_spill] sm:$0xff] %v5958_v17  ;;  %v2749_v46 = vmax.f32 %v2741_v31, %v2748_v22  ;;  %v2746_v36 = vsel %vm154_vm6, %v5958_v17, -inf  ;;  %v5982_v31 = vpop.permute.xlu0 %2999  ;;  %v5990_v37 = vpop.permute.xlu1 %3001 }
 0x389   :  { %v2747_v55 = vmax.f32 %v2739_v35, %v2746_v36  ;;  %6595 = vst [vmem:[#allocation45_spill] sm:$0xff] %v5982_v31  ;;  %v6564_v35 = vmov 1.0   ;;  %6596 = vst [vmem:[#allocation46_spill] sm:$0xff] %v5990_v37 }
 0x38a   :  { %v5971_v50 = vpop.f32.mrb[90].mxu1  ;;  %4024 = vmatprep.mubr.msk.f32.mxu0 %vm3199_vm7, %v6564_v35  ;;  %4588 = vmatprep.mubr.msk.f32.mxu1 %vm3200_vm8, %v6564_v35 }
 0x38b   :  { %v2752_v7 = vsel %vm154_vm6, %v5971_v50, -inf  ;;  %v5978_v0 = vpop.f32.mrb[91].mxu1 }
 0x38c   :  { %6594 = vst [vmem:[#allocation44_spill] sm:$0xff] %v5978_v0  ;;  %v2753_v22 = vmax.f32 %v2745_v26, %v2752_v7  ;;  %v2750_v16 = vsel %vm154_vm6, %v5978_v0, -inf  ;;  %v5998_v26 = vpop.permute.xlu0 %3011  ;;  %v6002_v43 = vpop.permute.xlu1 %3013 }
 0x38d   :  { %v2751_v36 = vmax.f32 %v2743_v2, %v2750_v16  ;;  %6599 = vst [vmem:[#allocation49_spill] sm:$0xff] %v5998_v26  ;;  %6600 = vst [vmem:[#allocation50_spill] sm:$0xff] %v6002_v43 }
 0x38e   :  { %v5992_v40 = vpop.f32.mrb[92].mxu1 }
 0x38f   :  { %6597 = vst [vmem:[#allocation47_spill] sm:$0xff] %v5992_v40  ;;  %v2756_v10 = vsel %vm154_vm6, %v5992_v40, -inf  ;;  %v5996_v7 = vpop.f32.mrb[93].mxu1 }
 0x390   :  { %6598 = vst [vmem:[#allocation48_spill] sm:$0xff] %v5996_v7  ;;  %v2757_v31 = vmax.f32 %v2749_v46, %v2756_v10  ;;  %v2754_v9 = vsel %vm154_vm6, %v5996_v7, -inf  ;;  %v6009_v40 = vpop.permute.xlu0 %3007  ;;  %v4923_v46 = vld [vmem:[#allocation18] sm:$0xff] }
 0x391   :  { %v2755_v12 = vmax.f32 %v2747_v55, %v2754_v9  ;;  %3570 = vrot.lane.b32.xlu0 %v4923_v46, %s5175_s13  ;;  %v6012_v9 = vpop.permute.xlu1 %3009  ;;  %v6023_v46 = vsub.s32 0, %v5950_v54 }
 0x392   :  { %v6004_v2 = vpop.f32.mrb[94].mxu1  ;;  %6602 = vst [vmem:[#allocation52_spill] sm:$0xff] %v6012_v9 }
 0x393   :  { %6601 = vst [vmem:[#allocation51_spill] sm:$0xff] %v6004_v2  ;;  %v2762_v16 = vmax.f32 %v2755_v12, %v2757_v31  ;;  %v2760_v35 = vsel %vm154_vm6, %v6004_v2, -inf  ;;  %v2659_v37 = vpop.f32.mrb[95].mxu1 }
 0x394   :  { %v2761_v60 = vmax.f32 %v2753_v22, %v2760_v35  ;;  %v2758_v33 = vsel %vm154_vm6, %v2659_v37, -inf  ;;  %v6014_v12 = vpop.permute.xlu0 %3019 }
 0x395   :  { %v2759_v15 = vmax.f32 %v2751_v36, %v2758_v33  ;;  %v6016_v26 = vpop.permute.xlu1 %3021 }
 0x397   :  { %v2763_v10 = vmax.f32 %v2759_v15, %v2761_v60  ;;  %v2668_v60 = vld [vmem:[#allocation3] sm:$0x1] }
 0x398   :  { %v6018_v2 = vpop.permute.xlu0 %3015 }
 0x399   :  { %v2764_v55 = vmax.f32 %v2762_v16, %v2763_v10  ;;  %v6020_v36 = vpop.permute.xlu1 %3017 }
 0x39a   :  { %v6609_v54 = vld [vmem:[#allocation51_spill] sm:$0xff] }
 0x39b   :  { %v2765_v43 = vrot.slane %v2764_v55, 4 }
 0x39c   :  { %v6025_v16 = vpop.permute.xlu0 %3027 }
 0x39d   :  { %v2766_v31 = vmax.f32 %v2764_v55, %v2765_v43  ;;  %6603 = vst [vmem:[#allocation53_spill] sm:$0xff] %v6025_v16  ;;  %v6031_v55 = vpop.permute.xlu1 %3029 }
 0x39e   :  { %6604 = vst [vmem:[#allocation54_spill] sm:$0xff] %v6031_v55 }
 0x39f   :  { %v2767_v22 = vrot.slane %v2766_v31, 2 }
 0x3a1   :  { %v2768_v35 = vmax.f32 %v2766_v31, %v2767_v22 }
 0x3a3   :  { %v2769_v33 = vrot.slane %v2768_v35, 1 }
 0x3a5   :  { %v2770_v15 = vmax.f32 %v2768_v35, %v2769_v33 }
 0x3a7   :  { %v2771_v9 = vmax.f32 %v2668_v60, %v2770_v15 }
 0x3a9   :  { %2773 = vst.msk [vmem:[#allocation3] sm:$0x1] %vm163_vm5, %v2771_v9  ;;  %v2774_v43 = vsub.f32 %v2668_v60, %v2771_v9  ;;  %v6029_v10 = vrot.slane %v2771_v9, %v6023_v46 }
 0x3ab   :  { %v2775_v31 = vmul.f32 1.442695, %v2774_v43  ;;  %v2829_v22 = vsub.f32 %v2659_v37, %v6029_v10  ;;  %v2783_v35 = vsub.f32 %v5764_v61, %v6029_v10  ;;  %v2784_v33 = vsub.f32 %v5762_v59, %v6029_v10  ;;  %v6050_v59 = vpop.permute.xlu0 %3023 }
 0x3ac   :  { %v2785_v15 = vsub.f32 %v5768_v44, %v6029_v10  ;;  %v2786_v60 = vsub.f32 %v5766_v62, %v6029_v10  ;;  %v2787_v9 = vsub.f32 %v5776_v1, %v6029_v10  ;;  %v2788_v43 = vsub.f32 %v5770_v48, %v6029_v10 }
 0x3ad   :  { %4761 = vpow2.f32 %v2775_v31  ;;  %v2789_v37 = vsub.f32 %v5788_v6, %v6029_v10  ;;  %v2790_v61 = vsub.f32 %v5782_v5, %v6029_v10  ;;  %v2791_v44 = vsub.f32 %v5798_v14, %v6029_v10  ;;  %v6066_v14 = vpop.permute.xlu1 %3025 }
 0x3ae   :  { %v2792_v62 = vsub.f32 %v5794_v13, %v6029_v10  ;;  %v2923_v31 = vmul.f32 1.442695, %v2829_v22  ;;  %6605 = vst [vmem:[#allocation55_spill] sm:$0xff] %v6066_v14  ;;  %v2831_v13 = vmul.f32 1.442695, %v2783_v35 }
 0x3af   :  { %v6100_v55 = vpop.permute.xlu0 %3035  ;;  %v2833_v58 = vmul.f32 1.442695, %v2784_v33  ;;  %v2835_v17 = vmul.f32 1.442695, %v2785_v15  ;;  %v2837_v1 = vmul.f32 1.442695, %v2786_v60  ;;  %v6610_v15 = vsub.f32 %v5806_v23, %v6029_v10 }
 0x3b0   :  { %6606 = vst [vmem:[#allocation56_spill] sm:$0xff] %v6100_v55  ;;  %4763 = vpow2.f32 %v2923_v31  ;;  %v2839_v22 = vmul.f32 1.442695, %v2787_v9  ;;  %v2841_v6 = vmul.f32 1.442695, %v2788_v43  ;;  %v6612_v43 = vsub.f32 %v5814_v28, %v6029_v10 }
 0x3b1   :  { %v6118_v55 = vpop.permute.xlu1 %3037  ;;  %4765 = vpow2.f32 %v2831_v13  ;;  %v2843_v16 = vmul.f32 1.442695, %v2789_v37  ;;  %v2845_v14 = vmul.f32 1.442695, %v2790_v61  ;;  %v2849_v35 = vmul.f32 1.442695, %v2792_v62 }
 0x3b2   :  { %6607 = vst [vmem:[#allocation57_spill] sm:$0xff] %v6118_v55  ;;  %v6608_v55 = vld [vmem:[#allocation47_spill] sm:$0xff]  ;;  %4767 = vpow2.f32 %v2833_v58  ;;  %v2851_v60 = vmul.f32 1.442695, %v6610_v15  ;;  %v6611_v58 = vsub.f32 %v5802_v21, %v6029_v10  ;;  %v2855_v37 = vmul.f32 1.442695, %v6612_v43 }
 0x3b3   :  { %v6139_v0 = vpop.permute.xlu0 %3031  ;;  %4769 = vpow2.f32 %v2835_v17  ;;  %v6614_v21 = vsub.f32 %v5822_v18, %v6029_v10  ;;  %v6615_v31 = vsub.f32 %v5818_v34, %v6029_v10  ;;  %v6617_v18 = vsub.f32 %v5826_v39, %v6029_v10  ;;  %v6619_v34 = vld [vmem:[#allocation28_spill] sm:$0xff]  ;;  %v6620_v43 = vld [vmem:[#allocation29_spill] sm:$0xff] }
 0x3b4   :  { %4771 = vpow2.f32 %v2837_v1  ;;  %v2853_v9 = vmul.f32 1.442695, %v6611_v58 }
 0x3b5   :  { %v6141_v7 = vpop.permute.xlu1 %3033  ;;  %4773 = vpow2.f32 %v2839_v22  ;;  %v2859_v62 = vmul.f32 1.442695, %v6614_v21  ;;  %v2861_v28 = vmul.f32 1.442695, %v6615_v31  ;;  %v6624_v31 = vsub.f32 %v5846_v53, %v6029_v10 }
 0x3b6   :  { %4775 = vpow2.f32 %v2841_v6  ;;  %v6627_v53 = vsub.f32 %v5842_v52, %v6029_v10  ;;  %v6631_v52 = vsub.f32 %v5850_v56, %v6029_v10  ;;  %v6635_v56 = vsub.f32 %v5858_v3, %v6029_v10 }
 0x3b7   :  { %v4762_v5 = vpop.eup %4761  ;;  %v6143_v33 = vpop.permute.xlu0 %3043  ;;  %4777 = vpow2.f32 %v2843_v16  ;;  %v6613_v16 = vsub.f32 %v5810_v25, %v6029_v10  ;;  %v6616_v25 = vsub.f32 %v5830_v41, %v6029_v10  ;;  %v6639_v3 = vsub.f32 %v5870_v8, %v6029_v10 }
 0x3b8   :  { %v6137_v48 = vrot.slane %v4762_v5, %v6023_v46  ;;  %v2847_v5 = vmul.f32 1.442695, %v2791_v44  ;;  %4779 = vpow2.f32 %v2845_v14  ;;  %v6643_v8 = vsub.f32 %v5888_v27, %v6029_v10 }
 0x3b9   :  { %v6151_v17 = vpop.permute.xlu1 %3045  ;;  %v2857_v23 = vmul.f32 1.442695, %v6613_v16  ;;  %v2863_v13 = vmul.f32 1.442695, %v6616_v25  ;;  %v2871_v25 = vmul.f32 1.442695, %v6624_v31  ;;  %v6645_v27 = vsub.f32 %v5898_v38, %v6029_v10 }
 0x3ba   :  { %4781 = vpow2.f32 %v2847_v5  ;;  %v6156_v61 = vpop.eup %4763  ;;  %v2865_v5 = vmul.f32 1.442695, %v6617_v18  ;;  %v6630_v31 = vld [vmem:[#allocation31_spill] sm:$0xff] }
 0x3bb   :  { %4783 = vpow2.f32 %v2849_v35  ;;  %v4766_v44 = vpop.eup %4765  ;;  %v6167_v14 = vpop.permute.xlu0 %3039  ;;  %v6618_v35 = vsub.f32 %v5838_v47, %v6029_v10  ;;  %v6623_v47 = vsub.f32 %v5834_v20, %v6029_v10 }
 0x3bc   :  { %4785 = vpow2.f32 %v2851_v60  ;;  %v4768_v1 = vpop.eup %4767  ;;  %v6179_v60 = vmul.f32 %v4766_v44, %v6619_v34  ;;  %v2873_v34 = vmul.f32 1.442695, %v6627_v53 }
 0x3bd   :  { %4787 = vpow2.f32 %v2853_v9  ;;  %v4770_v6 = vpop.eup %4769  ;;  %v2867_v15 = vmul.f32 1.442695, %v6618_v35  ;;  %v6181_v9 = vpop.permute.xlu1 %3041  ;;  %v6184_v41 = vmul.f32 %v4768_v1, %v6620_v43  ;;  %v2869_v44 = vmul.f32 1.442695, %v6623_v47  ;;  %v6628_v43 = vld [vmem:[#allocation30_spill] sm:$0xff] }
 0x3be   :  { %4789 = vpow2.f32 %v2855_v37  ;;  %v4772_v22 = vpop.eup %4771  ;;  %v6621_v37 = vld [vmem:[#allocation26_spill] sm:$0xff] }
 0x3bf   :  { %4791 = vpow2.f32 %v2857_v23  ;;  %v4774_v58 = vpop.eup %4773  ;;  %v6187_v16 = vmul.f32 %v4770_v6, %v6621_v37  ;;  %v6622_v23 = vld [vmem:[#allocation27_spill] sm:$0xff]  ;;  %v4624_v6 = vpack.c.bf16 %v6184_v41, %v6179_v60 }
 0x3c0   :  { %4793 = vpow2.f32 %v2859_v62  ;;  %v6190_v39 = vmul.f32 %v4772_v22, %v6622_v23  ;;  %v4776_v21 = vpop.eup %4775  ;;  %v6625_v62 = vld [vmem:[#allocation32_spill] sm:$0xff]  ;;  %v6629_v23 = vsub.f32 %v5854_v63, %v6029_v10  ;;  %v6633_v63 = vsub.f32 %v5862_v57, %v6029_v10 }
 0x3c1   :  { %4795 = vpow2.f32 %v2861_v28  ;;  %v6199_v18 = vmul.f32 %v4774_v58, %v6625_v62  ;;  %v4778_v1 = vpop.eup %4777  ;;  %v6626_v28 = vld [vmem:[#allocation33_spill] sm:$0xff]  ;;  %v6637_v57 = vsub.f32 %v5874_v11, %v6029_v10  ;;  %v6641_v11 = vsub.f32 %v5892_v32, %v6029_v10 }
 0x3c2   :  { %4797 = vpow2.f32 %v2863_v13  ;;  %v6206_v35 = vmul.f32 %v4776_v21, %v6626_v28  ;;  %v4780_v20 = vpop.eup %4779  ;;  %v6212_v58 = vmul.f32 %v4778_v1, %v6628_v43  ;;  %v3004_v13 = vpop.permute.xlu0 %3003  ;;  %v2875_v47 = vmul.f32 1.442695, %v6629_v23  ;;  %v6632_v28 = vld [vmem:[#allocation37_spill] sm:$0xff] }
 0x3c3   :  { %4799 = vpow2.f32 %v2865_v5  ;;  %v6220_v62 = vmul.f32 %v4780_v20, %v6630_v31  ;;  %v2877_v1 = vmul.f32 1.442695, %v6631_v52  ;;  %v3006_v43 = vpop.permute.xlu1 %3005  ;;  %v2879_v23 = vmul.f32 1.442695, %v6633_v63  ;;  %v6634_v31 = vld [vmem:[#allocation41_spill] sm:$0xff]  ;;  %v6636_v52 = vld [vmem:[#allocation34_spill] sm:$0xff] }
 0x3c4   :  { %v4782_v37 = vpop.eup %4781  ;;  %4801 = vpow2.f32 %v2867_v15  ;;  %v2883_v63 = vmul.f32 1.442695, %v6637_v57  ;;  %v2887_v57 = vmul.f32 1.442695, %v6641_v11  ;;  %v6644_v32 = vsub.f32 %v5902_v42, %v6029_v10 }
 0x3c5   :  { %v4784_v5 = vpop.eup %4783  ;;  %4803 = vpow2.f32 %v2869_v44  ;;  %v6226_v53 = vmul.f32 %v4782_v37, %v6632_v28  ;;  %v2881_v37 = vmul.f32 1.442695, %v6635_v56  ;;  %v2885_v56 = vmul.f32 1.442695, %v6639_v3 }
 0x3c6   :  { %v4786_v15 = vpop.eup %4785  ;;  %4805 = vpow2.f32 %v2871_v25  ;;  %v6234_v21 = vmul.f32 %v4784_v5, %v6634_v31  ;;  %v6638_v5 = vld [vmem:[#allocation35_spill] sm:$0xff]  ;;  %v6256_v22 = vpop.permute.xlu0 %3047  ;;  %v2891_v11 = vmul.f32 1.442695, %v6644_v32  ;;  %v6647_v32 = vld [vmem:[#allocation52_spill] sm:$0xff] }
 0x3c7   :  { %v4788_v44 = vpop.eup %4787  ;;  %4807 = vpow2.f32 %v2873_v34  ;;  %v6240_v28 = vmul.f32 %v4786_v15, %v6636_v52  ;;  %v6640_v15 = vld [vmem:[#allocation45_spill] sm:$0xff] }
 0x3c8   :  { %v4790_v25 = vpop.eup %4789  ;;  %4809 = vpow2.f32 %v2875_v47  ;;  %v6248_v31 = vmul.f32 %v4788_v44, %v6638_v5  ;;  %v6642_v5 = vld [vmem:[#allocation46_spill] sm:$0xff] }
 0x3c9   :  { %v4792_v34 = vpop.eup %4791  ;;  %4811 = vpow2.f32 %v2877_v1  ;;  %v6254_v52 = vmul.f32 %v4790_v25, %v6640_v15  ;;  %v2889_v25 = vmul.f32 1.442695, %v6643_v8 }
 0x3ca   :  { %v4794_v47 = vpop.eup %4793  ;;  %4813 = vpow2.f32 %v2879_v23  ;;  %v6264_v1 = vmul.f32 %v4792_v34, %v6642_v5  ;;  %v6271_v23 = vpop.permute.xlu1 %3049 }
 0x3cb   :  { %v4796_v20 = vpop.eup %4795  ;;  %4815 = vpow2.f32 %v2881_v37  ;;  %v6269_v3 = vmul.f32 %v4794_v47, %v3004_v13  ;;  %v2893_v13 = vmul.f32 1.442695, %v6645_v27  ;;  %v6649_v27 = vld [vmem:[#allocation49_spill] sm:$0xff] }
 0x3cc   :  { %v4798_v15 = vpop.eup %4797  ;;  %4817 = vpow2.f32 %v2883_v63  ;;  %v6278_v5 = vmul.f32 %v4796_v20, %v3006_v43  ;;  %v6646_v63 = vsub.f32 %v5914_v30, %v6029_v10  ;;  %v6650_v30 = vsub.f32 %v5924_v4, %v6029_v10 }
 0x3cd   :  { %v4800_v37 = vpop.eup %4799  ;;  %4819 = vpow2.f32 %v2885_v56  ;;  %v3135_v47 = vmul.f32 %v4798_v15, %v6009_v40  ;;  %v6648_v56 = vsub.f32 %v5910_v51, %v6029_v10  ;;  %v6294_v15 = vpop.permute.xlu0 %3051 }
 0x3ce   :  { %v4802_v8 = vpop.eup %4801  ;;  %4821 = vpow2.f32 %v2887_v57  ;;  %v2895_v42 = vmul.f32 1.442695, %v6646_v63  ;;  %v3136_v44 = vmul.f32 %v4800_v37, %v6647_v32  ;;  %v2899_v57 = vmul.f32 1.442695, %v6650_v30  ;;  %v6651_v63 = vld [vmem:[#allocation50_spill] sm:$0xff] }
 0x3cf   :  { %v4804_v20 = vpop.eup %4803  ;;  %4823 = vpow2.f32 %v2889_v25  ;;  %v2897_v38 = vmul.f32 1.442695, %v6648_v56  ;;  %v3137_v34 = vmul.f32 %v4802_v8, %v6649_v27  ;;  %v6652_v25 = vsub.f32 %v5920_v29, %v6029_v10  ;;  %v6304_v27 = vpop.permute.xlu1 %3053 }
 0x3d0   :  { %v4806_v40 = vpop.eup %4805  ;;  %4825 = vpow2.f32 %v2891_v11  ;;  %v4622_v37 = vpack.c.bf16 %v3136_v44, %v3135_v47  ;;  %v3138_v32 = vmul.f32 %v4804_v20, %v6651_v63  ;;  %v6653_v11 = vsub.f32 %v5934_v24, %v6029_v10 }
 0x3d1   :  { %v4808_v43 = vpop.eup %4807  ;;  %4827 = vpow2.f32 %v2893_v13  ;;  %v2901_v51 = vmul.f32 1.442695, %v6652_v25  ;;  %v3139_v56 = vmul.f32 %v4806_v40, %v6018_v2  ;;  %v6654_v29 = vsub.f32 %v5930_v45, %v6029_v10 }
 0x3d2   :  { %v4810_v8 = vpop.eup %4809  ;;  %4829 = vpow2.f32 %v2895_v42  ;;  %v2903_v4 = vmul.f32 1.442695, %v6653_v11  ;;  %4623 = vmatprep.subr.bf16.mxu0 %v4622_v37  ;;  %v4626_v44 = vpack.c.bf16 %v3138_v32, %v3137_v34  ;;  %v3140_v47 = vmul.f32 %v4808_v43, %v6020_v36  ;;  %v6659_v37 = vld [vmem:[#allocation55_spill] sm:$0xff]  ;;  %v6660_v32 = vld [vmem:[#allocation38_spill] sm:$0xff] }
 0x3d3   :  { %v4812_v20 = vpop.eup %4811  ;;  %4831 = vpow2.f32 %v2897_v38  ;;  %v2905_v13 = vmul.f32 1.442695, %v6654_v29  ;;  %4625 = vmatpush3.bf16.msra.mxu0 %v4624_v6  ;;  %v3141_v2 = vmul.f32 %v4810_v8, %v6014_v12  ;;  %v6655_v24 = vsub.f32 %v5946_v49, %v6029_v10  ;;  %v6325_v12 = vpop.permute.xlu0 %3055  ;;  %v6657_v6 = vld [vmem:[#allocation39_spill] sm:$0xff]  ;;  %v6666_v29 = vld [vmem:[#allocation54_spill] sm:$0xff] }
 0x3d4   :  { %v4814_v42 = vpop.eup %4813  ;;  %4833 = vpow2.f32 %v2899_v57  ;;  %4627 = vmatprep.subr.bf16.mxu0 %v4626_v44  ;;  %v4630_v36 = vpack.c.bf16 %v3140_v47, %v3139_v56  ;;  %v3142_v43 = vmul.f32 %v4812_v20, %v6016_v26  ;;  %v6656_v45 = vsub.f32 %v5942_v19, %v6029_v10  ;;  %v6338_v11 = vpop.permute.xlu1 %3057 }
 0x3d5   :  { %v2907_v34 = vmul.f32 1.442695, %v6655_v24  ;;  %v4816_v38 = vpop.eup %4815  ;;  %4835 = vpow2.f32 %v2901_v51  ;;  %v3143_v60 = vmul.f32 %v4814_v42, %v6050_v59  ;;  %v6658_v49 = vsub.f32 %v6657_v6, %v6029_v10  ;;  %v6663_v51 = vld [vmem:[#allocation53_spill] sm:$0xff] }
 0x3d6   :  { %v2909_v40 = vmul.f32 1.442695, %v6656_v45  ;;  %v4818_v41 = vpop.eup %4817  ;;  %4837 = vpow2.f32 %v2903_v4  ;;  %v4634_v57 = vpack.c.bf16 %v3142_v43, %v3141_v2  ;;  %v3144_v63 = vmul.f32 %v4816_v38, %v6659_v37  ;;  %v6664_v4 = vld [vmem:[#allocation44_spill] sm:$0xff] }
 0x3d7   :  { %v2911_v30 = vmul.f32 1.442695, %v6658_v49  ;;  %v4820_v26 = vpop.eup %4819  ;;  %4839 = vpow2.f32 %v2905_v13  ;;  %v6661_v25 = vsub.f32 %v6660_v32, %v6029_v10  ;;  %v6662_v59 = vpack.c.bf16 %v6190_v39, %v6187_v16 }
 0x3d8   :  { %v3145_v56 = vmul.f32 %v4818_v41, %v6663_v51  ;;  %v4822_v8 = vpop.eup %4821  ;;  %4841 = vpow2.f32 %v2907_v34  ;;  %v6665_v44 = vsub.f32 %v6664_v4, %v6029_v10  ;;  %v4638_v20 = vpack.c.bf16 %v3144_v63, %v3143_v60  ;;  %v6668_v34 = vld [vmem:[#allocation48_spill] sm:$0xff] }
 0x3d9   :  { %v2913_v19 = vmul.f32 1.442695, %v6661_v25  ;;  %4629 = vmatpush3.bf16.msra.mxu0 %v6662_v59  ;;  %v3146_v13 = vmul.f32 %v4820_v26, %v6666_v29  ;;  %v4824_v2 = vpop.eup %4823  ;;  %4843 = vpow2.f32 %v2909_v40  ;;  %v6667_v16 = vsub.f32 %v5971_v50, %v6029_v10  ;;  %v6674_v26 = vld [vmem:[#allocation57_spill] sm:$0xff]  ;;  %v3062_v25 = vpop.permute.xlu1 %3061 }
 0x3da   :  { %v2915_v47 = vmul.f32 1.442695, %v6665_v44  ;;  %4631 = vmatprep.subr.bf16.mxu0 %v4630_v36  ;;  %v6348_v42 = vmul.f32 %v4822_v8, %v6139_v0  ;;  %v4826_v24 = vpop.eup %4825  ;;  %4845 = vpow2.f32 %v2911_v30  ;;  %v6669_v43 = vsub.f32 %v6668_v34, %v6029_v10  ;;  %v6672_v0 = vld [vmem:[#allocation56_spill] sm:$0xff]  ;;  %v3060_v30 = vpop.permute.xlu0 %3059 }
 0x3db   :  { %v2917_v39 = vmul.f32 1.442695, %v6667_v16  ;;  %v4642_v45 = vpack.c.bf16 %v3146_v13, %v3145_v56  ;;  %v3148_v36 = vmul.f32 %v4824_v2, %v6141_v7  ;;  %v4828_v60 = vpop.eup %4827  ;;  %4847 = vpow2.f32 %v2913_v19 }
 0x3dc   :  { %v2919_v38 = vmul.f32 1.442695, %v6669_v43  ;;  %v6670_v40 = vsub.f32 %v6608_v55, %v6029_v10  ;;  %v6671_v50 = vpack.c.bf16 %v6206_v35, %v6199_v18  ;;  %v6361_v6 = vmul.f32 %v4826_v24, %v6672_v0  ;;  %v4830_v49 = vpop.eup %4829 }
 0x3dd   :  { %4849 = vpow2.f32 %v2915_v47  ;;  %v6673_v37 = vsub.f32 %v6609_v54, %v6029_v10  ;;  %v4646_v63 = vpack.c.bf16 %v3148_v36, %v6348_v42  ;;  %v6368_v55 = vmul.f32 %v4828_v60, %v6674_v26  ;;  %v4832_v32 = vpop.eup %4831 }
 0x3de   :  { %v2921_v41 = vmul.f32 1.442695, %v6670_v40  ;;  %4633 = vmatpush3.bf16.msra.mxu0 %v6671_v50  ;;  %4851 = vpow2.f32 %v2917_v39  ;;  %v3151_v18 = vmul.f32 %v4830_v49, %v6167_v14  ;;  %v4834_v35 = vpop.eup %4833  ;;  %v3152_v19 = vmul.f32 %v4832_v32, %v6181_v9  ;;  %v3064_v44 = vpop.permute.xlu0 %3063 }
 0x3df   :  { %v2925_v7 = vmul.f32 1.442695, %v6673_v37  ;;  %4635 = vmatprep.subr.bf16.mxu0 %v4634_v57  ;;  %4853 = vpow2.f32 %v2919_v38  ;;  %v4650_v59 = vpack.c.bf16 %v6368_v55, %v6361_v6  ;;  %v4836_v54 = vpop.eup %4835  ;;  %v3153_v10 = vmul.f32 %v4834_v35, %v6143_v33  ;;  %v6680_v6 = vld [vmem:[#allocation36_spill] sm:$0xff] }
 0x3e0   :  { %4855 = vpow2.f32 %v2921_v41  ;;  %v6675_v57 = vpack.c.bf16 %v6220_v62, %v6212_v58  ;;  %v4838_v51 = vpop.eup %4837  ;;  %v4654_v56 = vpack.c.bf16 %v3152_v19, %v3151_v18  ;;  %v3154_v14 = vmul.f32 %v4836_v54, %v6151_v17  ;;  %v3066_v17 = vpop.permute.xlu1 %3065 }
 0x3e1   :  { %4857 = vpow2.f32 %v2925_v7  ;;  %v4840_v8 = vpop.eup %4839  ;;  %v3155_v9 = vmul.f32 %v4838_v51, %v6256_v22  ;;  %v6676_v62 = vpack.c.bf16 %v6234_v21, %v6226_v53  ;;  %v6677_v21 = vpack.c.bf16 %v6248_v31, %v6240_v28  ;;  %v6679_v31 = vld [vmem:[#allocation40_spill] sm:$0xff]  ;;  %v6684_v7 = vld [vmem:[#allocation43_spill] sm:$0xff] }
 0x3e2   :  { %4637 = vmatpush3.bf16.msra.mxu0 %v6675_v57  ;;  %v4842_v4 = vpop.eup %4841  ;;  %4655 = vmatprep.subr.bf16.mxu1 %v4654_v56  ;;  %v4658_v47 = vpack.c.bf16 %v3154_v14, %v3153_v10  ;;  %v3156_v29 = vmul.f32 %v4840_v8, %v6271_v23  ;;  %v3068_v34 = vpop.permute.xlu0 %3067  ;;  %v6678_v41 = vpack.c.bf16 %v6264_v1, %v6254_v52  ;;  %v3169_v49 = vadd.s32 8, %v6680_v6  ;;  %v6682_v52 = vld [vmem:[#allocation42_spill] sm:$0xff] }
 0x3e3   :  { %4639 = vmatprep.subr.bf16.mxu0 %v4638_v20  ;;  %v4844_v33 = vpop.eup %4843  ;;  %4657 = vmatpush3.bf16.msra.mxu1 %v4654_v56  ;;  %v3157_v58 = vmul.f32 %v4842_v4, %v6294_v15  ;;  %v6397_v50 = vrot.slane %v6679_v31, %v6023_v46  ;;  %v3170_v46 = vadd.s32 16, %v6680_v6  ;;  %v6683_v1 = vmov 1.0   ;;  %v3271_v14 = vld [vmem:[#allocation2 + $0x8] sm:$0xff] }
 0x3e4   :  { %v4846_v13 = vpop.eup %4845  ;;  %4659 = vmatprep.subr.bf16.mxu1 %v4658_v47  ;;  %v4662_v20 = vpack.c.bf16 %v3156_v29, %v3155_v9  ;;  %v3158_v22 = vmul.f32 %v4844_v33, %v6304_v27  ;;  %v3070_v60 = vpop.permute.xlu1 %3069  ;;  %vm3202_vm10 = vcmp.eq.s32.totalorder %v3169_v49, %v6682_v52  ;;  %v3173_v37 = vadd.s32 40, %v6680_v6  ;;  %v3270_v9 = vld [vmem:[#allocation2] sm:$0xff] }
 0x3e5   :  { %v4848_v2 = vpop.eup %4847  ;;  %v3159_v16 = vmul.f32 %v4846_v13, %v6325_v12  ;;  %v3165_v12 = vmul.f32 %v6156_v61, %v3068_v34  ;;  %vm3198_vm9 = vcmp.eq.s32.totalorder %v6680_v6, %v6397_v50  ;;  %vm3201_vm11 = vcmp.eq.s32.totalorder %v3169_v49, %v6397_v50 }
 0x3e6   :  { %4641 = vmatpush3.bf16.msra.mxu0 %v6676_v62  ;;  %v4666_v23 = vpack.c.bf16 %v3158_v22, %v3157_v58  ;;  %v3160_v42 = vmul.f32 %v4848_v2, %v6338_v11  ;;  %vm3205_vm12 = vcmp.eq.s32.totalorder %v3170_v46, %v6682_v52  ;;  %vm3204_vm14 = vcmp.eq.s32.totalorder %v3170_v46, %v6397_v50  ;;  %v3272_v2 = vld [vmem:[#allocation2 + $0x10] sm:$0xff] }
 0x3e7   :  { %4643 = vmatprep.subr.bf16.mxu0 %v4642_v45  ;;  %v4850_v39 = vpop.eup %4849  ;;  %4661 = vmatpush3.bf16.msra.mxu1 %v4658_v47  ;;  %vm3203_vm3 = vcmp.eq.s32.totalorder %v3169_v49, %v6684_v7  ;;  %vm3206_vm5 = vcmp.eq.s32.totalorder %v3170_v46, %v6684_v7  ;;  %vm3214_vm7 = vcmp.eq.s32.totalorder %v3173_v37, %v6682_v52  ;;  %v3175_v26 = vadd.s32 56, %v6680_v6  ;;  %v3276_v49 = vld [vmem:[#allocation2 + $0x30] sm:$0xff] }
 0x3e8   :  { %v4852_v24 = vpop.eup %4851  ;;  %v3161_v15 = vmul.f32 %v4850_v39, %v3060_v30  ;;  %4663 = vmatprep.subr.bf16.mxu1 %v4662_v20  ;;  %v4670_v43 = vpack.c.bf16 %v3160_v42, %v3159_v16  ;;  %v6681_v30 = vpack.c.bf16 %v6278_v5, %v6269_v3  ;;  %v3171_v3 = vadd.s32 24, %v6680_v6 }
 0x3e9   :  { %v4854_v53 = vpop.eup %4853  ;;  %v3162_v27 = vmul.f32 %v4852_v24, %v3062_v25  ;;  %v3172_v5 = vadd.s32 32, %v6680_v6  ;;  %v3285_v29 = vmul.f32 %v6137_v48, %v3271_v14  ;;  %v3284_v62 = vmul.f32 %v6137_v48, %v3270_v9 }
 0x3ea   :  { %4645 = vmatpush3.bf16.msra.mxu0 %v6677_v21  ;;  %v4856_v38 = vpop.eup %4855  ;;  %v3163_v45 = vmul.f32 %v4854_v53, %v3064_v44  ;;  %vm3208_vm15 = vcmp.eq.s32.totalorder %v3171_v3, %v6682_v52  ;;  %vm3207_vm1 = vcmp.eq.s32.totalorder %v3171_v3, %v6397_v50  ;;  %vm3209_vm8 = vcmp.eq.s32.totalorder %v3171_v3, %v6684_v7  ;;  %v3277_v3 = vld [vmem:[#allocation2 + $0x38] sm:$0xff] }
 0x3eb   :  { %4647 = vmatprep.subr.bf16.mxu0 %v4646_v63  ;;  %v4858_v36 = vpop.eup %4857  ;;  %v4674_v11 = vpack.c.bf16 %v3162_v27, %v3161_v15  ;;  %v3164_v40 = vmul.f32 %v4856_v38, %v3066_v17  ;;  %4665 = vmatpush3.bf16.msra.mxu1 %v4662_v20  ;;  %vm3211_vm2 = vcmp.eq.s32.totalorder %v3172_v5, %v6682_v52  ;;  %v3174_v63 = vadd.s32 48, %v6680_v6  ;;  %v3273_v17 = vld [vmem:[#allocation2 + $0x18] sm:$0xff] }
 0x3ec   :  { %v3166_v28 = vmul.f32 %v4858_v36, %v3070_v60  ;;  %4667 = vmatprep.subr.bf16.mxu1 %v4666_v23  ;;  %vm3210_vm4 = vcmp.eq.s32.totalorder %v3172_v5, %v6397_v50  ;;  %v3287_v24 = vmul.f32 %v6137_v48, %v3273_v17  ;;  %v3286_v53 = vmul.f32 %v6137_v48, %v3272_v2 }
 0x3ed   :  { %v4678_v0 = vpack.c.bf16 %v3164_v40, %v3163_v45  ;;  %v3274_v45 = vld [vmem:[#allocation2 + $0x20] sm:$0xff] }
 0x3ee   :  { %4649 = vmatpush3.bf16.msra.mxu0 %v6678_v41  ;;  %v4682_v61 = vpack.c.bf16 %v3166_v28, %v3165_v12  ;;  %v3288_v31 = vmul.f32 %v6137_v48, %v3274_v45 }
 0x3ef   :  { %4651 = vmatprep.subr.bf16.mxu0 %v4650_v59  ;;  %4669 = vmatpush3.bf16.msra.mxu1 %v4666_v23 }
 0x3f0   :  { %4671 = vmatprep.subr.bf16.mxu1 %v4670_v43 }
 0x3f2   :  { %4653 = vmatpush3.bf16.msra.mxu0 %v6681_v30 }
 0x3f3   :  { %4673 = vmatpush3.bf16.msra.mxu1 %v4670_v43  ;;  %v3275_v43 = vld [vmem:[#allocation2 + $0x28] sm:$0xff] }
 0x3f4   :  { %4675 = vmatprep.subr.bf16.mxu1 %v4674_v11  ;;  %v3289_v40 = vmul.f32 %v6137_v48, %v3275_v43 }
 0x3f5   :  { %4025 = vmatmul.mubr.msk.f32.vlgmr.msra.gmra.mrb[96].mxu0 %vm3198_vm9, %v6683_v1  ;;  %vm3213_vm9 = vcmp.eq.s32.totalorder %v3173_v37, %v6397_v50 }
 0x3f6   :  { %4026 = vmatprep.mubr.msk.f32.mxu0 %vm3202_vm10, %v6683_v1  ;;  %vm3212_vm10 = vcmp.eq.s32.totalorder %v3172_v5, %v6684_v7 }
 0x3f7   :  { %4677 = vmatpush3.bf16.msra.mxu1 %v4674_v11 }
 0x3f8   :  { %4679 = vmatprep.subr.bf16.mxu1 %v4678_v0 }
 0x3f9   :  { %4027 = vmatmul.mubr.msk.f32.gmra.mrb[98].mxu0 %vm3201_vm11, %v6683_v1  ;;  %vm3217_vm11 = vcmp.eq.s32.totalorder %v3174_v63, %v6682_v52 }
 0x3fa   :  { %4028 = vmatprep.mubr.msk.f32.mxu0 %vm3205_vm12, %v6683_v1  ;;  %vm3215_vm12 = vcmp.eq.s32.totalorder %v3173_v37, %v6684_v7 }
 0x3fb   :  { %4681 = vmatpush3.bf16.msra.mxu1 %v4678_v0 }
 0x3fc   :  { %4683 = vmatprep.subr.bf16.mxu1 %v4682_v61 }
 0x3fd   :  { %4029 = vmatmul.mubr.msk.f32.gmra.mrb[100].mxu0 %vm3204_vm14, %v6683_v1  ;;  %vm3216_vm14 = vcmp.eq.s32.totalorder %v3174_v63, %v6397_v50 }
 0x3fe   :  { %4030 = vmatprep.mubr.msk.f32.mxu0 %vm3208_vm15, %v6683_v1  ;;  %vm3218_vm15 = vcmp.eq.s32.totalorder %v3174_v63, %v6684_v7  ;;  %v3290_v63 = vmul.f32 %v6137_v48, %v3276_v49 }
 0x3ff   :  { %4685 = vmatpush3.bf16.msra.mxu1 %v4682_v61 }
 0x401   :  { %4031 = vmatmul.mubr.msk.f32.gmra.mrb[102].mxu0 %vm3207_vm1, %v6683_v1  ;;  %vm3220_vm1 = vcmp.eq.s32.totalorder %v3175_v26, %v6682_v52 }
 0x402   :  { %4032 = vmatprep.mubr.msk.f32.mxu0 %vm3211_vm2, %v6683_v1  ;;  %4589 = vmatmul.mubr.msk.f32.vlgmr.msra.gmra.mrb[96].mxu1 %vm3203_vm3, %v6683_v1  ;;  %vm3221_vm2 = vcmp.eq.s32.totalorder %v3175_v26, %v6684_v7  ;;  %vm3219_vm3 = vcmp.eq.s32.totalorder %v3175_v26, %v6397_v50 }
 0x403   :  { %4591 = vmatprep.mubr.msk.f32.mxu1 %vm3206_vm5, %v6683_v1  ;;  %v3571_v55 = vpop.permute.xlu0 %3570 }
 0x404   :  { %4600 = vmatprep.subr.mxu1 %v3571_v55 }
 0x405   :  { %4033 = vmatmul.mubr.msk.f32.gmra.mrb[104].mxu0 %vm3210_vm4, %v6683_v1  ;;  %4601 = vmatpush3.msra.mxu1 %v3571_v55 }
 0x406   :  { %4034 = vmatprep.mubr.msk.f32.mxu0 %vm3214_vm7, %v6683_v1  ;;  %4592 = vmatmul.mubr.msk.f32.gmra.mrb[98].mxu1 %vm3209_vm8, %v6683_v1 }
 0x407   :  { %4594 = vmatprep.mubr.msk.f32.mxu1 %vm3212_vm10, %v6683_v1 }
 0x409   :  { %4035 = vmatmul.mubr.msk.f32.gmra.mrb[106].mxu0 %vm3213_vm9, %v6683_v1 }
 0x40a   :  { %4036 = vmatprep.mubr.msk.f32.mxu0 %vm3217_vm11, %v6683_v1  ;;  %4595 = vmatmul.mubr.msk.f32.gmra.mrb[100].mxu1 %vm3215_vm12, %v6683_v1 }
 0x40b   :  { %4597 = vmatprep.mubr.msk.f32.mxu1 %vm3218_vm15, %v6683_v1 }
 0x40d   :  { %4037 = vmatmul.mubr.msk.f32.gmra.mrb[108].mxu0 %vm3216_vm14, %v6683_v1 }
 0x40e   :  { %4038 = vmatprep.mubr.msk.f32.mxu0 %vm3220_vm1, %v6683_v1  ;;  %4598 = vmatmul.mubr.msk.f32.gmra.mrb[102].mxu1 %vm3221_vm2, %v6683_v1 }
 0x411   :  { %4039 = vmatmul.mubr.msk.f32.gmra.mrb[110].mxu0 %vm3219_vm3, %v6683_v1 }
 0x4c8   :  { %v4241_v32 = vpop.f32.mrb[96].mxu0 }
 0x4c9   :  { %v4242_v18 = vpop.f32.mrb[97].mxu0 }
 0x4ca   :  { %v4243_v35 = vadd.f32 %v4242_v18, %v4241_v32 }
 0x4cc   :  { %v4244_v25 = vpop.f32.mrb[98].mxu0 }
 0x4cd   :  { %v4245_v19 = vpop.f32.mrb[99].mxu0 }
 0x4ce   :  { %v4246_v59 = vadd.f32 %v4245_v19, %v4244_v25 }
 0x4d0   :  { %v4247_v54 = vpop.f32.mrb[100].mxu0 }
 0x4d1   :  { %v4248_v10 = vpop.f32.mrb[101].mxu0 }
 0x4d2   :  { %v4249_v57 = vadd.f32 %v4248_v10, %v4247_v54 }
 0x4d4   :  { %v4250_v51 = vpop.f32.mrb[102].mxu0 }
 0x4d5   :  { %v4251_v56 = vpop.f32.mrb[103].mxu0  ;;  %v4590_v4 = vpop.f32.mrb[96].mxu1 }
 0x4d6   :  { %v4252_v8 = vadd.f32 %v4251_v56, %v4250_v51  ;;  %v3463_v47 = vpop.f32.mrb[97].mxu1  ;;  %v3469_v33 = vadd.f32 %v4590_v4, %v4246_v59 }
 0x4d7   :  { %v3464_v13 = vadd.f32 %v4243_v35, %v3463_v47  ;;  %v3291_v35 = vmul.f32 %v6137_v48, %v3277_v3 }
 0x4d8   :  { %v4253_v44 = vpop.f32.mrb[104].mxu0  ;;  %v3503_v22 = vadd.f32 %v3469_v33, %v3285_v29 }
 0x4d9   :  { %v4254_v58 = vpop.f32.mrb[105].mxu0  ;;  %v3502_v16 = vadd.f32 %v3464_v13, %v3284_v62  ;;  %v4593_v39 = vpop.f32.mrb[98].mxu1 }
 0x4da   :  { %v4255_v20 = vadd.f32 %v4254_v58, %v4253_v44  ;;  %3511 = vst.msk [vmem:[#allocation2 + $0x8] sm:$0xff] %vm154_vm6, %v3503_v22  ;;  %v3473_v42 = vpop.f32.mrb[99].mxu1  ;;  %v3479_v15 = vadd.f32 %v4593_v39, %v4252_v8 }
 0x4db   :  { %3510 = vst.msk [vmem:[#allocation2] sm:$0xff] %vm154_vm6, %v3502_v16  ;;  %v3474_v34 = vadd.f32 %v4249_v57, %v3473_v42 }
 0x4dc   :  { %v4256_v23 = vpop.f32.mrb[106].mxu0  ;;  %v3505_v38 = vadd.f32 %v3479_v15, %v3287_v24 }
 0x4dd   :  { %v4257_v21 = vpop.f32.mrb[107].mxu0  ;;  %v3504_v12 = vadd.f32 %v3474_v34, %v3286_v53  ;;  %v4596_v36 = vpop.f32.mrb[100].mxu1 }
 0x4de   :  { %v4258_v27 = vadd.f32 %v4257_v21, %v4256_v23  ;;  %3513 = vst.msk [vmem:[#allocation2 + $0x18] sm:$0xff] %vm154_vm6, %v3505_v38  ;;  %v3483_v11 = vpop.f32.mrb[101].mxu1 }
 0x4df   :  { %3512 = vst.msk [vmem:[#allocation2 + $0x10] sm:$0xff] %vm154_vm6, %v3504_v12  ;;  %v3484_v50 = vadd.f32 %v4255_v20, %v3483_v11 }
 0x4e0   :  { %v4259_v60 = vpop.f32.mrb[108].mxu0  ;;  %v3489_v41 = vadd.f32 %v4596_v36, %v4258_v27 }
 0x4e1   :  { %v4260_v28 = vpop.f32.mrb[109].mxu0  ;;  %v3506_v61 = vadd.f32 %v3484_v50, %v3288_v31  ;;  %v4599_v30 = vpop.f32.mrb[102].mxu1  ;;  %v6464_v46 = vld [vmem:[#allocation2 + $0x8] sm:$0xff] }
 0x4e2   :  { %v4261_v0 = vadd.f32 %v4260_v28, %v4259_v60  ;;  %v3507_v6 = vadd.f32 %v3489_v41, %v3289_v40  ;;  %v3493_v1 = vpop.f32.mrb[103].mxu1  ;;  %v6467_v37 = vld [vmem:[#allocation2] sm:$0xff]  ;;  %v3530_v7 = vadd.f32 1e-16, %v6464_v46 }
 0x4e3   :  { %3514 = vst.msk [vmem:[#allocation2 + $0x20] sm:$0xff] %vm154_vm6, %v3506_v61  ;;  %v3529_v32 = vadd.f32 1e-16, %v6467_v37 }
 0x4e4   :  { %v4262_v52 = vpop.f32.mrb[110].mxu0  ;;  %3515 = vst.msk [vmem:[#allocation2 + $0x28] sm:$0xff] %vm154_vm6, %v3507_v6  ;;  %v3494_v26 = vadd.f32 %v4261_v0, %v3493_v1  ;;  %4859 = vrcp.f32 %v3530_v7 }
 0x4e5   :  { %v4263_v5 = vpop.f32.mrb[111].mxu0  ;;  %4861 = vrcp.f32 %v3529_v32  ;;  %v6474_v19 = vld [vmem:[#allocation2 + $0x18] sm:$0xff] }
 0x4e6   :  { %v4264_v55 = vadd.f32 %v4263_v5, %v4262_v52  ;;  %v3508_v18 = vadd.f32 %v3494_v26, %v3290_v63  ;;  %v6476_v59 = vld [vmem:[#allocation2 + $0x10] sm:$0xff]  ;;  %v3532_v54 = vadd.f32 1e-16, %v6474_v19 }
 0x4e7   :  { %v3531_v57 = vadd.f32 1e-16, %v6476_v59 }
 0x4e8   :  { %v3499_v25 = vadd.f32 %v4599_v30, %v4264_v55  ;;  %3516 = vst.msk [vmem:[#allocation2 + $0x30] sm:$0xff] %vm154_vm6, %v3508_v18  ;;  %4863 = vrcp.f32 %v3532_v54 }
 0x4e9   :  { %4865 = vrcp.f32 %v3531_v57 }
 0x4ea   :  { %v3509_v10 = vadd.f32 %v3499_v25, %v3291_v35  ;;  %v6484_v48 = vld [vmem:[#allocation2 + $0x20] sm:$0xff] }
 0x4eb   :  { %v6482_v51 = vld [vmem:[#allocation2 + $0x28] sm:$0xff]  ;;  %v3533_v14 = vadd.f32 1e-16, %v6484_v48 }
 0x4ec   :  { %3517 = vst.msk [vmem:[#allocation2 + $0x38] sm:$0xff] %vm154_vm6, %v3509_v10  ;;  %v3534_v56 = vadd.f32 1e-16, %v6482_v51 }
 0x4ee   :  { %4867 = vrcp.f32 %v3534_v56  ;;  %v4860_v8 = vpop.eup %4859 }
 0x4ef   :  { %4869 = vrcp.f32 %v3533_v14  ;;  %v6488_v9 = vld [vmem:[#allocation2 + $0x30] sm:$0xff]  ;;  %v4862_v4 = vpop.eup %4861  ;;  %v3546_v44 = vmul.f32 %v4860_v8, %v3530_v7 }
 0x4f0   :  { %v3535_v47 = vadd.f32 1e-16, %v6488_v9  ;;  %v3545_v29 = vmul.f32 %v4862_v4, %v3529_v32 }
 0x4f1   :  { %v3554_v58 = vsub.f32 2.0, %v3546_v44 }
 0x4f2   :  { %4871 = vrcp.f32 %v3535_v47  ;;  %v4864_v13 = vpop.eup %4863  ;;  %v3553_v17 = vsub.f32 2.0, %v3545_v29 }
 0x4f3   :  { %v6491_v33 = vld [vmem:[#allocation2 + $0x38] sm:$0xff]  ;;  %v4866_v20 = vpop.eup %4865  ;;  %v3562_v22 = vmul.f32 %v4860_v8, %v3554_v58  ;;  %v3548_v2 = vmul.f32 %v4864_v13, %v3532_v54 }
 0x4f4   :  { %v3536_v62 = vadd.f32 1e-16, %v6491_v33  ;;  %v3561_v16 = vmul.f32 %v4862_v4, %v3553_v17  ;;  %v3547_v39 = vmul.f32 %v4866_v20, %v3531_v57 }
 0x4f5   :  { %v3556_v23 = vsub.f32 2.0, %v3548_v2 }
 0x4f6   :  { %4873 = vrcp.f32 %v3536_v62  ;;  %4602 = vmatprep.mubr.msk.f32.mxu1 %vm2218_vm13, %v3561_v16  ;;  %v3555_v24 = vsub.f32 2.0, %v3547_v39 }
 0x4f7   :  { %4603 = vmatmul.mubr.msk.f32.vlgmr.msra.gmra.mrb[104].mxu1 %vm2218_vm13, %v3562_v22  ;;  %v3564_v21 = vmul.f32 %v4864_v13, %v3556_v23 }
 0x4f8   :  { %v4868_v42 = vpop.eup %4867  ;;  %v3563_v34 = vmul.f32 %v4866_v20, %v3555_v24 }
 0x4f9   :  { %v4870_v15 = vpop.eup %4869  ;;  %v3550_v53 = vmul.f32 %v4868_v42, %v3534_v56 }
 0x4fa   :  { %v3549_v43 = vmul.f32 %v4870_v15, %v3533_v14  ;;  %4605 = vmatprep.mubr.msk.f32.mxu1 %vm2218_vm13, %v3563_v34 }
 0x4fb   :  { %v3558_v27 = vsub.f32 2.0, %v3550_v53  ;;  %4606 = vmatmul.mubr.msk.f32.gmra.mrb[106].mxu1 %vm2218_vm13, %v3564_v21 }
 0x4fc   :  { %v3557_v38 = vsub.f32 2.0, %v3549_v43  ;;  %v4872_v45 = vpop.eup %4871 }
 0x4fd   :  { %v3566_v12 = vmul.f32 %v4868_v42, %v3558_v27  ;;  %v3551_v60 = vmul.f32 %v4872_v45, %v3535_v47 }
 0x4fe   :  { %v3565_v36 = vmul.f32 %v4870_v15, %v3557_v38 }
 0x4ff   :  { %v3559_v40 = vsub.f32 2.0, %v3551_v60 }
 0x500   :  { %v4874_v11 = vpop.eup %4873  ;;  %4608 = vmatprep.mubr.msk.f32.mxu1 %vm2218_vm13, %v3565_v36 }
 0x501   :  { %v3552_v41 = vmul.f32 %v4874_v11, %v3536_v62  ;;  %4609 = vmatmul.mubr.msk.f32.gmra.mrb[108].mxu1 %vm2218_vm13, %v3566_v12  ;;  %v3567_v28 = vmul.f32 %v4872_v45, %v3559_v40 }
 0x503   :  { %v3560_v31 = vsub.f32 2.0, %v3552_v41  ;;  %4611 = vmatprep.mubr.msk.f32.mxu1 %vm2218_vm13, %v3567_v28 }
 0x505   :  { %v3568_v50 = vmul.f32 %v4874_v11, %v3560_v31 }
 0x507   :  { %4612 = vmatmul.mubr.msk.f32.gmra.mrb[110].mxu1 %vm2218_vm13, %v3568_v50 }
 0x5ca   :  { %v4604_v0 = vpop.f32.mrb[104].mxu1 }
 0x5cb   :  { %3712 = vrot.lane.b32.xlu0 %v4604_v0, %s5161_s10  ;;  %v3663_v6 = vpop.f32.mrb[105].mxu1 }
 0x5cc   :  { %3710 = vrot.lane.b32.xlu1 %v3663_v6, %s5161_s10 }
 0x5ce   :  { %v4607_v49 = vpop.f32.mrb[106].mxu1 }
 0x5cf   :  { %3716 = vrot.lane.b32.xlu0 %v4607_v49, %s5161_s10  ;;  %v3673_v61 = vpop.f32.mrb[107].mxu1 }
 0x5d0   :  { %3714 = vrot.lane.b32.xlu1 %v3673_v61, %s5161_s10 }
 0x5d4   :  { %v4610_v30 = vpop.f32.mrb[108].mxu1 }
 0x5d5   :  { %3720 = vrot.lane.b32.xlu0 %v4610_v30, %s5161_s10  ;;  %v3683_v52 = vpop.f32.mrb[109].mxu1 }
 0x5d6   :  { %3718 = vrot.lane.b32.xlu1 %v3683_v52, %s5161_s10 }
 0x5da   :  { %v4613_v1 = vpop.f32.mrb[110].mxu1 }
 0x5db   :  { %3724 = vrot.lane.b32.xlu0 %v4613_v1, %s5161_s10  ;;  %v3693_v3 = vpop.f32.mrb[111].mxu1 }
 0x5dc   :  { %3722 = vrot.lane.b32.xlu1 %v3693_v3, %s5161_s10 }
 0x63d   :  { %v3713_v5 = vpop.permute.xlu0 %3712 }
 0x63e   :  { %v3735_v7 = vmul.f32 %v3713_v5, %v6464_v46  ;;  %v3711_v63 = vpop.permute.xlu1 %3710 }
 0x63f   :  { %v3734_v26 = vmul.f32 %v3711_v63, %v6467_v37 }
 0x640   :  { %3752 = vrot.lane.b32.xlu0 %v3735_v7, %s5175_s13 }
 0x641   :  { %3750 = vrot.lane.b32.xlu1 %v3734_v26, %s5175_s13  ;;  %v3717_v55 = vpop.permute.xlu0 %3716 }
 0x642   :  { %v3737_v32 = vmul.f32 %v3717_v55, %v6474_v19  ;;  %v3715_v18 = vpop.permute.xlu1 %3714 }
 0x643   :  { %v3736_v35 = vmul.f32 %v3715_v18, %v6476_v59 }
 0x644   :  { %3756 = vrot.lane.b32.xlu0 %v3737_v32, %s5175_s13 }
 0x645   :  { %3754 = vrot.lane.b32.xlu1 %v3736_v35, %s5175_s13 }
 0x647   :  { %v3721_v25 = vpop.permute.xlu0 %3720 }
 0x648   :  { %v3739_v46 = vmul.f32 %v3721_v25, %v6482_v51  ;;  %v3719_v54 = vpop.permute.xlu1 %3718 }
 0x649   :  { %v3738_v37 = vmul.f32 %v3719_v54, %v6484_v48 }
 0x64a   :  { %3760 = vrot.lane.b32.xlu0 %v3739_v46, %s5175_s13 }
 0x64b   :  { %3758 = vrot.lane.b32.xlu1 %v3738_v37, %s5175_s13 }
 0x64d   :  { %v3725_v10 = vpop.permute.xlu0 %3724 }
 0x64e   :  { %v3741_v19 = vmul.f32 %v3725_v10, %v6491_v33  ;;  %v3723_v57 = vpop.permute.xlu1 %3722 }
 0x64f   :  { %v3740_v59 = vmul.f32 %v3723_v57, %v6488_v9 }
 0x650   :  { %3764 = vrot.lane.b32.xlu0 %v3741_v19, %s5175_s13 }
 0x651   :  { %3762 = vrot.lane.b32.xlu1 %v3740_v59, %s5175_s13 }
 0x6b2   :  { %v3753_v56 = vpop.permute.xlu0 %3752 }
 0x6b3   :  { %3775 = vst.msk [vmem:[#allocation19 + $0x8] sm:$0xff] %vm357_vm0, %v3753_v56  ;;  %v3751_v51 = vpop.permute.xlu1 %3750 }
 0x6b4   :  { %3774 = vst.msk [vmem:[#allocation19] sm:$0xff] %vm357_vm0, %v3751_v51 }
 0x6b6   :  { %v3757_v48 = vpop.permute.xlu0 %3756 }
 0x6b7   :  { %3777 = vst.msk [vmem:[#allocation19 + $0x18] sm:$0xff] %vm357_vm0, %v3757_v48  ;;  %v3755_v14 = vpop.permute.xlu1 %3754 }
 0x6b8   :  { %3776 = vst.msk [vmem:[#allocation19 + $0x10] sm:$0xff] %vm357_vm0, %v3755_v14 }
 0x6bc   :  { %v3761_v8 = vpop.permute.xlu0 %3760 }
 0x6bd   :  { %3779 = vst.msk [vmem:[#allocation19 + $0x28] sm:$0xff] %vm357_vm0, %v3761_v8  ;;  %v3759_v9 = vpop.permute.xlu1 %3758 }
 0x6be   :  { %3778 = vst.msk [vmem:[#allocation19 + $0x20] sm:$0xff] %vm357_vm0, %v3759_v9 }
 0x6c2   :  { %v3765_v4 = vpop.permute.xlu0 %3764 }
 0x6c3   :  { %3781 = vst.msk [vmem:[#allocation19 + $0x38] sm:$0xff] %vm357_vm0, %v3765_v4  ;;  %v3763_v44 = vpop.permute.xlu1 %3762 }
 0x6c4   :  { %3780 = vst.msk [vmem:[#allocation19 + $0x30] sm:$0xff] %vm357_vm0, %v3763_v44 }
 0x6c5   :  { %5133 = shalt.err (!%p5130_p6)
}
 0x6c6   :  { %s5134_s21 = scalar_lea.hbm %s6558_s9, 1024 }
 0x6c7   :  { %p5135_p7 = scmp.ne.s32.totalorder %s6558_s9, %s5134_s21  ;;  %p5138_p8 = scmp.lt.u32.totalorder %s5134_s21, %s6558_s9 }
 0x6c9   :  { %p5140_p9 = pnand %p5138_p8, %p5135_p7 }
 0x6cb   :  { %5143 = shalt.err (!%p5140_p9)
}
 0x6cc   :  { %3793 = dma.vmem_to_hbm [thread:$0]  %s3788_s26, 1024, %s6558_s9, [#allocation6], %s5160_s1, %s5160_s1, %s5161_s10  }
 0x6cd   :  { %5154 = dma.done.wait [#allocation6], 1024  }
 0x6ce   :  { %5155 = vsyncadd [#allocation6], 4294966272 }
 0x6cf   :  { %3797 = vsyncpa [#allocation5], 1 }
 0x6d0   :  { %3798 = vsyncpa [#allocation8], 1 }
 0x6d1   :  { %3799 = vsyncpa [#allocation11], 1 }
 0x6d2   :  { %3800 = vsyncpa [#allocation14], 1 }
 0x6d3   :  { %3801 = vsyncpa [#allocation17], 1 }
 0x6d4   :  { %3802 = vsyncpa [#allocation6], 1 }

</bundles_post_ra>
